<compile_context>
chip_gen: v6e
topology: v6e:2x2x1
jax: 0.10.0
libtpu: 0.0.40
codegen_flags: <defaults>
</compile_context>

<pallas_src>
import functools

import jax
import jax.numpy as jnp
from jax import lax
from jax.experimental import pallas as pl
from jax.experimental.pallas import tpu as pltpu


KEY_DIM = 32      # hard-coded in Transformer.__init__
VALUE_DIM = 32
LN_EPS = 1e-5


def _round_up(x, m):
    return ((x + m - 1) // m) * m


@functools.lru_cache(maxsize=1)
def _vmem_limit():
    """Per-call VMEM budget: generous on v5e/v6e (128 MiB physical VMEM),
    conservative on v7x (64 MiB per TensorCore) and unknown chips."""
    try:
        kind = jax.devices()[0].device_kind.lower()
    except Exception:
        return 32 * 1024 * 1024
    if "v5" in kind or "v6" in kind:
        return 64 * 1024 * 1024
    return 32 * 1024 * 1024


def _pick_tile(m, target):
    """Row-tile size (multiple of 8) and padded row count (multiple of tile).
    Prefers >=2 grid steps when enough rows exist so the v7x megacore and the
    DMA/compute pipeline both get work."""
    if m > target:
        return target, _round_up(m, target)
    if m >= 128:
        tm = _round_up((m + 1) // 2, 8)
        return tm, _round_up(m, tm)
    tm = _round_up(max(m, 8), 8)
    return tm, tm


# ----------------------------------------------------------------------------
# Conv kernels.
#   * _conv_s1_fused_kernel: stride-1 conv, im2col built in VMEM from the
#     once-DMA'd padded image (flattened to 2-D); one K=taps*Cin MXU matmul.
#   * _conv_mm_kernel / _conv_mm_ln_kernel: row-tiled matmul over an XLA-side
#     im2col buffer (used for the strided 7x7 emb conv and the Cin=3 stem conv),
#     optionally with the channel LayerNorm fused into the epilogue.
# ----------------------------------------------------------------------------
def _conv_s1_fused_kernel(xp_ref, w_ref, b_ref, o_ref, *, offsets, m_out):
    xp = xp_ref[0]                                        # (Lp, Cin) bf16
    cols = [xp[off:off + m_out, :] for off in offsets]    # contiguous row slices
    xcol = jnp.concatenate(cols, axis=-1)                 # (m_out, taps*Cin) bf16
    acc = jnp.dot(xcol, w_ref[...], preferred_element_type=jnp.float32)
    o_ref[0] = (acc + b_ref[...]).astype(o_ref.dtype)


def _conv_mm_kernel(xcol_ref, w_ref, b_ref, o_ref):
    acc = jnp.dot(xcol_ref[...], w_ref[...], preferred_element_type=jnp.float32)
    o_ref[...] = (acc + b_ref[...]).astype(o_ref.dtype)


def _conv_mm_ln_kernel(xcol_ref, w_ref, b_ref, g_ref, beta_ref, o_ref, *, eps):
    acc = jnp.dot(xcol_ref[...], w_ref[...], preferred_element_type=jnp.float32)
    y = acc + b_ref[...]
    mean = jnp.mean(y, axis=-1, keepdims=True)
    var = jnp.mean(jnp.square(y - mean), axis=-1, keepdims=True)
    y = (y - mean) / (jnp.sqrt(var) + eps)     # torch ref: (x-mean)/(std+eps), biased var
    o_ref[...] = (y * g_ref[...] + beta_ref[...]).astype(o_ref.dtype)


def conv2d(x, w, b, *, stride=1, padding=0, ln=None, tile_rows=512):
    """x: (B,H,W,Cin) NHWC f32; w: (kh,kw,Cin,Cout); b: (Cout,). Returns NHWC f32.
    MXU operands are bf16 (f32 accumulation)."""
    B, H, W, Cin = x.shape
    kh, kw, _, Cout = w.shape
    Ho = (H + 2 * padding - kh) // stride + 1
    Wo = (W + 2 * padding - kw) // stride + 1
    Kd = kh * kw * Cin
    Hp, Wp = H + 2 * padding, W + 2 * padding

    w2 = w.reshape(Kd, Cout).astype(jnp.bfloat16)
    b2 = b.reshape(1, Cout).astype(jnp.float32)

    # ---- fast path: stride-1 conv, im2col built inside the kernel -----------
    # Reads x from HBM exactly once (no taps-times-inflated im2col buffer).
    Lp = Hp * Wp + kw - 1
    m_out = Ho * Wp                      # rows indexed by yo*Wp+xo (halo cols cropped)
    vmem_est = 2 * (2 * Lp * Cin + m_out * Kd + 2 * Kd * Cout) + 8 * m_out * Cout
    if stride == 1 and ln is None and Cin >= 8 and vmem_est < _vmem_limit() // 2:
        xp = jnp.pad(x, ((0, 0), (padding, padding), (padding, padding), (0, 0)))
        xp = xp.reshape(B, Hp * Wp, Cin)
        xp = jnp.pad(xp, ((0, 0), (0, kw - 1), (0, 0))).astype(jnp.bfloat16)
        offsets = tuple(dy * Wp + dx for dy in range(kh) for dx in range(kw))
        kern = functools.partial(_conv_s1_fused_kernel, offsets=offsets, m_out=m_out)

        flops = 2 * B * m_out * Kd * Cout + 2 * B * m_out * Cout
        bytes_accessed = 2 * (B * Lp * Cin + Kd * Cout) + 4 * (Cout + B * m_out * Cout)
        out = pl.pallas_call(
            kern,
            out_shape=jax.ShapeDtypeStruct((B, m_out, Cout), jnp.float32),
            grid=(B,),
            in_specs=[
                pl.BlockSpec((1, Lp, Cin), lambda i: (i, 0, 0)),
                pl.BlockSpec((Kd, Cout), lambda i: (0, 0)),
                pl.BlockSpec((1, Cout), lambda i: (0, 0)),
            ],
            out_specs=pl.BlockSpec((1, m_out, Cout), lambda i: (i, 0, 0)),
            compiler_params=pltpu.CompilerParams(
                dimension_semantics=("parallel",),
                vmem_limit_bytes=_vmem_limit()),
            cost_estimate=pl.CostEstimate(flops=flops, transcendentals=0,
                                          bytes_accessed=bytes_accessed),
        )(xp, w2, b2)
        # rows are yo*Wp+xo; drop the xo >= Wo halo columns.
        return out.reshape(B, Ho, Wp, Cout)[:, :, :Wo, :]

    # ---- general path: XLA-side im2col + row-tiled MXU matmul ----------------
    # TODO(synk): a manual haloed row-tile DMA would remove the XLA-side im2col
    # for large strided convs too; unnecessary at these shapes (blowup ~3x).
    xp = jnp.pad(x, ((0, 0), (padding, padding), (padding, padding),
                     (0, 0))).astype(jnp.bfloat16)
    cols = []
    for dy in range(kh):
        for dx in range(kw):
            ey = dy + (Ho - 1) * stride + 1
            ex = dx + (Wo - 1) * stride + 1
            cols.append(xp[:, dy:ey:stride, dx:ex:stride, :])
    xcol = jnp.concatenate(cols, axis=-1).reshape(B * Ho * Wo, Kd)

    M = B * Ho * Wo
    tm, m_pad = _pick_tile(M, tile_rows)
    if m_pad != M:
        xcol = jnp.pad(xcol, ((0, m_pad - M), (0, 0)))

    in_specs = [
        pl.BlockSpec((tm, Kd), lambda i: (i, 0)),
        pl.BlockSpec((Kd, Cout), lambda i: (0, 0)),
        pl.BlockSpec((1, Cout), lambda i: (0, 0)),
    ]
    args = [xcol, w2, b2]
    transcendentals = 0
    if ln is None:
        kernel = _conv_mm_kernel
    else:
        g, beta, eps = ln
        kernel = functools.partial(_conv_mm_ln_kernel, eps=float(eps))
        in_specs += [pl.BlockSpec((1, Cout), lambda i: (0, 0)),
                     pl.BlockSpec((1, Cout), lambda i: (0, 0))]
        args += [g.reshape(1, Cout).astype(jnp.float32),
                 beta.reshape(1, Cout).astype(jnp.float32)]
        transcendentals = m_pad                      # one sqrt per output row

    flops = 2 * m_pad * Kd * Cout + 2 * m_pad * Cout
    bytes_accessed = 2 * (m_pad * Kd + Kd * Cout) + 4 * (Cout + m_pad * Cout)

    out = pl.pallas_call(
        kernel,
        out_shape=jax.ShapeDtypeStruct((m_pad, Cout), jnp.float32),
        grid=(m_pad // tm,),
        in_specs=in_specs,
        out_specs=pl.BlockSpec((tm, Cout), lambda i: (i, 0)),
        compiler_params=pltpu.CompilerParams(
            dimension_semantics=("parallel",),
            vmem_limit_bytes=_vmem_limit()),
        cost_estimate=pl.CostEstimate(flops=flops,
                                      transcendentals=transcendentals,
                                      bytes_accessed=bytes_accessed),
    )(*args)
    return out[:M].reshape(B, Ho, Wo, Cout)


# ----------------------------------------------------------------------------
# Linear attention core, channels-last.
#   input : fused (lane-padded) qkv conv output (B, n, >= heads*(2kd+vd))
#   output: (B, n, heads*value_dim), per-head results stored directly.
# ----------------------------------------------------------------------------
def _linear_attn_kernel(qkv_ref, o_ref, *, heads, key_dim, value_dim, scale):
    qkv = qkv_ref[0].astype(jnp.float32)             # (n, c_pad); pad chans unused
    k_off = heads * key_dim
    v_off = 2 * heads * key_dim
    for h in range(heads):                           # static unroll; heads small
        q = qkv[:, h * key_dim:(h + 1) * key_dim] * scale                   # (n, d)
        k = qkv[:, k_off + h * key_dim:k_off + (h + 1) * key_dim] * scale   # (n, d)
        v = qkv[:, v_off + h * value_dim:v_off + (h + 1) * value_dim]       # (n, e)
        k = jax.nn.softmax(k, axis=0)        # softmax over n   (torch dim=-1)
        q = jax.nn.softmax(q, axis=1)        # norm_queries over d (dim=-2)
        # ctx[d,e] = sum_n k[n,d] v[n,e] ; out[n,e] = sum_d q[n,d] ctx[d,e]
        ctx = lax.dot_general(k.astype(jnp.bfloat16), v.astype(jnp.bfloat16),
                              (((0,), (0,)), ((), ())),
                              preferred_element_type=jnp.float32)           # (d, e)
        out_h = jnp.dot(q.astype(jnp.bfloat16), ctx.astype(jnp.bfloat16),
                        preferred_element_type=jnp.float32)                 # (n, e)
        o_ref[0, :, h * value_dim:(h + 1) * value_dim] = out_h.astype(o_ref.dtype)


def linear_attention(qkv, *, heads, key_dim, value_dim):
    B, n, c_pad = qkv.shape
    kern = functools.partial(_linear_attn_kernel, heads=heads, key_dim=key_dim,
                             value_dim=value_dim, scale=float(key_dim) ** -0.25)
    return pl.pallas_call(
        kern,
        out_shape=jax.ShapeDtypeStruct((B, n, heads * value_dim), jnp.float32),
        grid=(B,),
        in_specs=[pl.BlockSpec((1, n, c_pad), lambda b: (b, 0, 0))],
        out_specs=pl.BlockSpec((1, n, heads * value_dim), lambda b: (b, 0, 0)),
        compiler_params=pltpu.CompilerParams(
            dimension_semantics=("parallel",),
            vmem_limit_bytes=_vmem_limit()),
    )(qkv)


# ----------------------------------------------------------------------------
# Fused: attn residual + FeedForward (1x1 conv -> GELU -> 1x1 conv) + residual.
# Tiled over the pixel axis; residual stream kept in f32, MXU operands bf16.
# ----------------------------------------------------------------------------
def _erf(x):
    # Abramowitz & Stegun 7.1.26 (|err| < 1.5e-7); reciprocal + exp go to the EUP.
    a1, a2, a3, a4, a5 = (0.254829592, -0.284496736, 1.421413741,
                          -1.453152027, 1.061405429)
    p = 0.3275911
    ax = jnp.abs(x)
    t = pl.reciprocal(1.0 + p * ax, approx=True)
    poly = ((((a5 * t + a4) * t + a3) * t + a2) * t + a1) * t
    y = 1.0 - poly * jnp.exp(-ax * ax)
    return jnp.where(x >= 0, y, -y)


def _gelu_exact(x):
    # matches torch.nn.GELU() (erf form); Dropout(p=0) == identity
    return 0.5 * x * (1.0 + _erf(x * 0.7071067811865476))


def _ff_residual_kernel(a_ref, r_ref, w1_ref, b1_ref, w2_ref, b2_ref, o_ref):
    h = a_ref[...] + r_ref[...]                                # f32 residual stream
    z = jnp.dot(h.astype(jnp.bfloat16), w1_ref[...],
                preferred_element_type=jnp.float32) + b1_ref[...]
    z = _gelu_exact(z)
    y = jnp.dot(z.astype(jnp.bfloat16), w2_ref[...],
                preferred_element_type=jnp.float32) + b2_ref[...]
    o_ref[...] = (y + h).astype(o_ref.dtype)


def ff_residual(a, r, w1, b1, w2, b2, *, tile_rows=512):
    M, C = a.shape
    Hd = w1.shape[1]
    tm, m_pad = _pick_tile(M, tile_rows)
    if m_pad != M:
        a = jnp.pad(a, ((0, m_pad - M), (0, 0)))
        r = jnp.pad(r, ((0, m_pad - M), (0, 0)))

    flops = 4 * m_pad * C * Hd + 16 * m_pad * Hd + 8 * m_pad * C
    bytes_accessed = 4 * 3 * m_pad * C + 2 * 2 * C * Hd + 4 * (Hd + C)

    out = pl.pallas_call(
        _ff_residual_kernel,
        out_shape=jax.ShapeDtypeStruct((m_pad, C), jnp.float32),
        grid=(m_pad // tm,),
        in_specs=[
            pl.BlockSpec((tm, C), lambda i: (i, 0)),
            pl.BlockSpec((tm, C), lambda i: (i, 0)),
            pl.BlockSpec((C, Hd), lambda i: (0, 0)),
            pl.BlockSpec((1, Hd), lambda i: (0, 0)),
            pl.BlockSpec((Hd, C), lambda i: (0, 0)),
            pl.BlockSpec((1, C), lambda i: (0, 0)),
        ],
        out_specs=pl.BlockSpec((tm, C), lambda i: (i, 0)),
        compiler_params=pltpu.CompilerParams(
            dimension_semantics=("parallel",),
            vmem_limit_bytes=_vmem_limit()),
        cost_estimate=pl.CostEstimate(flops=flops,
                                      transcendentals=3 * m_pad * Hd,
                                      bytes_accessed=bytes_accessed),
    )(a, r, w1.astype(jnp.bfloat16), b1.reshape(1, Hd).astype(jnp.float32),
      w2.astype(jnp.bfloat16), b2.reshape(1, C).astype(jnp.float32))
    return out[:M]


# ----------------------------------------------------------------------------
# Head: global average pool over spatial + Linear  (fully vectorized, one dot).
# ----------------------------------------------------------------------------
def _head_kernel(x_ref, w_ref, b_ref, o_ref):
    pooled = jnp.mean(x_ref[...], axis=1)                      # (B, C)
    o_ref[...] = (jnp.dot(pooled, w_ref[...],
                          preferred_element_type=jnp.float32)
                  + b_ref[...]).astype(o_ref.dtype)


def head(x, w, b):
    B, n, C = x.shape
    NC = w.shape[1]
    return pl.pallas_call(
        _head_kernel,
        out_shape=jax.ShapeDtypeStruct((B, NC), jnp.float32),
        grid=(1,),
        in_specs=[pl.BlockSpec((B, n, C), lambda i: (0, 0, 0)),
                  pl.BlockSpec((C, NC), lambda i: (0, 0)),
                  pl.BlockSpec((1, NC), lambda i: (0, 0))],
        out_specs=pl.BlockSpec((B, NC), lambda i: (0, 0)),
        compiler_params=pltpu.CompilerParams(vmem_limit_bytes=_vmem_limit()),
    )(x, w, b.reshape(1, NC))


# ----------------------------------------------------------------------------
# Parameters (deterministic synthetic init) and full CLTV forward pass.
# ----------------------------------------------------------------------------
def init_params(key, *, emb_dim=64, heads=1, mlp_mult=4, num_classes=10):
    dim0 = emb_dim // 2            # CLTV: dim = emb_dim / 2
    stem0 = dim0 // 2
    ks = jax.random.split(key, 20)

    def w(k, shape, scale=0.1):
        return jax.random.normal(k, shape, jnp.float32) * scale

    return dict(
        stem_w1=w(ks[0], (3, 3, 3, stem0)),           stem_b1=w(ks[1], (stem0,), 0.01),
        stem_w2=w(ks[2], (3, 3, stem0, dim0)),        stem_b2=w(ks[3], (dim0,), 0.01),
        emb_w=w(ks[4], (7, 7, dim0, emb_dim), 0.05),  emb_b=w(ks[5], (emb_dim,), 0.01),
        ln_g=jnp.ones((emb_dim,), jnp.float32),
        ln_b=jnp.zeros((emb_dim,), jnp.float32),
        wq=w(ks[6], (3, 3, emb_dim, KEY_DIM * heads)),    bq=w(ks[7], (KEY_DIM * heads,), 0.01),
        wk=w(ks[8], (3, 3, emb_dim, KEY_DIM * heads)),    bk=w(ks[9], (KEY_DIM * heads,), 0.01),
        wv=w(ks[10], (3, 3, emb_dim, VALUE_DIM * heads)), bv=w(ks[11], (VALUE_DIM * heads,), 0.01),
        wo=w(ks[12], (3, 3, VALUE_DIM * heads, emb_dim)), bo=w(ks[13], (emb_dim,), 0.01),
        w1=w(ks[14], (emb_dim, emb_dim * mlp_mult)),      b1=w(ks[15], (emb_dim * mlp_mult,), 0.01),
        w2=w(ks[16], (emb_dim * mlp_mult, emb_dim)),      b2=w(ks[17], (emb_dim,), 0.01),
        head_w=w(ks[18], (emb_dim, num_classes)),         head_b=w(ks[19], (num_classes,), 0.01),
    )


def cltv_forward(x_nchw, params, *, heads):
    # NCHW -> NHWC once at the boundary; everything downstream is channels-last.
    x = jnp.transpose(x_nchw, (0, 2, 3, 1))

    # Stem: Conv2d(3, dim/2, 3,1,1) -> Conv2d(dim/2, dim, 3,1,1)
    x = conv2d(x, params["stem_w1"], params["stem_b1"], stride=1, padding=1)
    x = conv2d(x, params["stem_w2"], params["stem_b2"], stride=1, padding=1)

    # Embedding conv (7x7, stride 4, pad 3) with fused channel LayerNorm epilogue.
    x = conv2d(x, params["emb_w"], params["emb_b"], stride=4, padding=3,
               ln=(params["ln_g"], params["ln_b"], LN_EPS))
    B, Ho, Wo, C = x.shape
    n = Ho * Wo

    # --- Transformer block ---------------------------------------------------
    # Fused q/k/v 3x3 conv, Cout padded up to a 128-lane multiple so the conv's
    # stores are full-lane; the pad channels are ignored by the attention kernel.
    wqkv = jnp.concatenate([params["wq"], params["wk"], params["wv"]], axis=-1)
    bqkv = jnp.concatenate([params["bq"], params["bk"], params["bv"]], axis=0)
    c_qkv = wqkv.shape[-1]
    c_pad = _round_up(c_qkv, 128)
    if c_pad != c_qkv:
        wqkv = jnp.pad(wqkv, ((0, 0), (0, 0), (0, 0), (0, c_pad - c_qkv)))
        bqkv = jnp.pad(bqkv, ((0, c_pad - c_qkv),))
    qkv = conv2d(x, wqkv, bqkv, stride=1, padding=1)        # (B, Ho, Wo, c_pad)

    attn = linear_attention(qkv.reshape(B, n, c_pad), heads=heads,
                            key_dim=KEY_DIM, value_dim=VALUE_DIM)   # (B, n, heads*vd)
    attn = conv2d(attn.reshape(B, Ho, Wo, heads * VALUE_DIM),
                  params["wo"], params["bo"], stride=1, padding=1)  # (B, Ho, Wo, C)

    # x = attn(x) + x ; x = ff(x) + x   (fused residuals + FF)
    y = ff_residual(attn.reshape(B * n, C), x.reshape(B * n, C),
                    params["w1"], params["b1"], params["w2"], params["b2"])
    y = y.reshape(B, n, C)

    # Head: global average pool + Linear(dim, num_classes)
    return head(y, params["head_w"], params["head_b"])


if __name__ == "__main__":
    B, H, W = 2, 16, 16
    heads, num_classes = 1, 10     # CLTV defaults: heads=1, emb_dim=64, depth=1
    key = jax.random.PRNGKey(0)
    kx, kp = jax.random.split(key)
    x = jax.random.normal(kx, (B, 3, H, W), jnp.float32)   # NCHW like PyTorch
    params = init_params(kp, emb_dim=64, heads=heads, mlp_mult=4,
                         num_classes=num_classes)

    fwd = jax.jit(functools.partial(cltv_forward, heads=heads))
    out = fwd(x, params)
    jax.block_until_ready(out)
    assert out.shape == (B, num_classes) and out.dtype == jnp.float32
    print("KERNEL_OK")
</pallas_src>

<mosaic_0001>
module attributes {stable_mosaic.version = 11 : i64} {
  func.func @_conv_mm_kernel(%arg0: i32, %arg1: memref<256x27xbf16, #tpu.memory_space<vmem>>, %arg2: memref<27x16xbf16, #tpu.memory_space<vmem>>, %arg3: memref<1x16xf32, #tpu.memory_space<vmem>>, %arg4: memref<256x16xf32, #tpu.memory_space<vmem>>) attributes {dimension_semantics = [#tpu.dimension_semantics<parallel>], iteration_bounds = array<i64: 2>, scalar_prefetch = 0 : i64, scratch_operands = 0 : i64, tpu.core_type = #tpu.core_type<tc>, window_params = [{transform_indices = @transform_0, window_bounds = array<i64: 256, 27>}, {pipeline_mode = #tpu.pipeline_mode<synchronous>, transform_indices = @transform_1, window_bounds = array<i64: 27, 16>}, {pipeline_mode = #tpu.pipeline_mode<synchronous>, transform_indices = @transform_2, window_bounds = array<i64: 1, 16>}, {transform_indices = @transform_3, window_bounds = array<i64: 256, 16>}]} {
    %c0 = arith.constant 0 : index
    %c0_0 = arith.constant 0 : index
    %0 = vector.load %arg1[%c0, %c0_0] : memref<256x27xbf16, #tpu.memory_space<vmem>>, vector<256x27xbf16>
    %c0_1 = arith.constant 0 : index
    %c0_2 = arith.constant 0 : index
    %1 = vector.load %arg2[%c0_1, %c0_2] : memref<27x16xbf16, #tpu.memory_space<vmem>>, vector<27x16xbf16>
    %cst = arith.constant dense<0.000000e+00> : vector<256x16xf32>
    %2 = tpu.matmul %0, %1, %cst {dimension_numbers = #tpu.dot_dimension_numbers<[1], [0], [0], [1], [0, 0, 1, 1], [], []>} : vector<256x27xbf16>, vector<27x16xbf16>, vector<256x16xf32> -> vector<256x16xf32>
    %c0_3 = arith.constant 0 : index
    %c0_4 = arith.constant 0 : index
    %3 = vector.load %arg3[%c0_3, %c0_4] : memref<1x16xf32, #tpu.memory_space<vmem>>, vector<1x16xf32>
    %4 = vector.broadcast %3 : vector<1x16xf32> to vector<256x16xf32>
    %5 = arith.addf %2, %4 : vector<256x16xf32>
    %c0_5 = arith.constant 0 : index
    %c0_6 = arith.constant 0 : index
    %6 = vector.load %arg4[%c0_5, %c0_6] : memref<256x16xf32, #tpu.memory_space<vmem>>, vector<256x16xf32>
    tpu.vector_store %arg4[%c0_5, %c0_6], %5 {strides = array<i32>} : memref<256x16xf32, #tpu.memory_space<vmem>>, vector<256x16xf32>,
    return
  }
  func.func @transform_0(%arg0: i32) -> (i32, i32) {
    %c0_i32 = arith.constant 0 : i32
    %c0_i32_0 = arith.constant 0 : i32
    return %arg0, %c0_i32 : i32, i32
  }
  func.func @transform_1(%arg0: i32) -> (i32, i32) {
    %c0_i32 = arith.constant 0 : i32
    %c0_i32_0 = arith.constant 0 : i32
    %c0_i32_1 = arith.constant 0 : i32
    return %c0_i32, %c0_i32_0 : i32, i32
  }
  func.func @transform_2(%arg0: i32) -> (i32, i32) {
    %c0_i32 = arith.constant 0 : i32
    %c0_i32_0 = arith.constant 0 : i32
    %c0_i32_1 = arith.constant 0 : i32
    return %c0_i32, %c0_i32_0 : i32, i32
  }
  func.func @transform_3(%arg0: i32) -> (i32, i32) {
    %c0_i32 = arith.constant 0 : i32
    %c0_i32_0 = arith.constant 0 : i32
    return %arg0, %c0_i32 : i32, i32
  }
}

module attributes {stable_mosaic.version = 11 : i64} {
  func.func @_conv_s1_fused_kernel(%arg0: i32, %arg1: memref<1x326x16xbf16, #tpu.memory_space<vmem>>, %arg2: memref<144x32xbf16, #tpu.memory_space<vmem>>, %arg3: memref<1x32xf32, #tpu.memory_space<vmem>>, %arg4: memref<1x288x32xf32, #tpu.memory_space<vmem>>) attributes {dimension_semantics = [#tpu.dimension_semantics<parallel>], iteration_bounds = array<i64: 2>, scalar_prefetch = 0 : i64, scratch_operands = 0 : i64, tpu.core_type = #tpu.core_type<tc>, window_params = [{transform_indices = @transform_0, window_bounds = array<i64: 1, 326, 16>}, {pipeline_mode = #tpu.pipeline_mode<synchronous>, transform_indices = @transform_1, window_bounds = array<i64: 144, 32>}, {pipeline_mode = #tpu.pipeline_mode<synchronous>, transform_indices = @transform_2, window_bounds = array<i64: 1, 32>}, {transform_indices = @transform_3, window_bounds = array<i64: 1, 288, 32>}]} {
    %c0 = arith.constant 0 : index
    %c0_0 = arith.constant 0 : index
    %c0_1 = arith.constant 0 : index
    %0 = vector.load %arg1[%c0, %c0_0, %c0_1] : memref<1x326x16xbf16, #tpu.memory_space<vmem>>, vector<1x326x16xbf16>
    %1 = vector.shape_cast %0 : vector<1x326x16xbf16> to vector<326x16xbf16>
    %2 = vector.extract_strided_slice %1 {offsets = [0, 0], sizes = [288, 16], strides = [1, 1]} : vector<326x16xbf16> to vector<288x16xbf16>
    %3 = vector.extract_strided_slice %1 {offsets = [1, 0], sizes = [288, 16], strides = [1, 1]} : vector<326x16xbf16> to vector<288x16xbf16>
    %4 = vector.extract_strided_slice %1 {offsets = [2, 0], sizes = [288, 16], strides = [1, 1]} : vector<326x16xbf16> to vector<288x16xbf16>
    %5 = vector.extract_strided_slice %1 {offsets = [18, 0], sizes = [288, 16], strides = [1, 1]} : vector<326x16xbf16> to vector<288x16xbf16>
    %6 = vector.extract_strided_slice %1 {offsets = [19, 0], sizes = [288, 16], strides = [1, 1]} : vector<326x16xbf16> to vector<288x16xbf16>
    %7 = vector.extract_strided_slice %1 {offsets = [20, 0], sizes = [288, 16], strides = [1, 1]} : vector<326x16xbf16> to vector<288x16xbf16>
    %8 = vector.extract_strided_slice %1 {offsets = [36, 0], sizes = [288, 16], strides = [1, 1]} : vector<326x16xbf16> to vector<288x16xbf16>
    %9 = vector.extract_strided_slice %1 {offsets = [37, 0], sizes = [288, 16], strides = [1, 1]} : vector<326x16xbf16> to vector<288x16xbf16>
    %10 = vector.extract_strided_slice %1 {offsets = [38, 0], sizes = [288, 16], strides = [1, 1]} : vector<326x16xbf16> to vector<288x16xbf16>
    %11 = tpu.concatenate %2, %3, %4, %5, %6, %7, %8, %9, %10 in 1 : vector<288x16xbf16>, vector<288x16xbf16>, vector<288x16xbf16>, vector<288x16xbf16>, vector<288x16xbf16>, vector<288x16xbf16>, vector<288x16xbf16>, vector<288x16xbf16>, vector<288x16xbf16> -> vector<288x144xbf16>
    %c0_2 = arith.constant 0 : index
    %c0_3 = arith.constant 0 : index
    %12 = vector.load %arg2[%c0_2, %c0_3] : memref<144x32xbf16, #tpu.memory_space<vmem>>, vector<144x32xbf16>
    %cst = arith.constant dense<0.000000e+00> : vector<288x32xf32>
    %13 = tpu.matmul %11, %12, %cst {dimension_numbers = #tpu.dot_dimension_numbers<[1], [0], [0], [1], [0, 0, 1, 1], [], []>} : vector<288x144xbf16>, vector<144x32xbf16>, vector<288x32xf32> -> vector<288x32xf32>
    %c0_4 = arith.constant 0 : index
    %c0_5 = arith.constant 0 : index
    %14 = vector.load %arg3[%c0_4, %c0_5] : memref<1x32xf32, #tpu.memory_space<vmem>>, vector<1x32xf32>
    %15 = vector.broadcast %14 : vector<1x32xf32> to vector<288x32xf32>
    %16 = arith.addf %13, %15 : vector<288x32xf32>
    %c0_6 = arith.constant 0 : index
    %c0_7 = arith.constant 0 : index
    %c0_8 = arith.constant 0 : index
    %17 = vector.load %arg4[%c0_6, %c0_7, %c0_8] : memref<1x288x32xf32, #tpu.memory_space<vmem>>, vector<1x288x32xf32>
    %18 = vector.shape_cast %17 : vector<1x288x32xf32> to vector<288x32xf32>
    %19 = vector.shape_cast %16 : vector<288x32xf32> to vector<1x288x32xf32>
    tpu.vector_store %arg4[%c0_6, %c0_7, %c0_8], %19 {strides = array<i32>} : memref<1x288x32xf32, #tpu.memory_space<vmem>>, vector<1x288x32xf32>,
    return
  }
  func.func @transform_0(%arg0: i32) -> (i32, i32, i32) {
    %c0_i32 = arith.constant 0 : i32
    %c0_i32_0 = arith.constant 0 : i32
    %c0_i32_1 = arith.constant 0 : i32
    return %arg0, %c0_i32, %c0_i32_0 : i32, i32, i32
  }
  func.func @transform_1(%arg0: i32) -> (i32, i32) {
    %c0_i32 = arith.constant 0 : i32
    %c0_i32_0 = arith.constant 0 : i32
    %c0_i32_1 = arith.constant 0 : i32
    return %c0_i32, %c0_i32_0 : i32, i32
  }
  func.func @transform_2(%arg0: i32) -> (i32, i32) {
    %c0_i32 = arith.constant 0 : i32
    %c0_i32_0 = arith.constant 0 : i32
    %c0_i32_1 = arith.constant 0 : i32
    return %c0_i32, %c0_i32_0 : i32, i32
  }
  func.func @transform_3(%arg0: i32) -> (i32, i32, i32) {
    %c0_i32 = arith.constant 0 : i32
    %c0_i32_0 = arith.constant 0 : i32
    %c0_i32_1 = arith.constant 0 : i32
    return %arg0, %c0_i32, %c0_i32_0 : i32, i32, i32
  }
}

module attributes {stable_mosaic.version = 11 : i64} {
  func.func @_conv_mm_ln_kernel(%arg0: i32, %arg1: memref<32x1568xbf16, #tpu.memory_space<vmem>>, %arg2: memref<1568x64xbf16, #tpu.memory_space<vmem>>, %arg3: memref<1x64xf32, #tpu.memory_space<vmem>>, %arg4: memref<1x64xf32, #tpu.memory_space<vmem>>, %arg5: memref<1x64xf32, #tpu.memory_space<vmem>>, %arg6: memref<32x64xf32, #tpu.memory_space<vmem>>) attributes {dimension_semantics = [#tpu.dimension_semantics<parallel>], iteration_bounds = array<i64: 1>, scalar_prefetch = 0 : i64, scratch_operands = 0 : i64, tpu.core_type = #tpu.core_type<tc>, window_params = [{transform_indices = @transform_0, window_bounds = array<i64: 32, 1568>}, {pipeline_mode = #tpu.pipeline_mode<synchronous>, transform_indices = @transform_1, window_bounds = array<i64: 1568, 64>}, {pipeline_mode = #tpu.pipeline_mode<synchronous>, transform_indices = @transform_2, window_bounds = array<i64: 1, 64>}, {pipeline_mode = #tpu.pipeline_mode<synchronous>, transform_indices = @transform_3, window_bounds = array<i64: 1, 64>}, {pipeline_mode = #tpu.pipeline_mode<synchronous>, transform_indices = @transform_4, window_bounds = array<i64: 1, 64>}, {transform_indices = @transform_5, window_bounds = array<i64: 32, 64>}]} {
    %c0 = arith.constant 0 : index
    %c0_0 = arith.constant 0 : index
    %0 = vector.load %arg1[%c0, %c0_0] : memref<32x1568xbf16, #tpu.memory_space<vmem>>, vector<32x1568xbf16>
    %c0_1 = arith.constant 0 : index
    %c0_2 = arith.constant 0 : index
    %1 = vector.load %arg2[%c0_1, %c0_2] : memref<1568x64xbf16, #tpu.memory_space<vmem>>, vector<1568x64xbf16>
    %cst = arith.constant dense<0.000000e+00> : vector<32x64xf32>
    %2 = tpu.matmul %0, %1, %cst {dimension_numbers = #tpu.dot_dimension_numbers<[1], [0], [0], [1], [0, 0, 1, 1], [], []>} : vector<32x1568xbf16>, vector<1568x64xbf16>, vector<32x64xf32> -> vector<32x64xf32>
    %c0_3 = arith.constant 0 : index
    %c0_4 = arith.constant 0 : index
    %3 = vector.load %arg3[%c0_3, %c0_4] : memref<1x64xf32, #tpu.memory_space<vmem>>, vector<1x64xf32>
    %4 = vector.broadcast %3 : vector<1x64xf32> to vector<32x64xf32>
    %5 = arith.addf %2, %4 : vector<32x64xf32>
    %cst_5 = arith.constant dense<0.000000e+00> : vector<32xf32>
    %6 = vector.multi_reduction <add>, %5, %cst_5 [1] : vector<32x64xf32> to vector<32xf32>
    %7 = vector.shape_cast %6 : vector<32xf32> to vector<32x1xf32>
    %cst_6 = arith.constant 6.400000e+01 : f32
    %8 = vector.broadcast %cst_6 : f32 to vector<32x1xf32>
    %9 = arith.divf %7, %8 : vector<32x1xf32>
    %10 = vector.broadcast %9 : vector<32x1xf32> to vector<32x64xf32>
    %11 = arith.subf %5, %10 : vector<32x64xf32>
    %12 = arith.mulf %11, %11 : vector<32x64xf32>
    %cst_7 = arith.constant dense<0.000000e+00> : vector<32xf32>
    %13 = vector.multi_reduction <add>, %12, %cst_7 [1] : vector<32x64xf32> to vector<32xf32>
    %14 = vector.shape_cast %13 : vector<32xf32> to vector<32x1xf32>
    %cst_8 = arith.constant 6.400000e+01 : f32
    %15 = vector.broadcast %cst_8 : f32 to vector<32x1xf32>
    %16 = arith.divf %14, %15 : vector<32x1xf32>
    %17 = vector.broadcast %9 : vector<32x1xf32> to vector<32x64xf32>
    %18 = arith.subf %5, %17 : vector<32x64xf32>
    %19 = math.sqrt %16 : vector<32x1xf32>
    %cst_9 = arith.constant 9.99999974E-6 : f32
    %20 = vector.broadcast %cst_9 : f32 to vector<32x1xf32>
    %21 = arith.addf %19, %20 : vector<32x1xf32>
    %22 = vector.broadcast %21 : vector<32x1xf32> to vector<32x64xf32>
    %23 = arith.divf %18, %22 : vector<32x64xf32>
    %c0_10 = arith.constant 0 : index
    %c0_11 = arith.constant 0 : index
    %24 = vector.load %arg4[%c0_10, %c0_11] : memref<1x64xf32, #tpu.memory_space<vmem>>, vector<1x64xf32>
    %25 = vector.broadcast %24 : vector<1x64xf32> to vector<32x64xf32>
    %26 = arith.mulf %23, %25 : vector<32x64xf32>
    %c0_12 = arith.constant 0 : index
    %c0_13 = arith.constant 0 : index
    %27 = vector.load %arg5[%c0_12, %c0_13] : memref<1x64xf32, #tpu.memory_space<vmem>>, vector<1x64xf32>
    %28 = vector.broadcast %27 : vector<1x64xf32> to vector<32x64xf32>
    %29 = arith.addf %26, %28 : vector<32x64xf32>
    %c0_14 = arith.constant 0 : index
    %c0_15 = arith.constant 0 : index
    %30 = vector.load %arg6[%c0_14, %c0_15] : memref<32x64xf32, #tpu.memory_space<vmem>>, vector<32x64xf32>
    tpu.vector_store %arg6[%c0_14, %c0_15], %29 {strides = array<i32>} : memref<32x64xf32, #tpu.memory_space<vmem>>, vector<32x64xf32>,
    return
  }
  func.func @transform_0(%arg0: i32) -> (i32, i32) {
    %c0_i32 = arith.constant 0 : i32
    %c0_i32_0 = arith.constant 0 : i32
    return %arg0, %c0_i32 : i32, i32
  }
  func.func @transform_1(%arg0: i32) -> (i32, i32) {
    %c0_i32 = arith.constant 0 : i32
    %c0_i32_0 = arith.constant 0 : i32
    %c0_i32_1 = arith.constant 0 : i32
    return %c0_i32, %c0_i32_0 : i32, i32
  }
  func.func @transform_2(%arg0: i32) -> (i32, i32) {
    %c0_i32 = arith.constant 0 : i32
    %c0_i32_0 = arith.constant 0 : i32
    %c0_i32_1 = arith.constant 0 : i32
    return %c0_i32, %c0_i32_0 : i32, i32
  }
  func.func @transform_3(%arg0: i32) -> (i32, i32) {
    %c0_i32 = arith.constant 0 : i32
    %c0_i32_0 = arith.constant 0 : i32
    %c0_i32_1 = arith.constant 0 : i32
    return %c0_i32, %c0_i32_0 : i32, i32
  }
  func.func @transform_4(%arg0: i32) -> (i32, i32) {
    %c0_i32 = arith.constant 0 : i32
    %c0_i32_0 = arith.constant 0 : i32
    %c0_i32_1 = arith.constant 0 : i32
    return %c0_i32, %c0_i32_0 : i32, i32
  }
  func.func @transform_5(%arg0: i32) -> (i32, i32) {
    %c0_i32 = arith.constant 0 : i32
    %c0_i32_0 = arith.constant 0 : i32
    return %arg0, %c0_i32 : i32, i32
  }
}

module attributes {stable_mosaic.version = 11 : i64} {
  func.func @_conv_s1_fused_kernel(%arg0: i32, %arg1: memref<1x38x64xbf16, #tpu.memory_space<vmem>>, %arg2: memref<576x128xbf16, #tpu.memory_space<vmem>>, %arg3: memref<1x128xf32, #tpu.memory_space<vmem>>, %arg4: memref<1x24x128xf32, #tpu.memory_space<vmem>>) attributes {dimension_semantics = [#tpu.dimension_semantics<parallel>], iteration_bounds = array<i64: 2>, scalar_prefetch = 0 : i64, scratch_operands = 0 : i64, tpu.core_type = #tpu.core_type<tc>, window_params = [{transform_indices = @transform_0, window_bounds = array<i64: 1, 38, 64>}, {pipeline_mode = #tpu.pipeline_mode<synchronous>, transform_indices = @transform_1, window_bounds = array<i64: 576, 128>}, {pipeline_mode = #tpu.pipeline_mode<synchronous>, transform_indices = @transform_2, window_bounds = array<i64: 1, 128>}, {transform_indices = @transform_3, window_bounds = array<i64: 1, 24, 128>}]} {
    %c0 = arith.constant 0 : index
    %c0_0 = arith.constant 0 : index
    %c0_1 = arith.constant 0 : index
    %0 = vector.load %arg1[%c0, %c0_0, %c0_1] : memref<1x38x64xbf16, #tpu.memory_space<vmem>>, vector<1x38x64xbf16>
    %1 = vector.shape_cast %0 : vector<1x38x64xbf16> to vector<38x64xbf16>
    %2 = vector.extract_strided_slice %1 {offsets = [0, 0], sizes = [24, 64], strides = [1, 1]} : vector<38x64xbf16> to vector<24x64xbf16>
    %3 = vector.extract_strided_slice %1 {offsets = [1, 0], sizes = [24, 64], strides = [1, 1]} : vector<38x64xbf16> to vector<24x64xbf16>
    %4 = vector.extract_strided_slice %1 {offsets = [2, 0], sizes = [24, 64], strides = [1, 1]} : vector<38x64xbf16> to vector<24x64xbf16>
    %5 = vector.extract_strided_slice %1 {offsets = [6, 0], sizes = [24, 64], strides = [1, 1]} : vector<38x64xbf16> to vector<24x64xbf16>
    %6 = vector.extract_strided_slice %1 {offsets = [7, 0], sizes = [24, 64], strides = [1, 1]} : vector<38x64xbf16> to vector<24x64xbf16>
    %7 = vector.extract_strided_slice %1 {offsets = [8, 0], sizes = [24, 64], strides = [1, 1]} : vector<38x64xbf16> to vector<24x64xbf16>
    %8 = vector.extract_strided_slice %1 {offsets = [12, 0], sizes = [24, 64], strides = [1, 1]} : vector<38x64xbf16> to vector<24x64xbf16>
    %9 = vector.extract_strided_slice %1 {offsets = [13, 0], sizes = [24, 64], strides = [1, 1]} : vector<38x64xbf16> to vector<24x64xbf16>
    %10 = vector.extract_strided_slice %1 {offsets = [14, 0], sizes = [24, 64], strides = [1, 1]} : vector<38x64xbf16> to vector<24x64xbf16>
    %11 = tpu.concatenate %2, %3, %4, %5, %6, %7, %8, %9, %10 in 1 : vector<24x64xbf16>, vector<24x64xbf16>, vector<24x64xbf16>, vector<24x64xbf16>, vector<24x64xbf16>, vector<24x64xbf16>, vector<24x64xbf16>, vector<24x64xbf16>, vector<24x64xbf16> -> vector<24x576xbf16>
    %c0_2 = arith.constant 0 : index
    %c0_3 = arith.constant 0 : index
    %12 = vector.load %arg2[%c0_2, %c0_3] : memref<576x128xbf16, #tpu.memory_space<vmem>>, vector<576x128xbf16>
    %cst = arith.constant dense<0.000000e+00> : vector<24x128xf32>
    %13 = tpu.matmul %11, %12, %cst {dimension_numbers = #tpu.dot_dimension_numbers<[1], [0], [0], [1], [0, 0, 1, 1], [], []>} : vector<24x576xbf16>, vector<576x128xbf16>, vector<24x128xf32> -> vector<24x128xf32>
    %c0_4 = arith.constant 0 : index
    %c0_5 = arith.constant 0 : index
    %14 = vector.load %arg3[%c0_4, %c0_5] : memref<1x128xf32, #tpu.memory_space<vmem>>, vector<1x128xf32>
    %15 = vector.broadcast %14 : vector<1x128xf32> to vector<24x128xf32>
    %16 = arith.addf %13, %15 : vector<24x128xf32>
    %c0_6 = arith.constant 0 : index
    %c0_7 = arith.constant 0 : index
    %c0_8 = arith.constant 0 : index
    %17 = vector.load %arg4[%c0_6, %c0_7, %c0_8] : memref<1x24x128xf32, #tpu.memory_space<vmem>>, vector<1x24x128xf32>
    %18 = vector.shape_cast %17 : vector<1x24x128xf32> to vector<24x128xf32>
    %19 = vector.shape_cast %16 : vector<24x128xf32> to vector<1x24x128xf32>
    tpu.vector_store %arg4[%c0_6, %c0_7, %c0_8], %19 {strides = array<i32>} : memref<1x24x128xf32, #tpu.memory_space<vmem>>, vector<1x24x128xf32>,
    return
  }
  func.func @transform_0(%arg0: i32) -> (i32, i32, i32) {
    %c0_i32 = arith.constant 0 : i32
    %c0_i32_0 = arith.constant 0 : i32
    %c0_i32_1 = arith.constant 0 : i32
    return %arg0, %c0_i32, %c0_i32_0 : i32, i32, i32
  }
  func.func @transform_1(%arg0: i32) -> (i32, i32) {
    %c0_i32 = arith.constant 0 : i32
    %c0_i32_0 = arith.constant 0 : i32
    %c0_i32_1 = arith.constant 0 : i32
    return %c0_i32, %c0_i32_0 : i32, i32
  }
  func.func @transform_2(%arg0: i32) -> (i32, i32) {
    %c0_i32 = arith.constant 0 : i32
    %c0_i32_0 = arith.constant 0 : i32
    %c0_i32_1 = arith.constant 0 : i32
    return %c0_i32, %c0_i32_0 : i32, i32
  }
  func.func @transform_3(%arg0: i32) -> (i32, i32, i32) {
    %c0_i32 = arith.constant 0 : i32
    %c0_i32_0 = arith.constant 0 : i32
    %c0_i32_1 = arith.constant 0 : i32
    return %arg0, %c0_i32, %c0_i32_0 : i32, i32, i32
  }
}

module attributes {stable_mosaic.version = 11 : i64} {
  func.func @_linear_attn_kernel(%arg0: i32, %arg1: memref<1x16x128xf32, #tpu.memory_space<vmem>>, %arg2: memref<1x16x32xf32, #tpu.memory_space<vmem>>) attributes {dimension_semantics = [#tpu.dimension_semantics<parallel>], iteration_bounds = array<i64: 2>, scalar_prefetch = 0 : i64, scratch_operands = 0 : i64, tpu.core_type = #tpu.core_type<tc>, window_params = [{transform_indices = @transform_0, window_bounds = array<i64: 1, 16, 128>}, {transform_indices = @transform_1, window_bounds = array<i64: 1, 16, 32>}]} {
    %c0 = arith.constant 0 : index
    %c0_0 = arith.constant 0 : index
    %c0_1 = arith.constant 0 : index
    %0 = vector.load %arg1[%c0, %c0_0, %c0_1] : memref<1x16x128xf32, #tpu.memory_space<vmem>>, vector<1x16x128xf32>
    %1 = vector.shape_cast %0 : vector<1x16x128xf32> to vector<16x128xf32>
    %2 = vector.extract_strided_slice %1 {offsets = [0, 0], sizes = [16, 32], strides = [1, 1]} : vector<16x128xf32> to vector<16x32xf32>
    %cst = arith.constant 0.420448214 : f32
    %3 = vector.broadcast %cst : f32 to vector<16x32xf32>
    %4 = arith.mulf %2, %3 : vector<16x32xf32>
    %5 = vector.extract_strided_slice %1 {offsets = [0, 32], sizes = [16, 32], strides = [1, 1]} : vector<16x128xf32> to vector<16x32xf32>
    %cst_2 = arith.constant 0.420448214 : f32
    %6 = vector.broadcast %cst_2 : f32 to vector<16x32xf32>
    %7 = arith.mulf %5, %6 : vector<16x32xf32>
    %8 = vector.extract_strided_slice %1 {offsets = [0, 64], sizes = [16, 32], strides = [1, 1]} : vector<16x128xf32> to vector<16x32xf32>
    %cst_3 = arith.constant dense<0xFF800000> : vector<32xf32>
    %9 = vector.multi_reduction <maximumf>, %7, %cst_3 [0] : vector<16x32xf32> to vector<32xf32>
    %cst_4 = arith.constant 0xFF800000 : f32
    %10 = vector.broadcast %cst_4 : f32 to vector<32xf32>
    %11 = arith.maximumf %10, %9 : vector<32xf32>
    %12 = vector.shape_cast %11 : vector<32xf32> to vector<1x32xf32>
    %13 = vector.broadcast %12 : vector<1x32xf32> to vector<16x32xf32>
    %14 = arith.subf %7, %13 : vector<16x32xf32>
    %15 = math.exp %14 : vector<16x32xf32>
    %cst_5 = arith.constant dense<0.000000e+00> : vector<32xf32>
    %16 = vector.multi_reduction <add>, %15, %cst_5 [0] : vector<16x32xf32> to vector<32xf32>
    %17 = vector.shape_cast %16 : vector<32xf32> to vector<1x32xf32>
    %18 = vector.broadcast %17 : vector<1x32xf32> to vector<16x32xf32>
    %19 = arith.divf %15, %18 : vector<16x32xf32>
    %cst_6 = arith.constant dense<0xFF800000> : vector<16xf32>
    %20 = vector.multi_reduction <maximumf>, %4, %cst_6 [1] : vector<16x32xf32> to vector<16xf32>
    %cst_7 = arith.constant 0xFF800000 : f32
    %21 = vector.broadcast %cst_7 : f32 to vector<16xf32>
    %22 = arith.maximumf %21, %20 : vector<16xf32>
    %23 = vector.shape_cast %22 : vector<16xf32> to vector<16x1xf32>
    %24 = vector.broadcast %23 : vector<16x1xf32> to vector<16x32xf32>
    %25 = arith.subf %4, %24 : vector<16x32xf32>
    %26 = math.exp %25 : vector<16x32xf32>
    %cst_8 = arith.constant dense<0.000000e+00> : vector<16xf32>
    %27 = vector.multi_reduction <add>, %26, %cst_8 [1] : vector<16x32xf32> to vector<16xf32>
    %28 = vector.shape_cast %27 : vector<16xf32> to vector<16x1xf32>
    %29 = vector.broadcast %28 : vector<16x1xf32> to vector<16x32xf32>
    %30 = arith.divf %26, %29 : vector<16x32xf32>
    %31 = arith.truncf %19 : vector<16x32xf32> to vector<16x32xbf16>
    %32 = arith.truncf %8 : vector<16x32xf32> to vector<16x32xbf16>
    %cst_9 = arith.constant dense<0.000000e+00> : vector<32x32xf32>
    %33 = tpu.matmul %31, %32, %cst_9 {dimension_numbers = #tpu.dot_dimension_numbers<[0], [0], [1], [1], [0, 1, 1, 1], [], []>} : vector<16x32xbf16>, vector<16x32xbf16>, vector<32x32xf32> -> vector<32x32xf32>
    %34 = arith.truncf %30 : vector<16x32xf32> to vector<16x32xbf16>
    %35 = arith.truncf %33 : vector<32x32xf32> to vector<32x32xbf16>
    %cst_10 = arith.constant dense<0.000000e+00> : vector<16x32xf32>
    %36 = tpu.matmul %34, %35, %cst_10 {dimension_numbers = #tpu.dot_dimension_numbers<[1], [0], [0], [1], [0, 0, 1, 1], [], []>} : vector<16x32xbf16>, vector<32x32xbf16>, vector<16x32xf32> -> vector<16x32xf32>
    %c0_11 = arith.constant 0 : index
    %c0_12 = arith.constant 0 : index
    %c0_13 = arith.constant 0 : index
    %37 = vector.load %arg2[%c0_11, %c0_12, %c0_13] : memref<1x16x32xf32, #tpu.memory_space<vmem>>, vector<1x16x32xf32>
    %38 = vector.shape_cast %37 : vector<1x16x32xf32> to vector<16x32xf32>
    %39 = vector.shape_cast %36 : vector<16x32xf32> to vector<1x16x32xf32>
    tpu.vector_store %arg2[%c0_11, %c0_12, %c0_13], %39 {strides = array<i32>} : memref<1x16x32xf32, #tpu.memory_space<vmem>>, vector<1x16x32xf32>,
    return
  }
  func.func @transform_0(%arg0: i32) -> (i32, i32, i32) {
    %c0_i32 = arith.constant 0 : i32
    %c0_i32_0 = arith.constant 0 : i32
    %c0_i32_1 = arith.constant 0 : i32
    return %arg0, %c0_i32, %c0_i32_0 : i32, i32, i32
  }
  func.func @transform_1(%arg0: i32) -> (i32, i32, i32) {
    %c0_i32 = arith.constant 0 : i32
    %c0_i32_0 = arith.constant 0 : i32
    %c0_i32_1 = arith.constant 0 : i32
    return %arg0, %c0_i32, %c0_i32_0 : i32, i32, i32
  }
}

module attributes {stable_mosaic.version = 11 : i64} {
  func.func @_conv_s1_fused_kernel(%arg0: i32, %arg1: memref<1x38x32xbf16, #tpu.memory_space<vmem>>, %arg2: memref<288x64xbf16, #tpu.memory_space<vmem>>, %arg3: memref<1x64xf32, #tpu.memory_space<vmem>>, %arg4: memref<1x24x64xf32, #tpu.memory_space<vmem>>) attributes {dimension_semantics = [#tpu.dimension_semantics<parallel>], iteration_bounds = array<i64: 2>, scalar_prefetch = 0 : i64, scratch_operands = 0 : i64, tpu.core_type = #tpu.core_type<tc>, window_params = [{transform_indices = @transform_0, window_bounds = array<i64: 1, 38, 32>}, {pipeline_mode = #tpu.pipeline_mode<synchronous>, transform_indices = @transform_1, window_bounds = array<i64: 288, 64>}, {pipeline_mode = #tpu.pipeline_mode<synchronous>, transform_indices = @transform_2, window_bounds = array<i64: 1, 64>}, {transform_indices = @transform_3, window_bounds = array<i64: 1, 24, 64>}]} {
    %c0 = arith.constant 0 : index
    %c0_0 = arith.constant 0 : index
    %c0_1 = arith.constant 0 : index
    %0 = vector.load %arg1[%c0, %c0_0, %c0_1] : memref<1x38x32xbf16, #tpu.memory_space<vmem>>, vector<1x38x32xbf16>
    %1 = vector.shape_cast %0 : vector<1x38x32xbf16> to vector<38x32xbf16>
    %2 = vector.extract_strided_slice %1 {offsets = [0, 0], sizes = [24, 32], strides = [1, 1]} : vector<38x32xbf16> to vector<24x32xbf16>
    %3 = vector.extract_strided_slice %1 {offsets = [1, 0], sizes = [24, 32], strides = [1, 1]} : vector<38x32xbf16> to vector<24x32xbf16>
    %4 = vector.extract_strided_slice %1 {offsets = [2, 0], sizes = [24, 32], strides = [1, 1]} : vector<38x32xbf16> to vector<24x32xbf16>
    %5 = vector.extract_strided_slice %1 {offsets = [6, 0], sizes = [24, 32], strides = [1, 1]} : vector<38x32xbf16> to vector<24x32xbf16>
    %6 = vector.extract_strided_slice %1 {offsets = [7, 0], sizes = [24, 32], strides = [1, 1]} : vector<38x32xbf16> to vector<24x32xbf16>
    %7 = vector.extract_strided_slice %1 {offsets = [8, 0], sizes = [24, 32], strides = [1, 1]} : vector<38x32xbf16> to vector<24x32xbf16>
    %8 = vector.extract_strided_slice %1 {offsets = [12, 0], sizes = [24, 32], strides = [1, 1]} : vector<38x32xbf16> to vector<24x32xbf16>
    %9 = vector.extract_strided_slice %1 {offsets = [13, 0], sizes = [24, 32], strides = [1, 1]} : vector<38x32xbf16> to vector<24x32xbf16>
    %10 = vector.extract_strided_slice %1 {offsets = [14, 0], sizes = [24, 32], strides = [1, 1]} : vector<38x32xbf16> to vector<24x32xbf16>
    %11 = tpu.concatenate %2, %3, %4, %5, %6, %7, %8, %9, %10 in 1 : vector<24x32xbf16>, vector<24x32xbf16>, vector<24x32xbf16>, vector<24x32xbf16>, vector<24x32xbf16>, vector<24x32xbf16>, vector<24x32xbf16>, vector<24x32xbf16>, vector<24x32xbf16> -> vector<24x288xbf16>
    %c0_2 = arith.constant 0 : index
    %c0_3 = arith.constant 0 : index
    %12 = vector.load %arg2[%c0_2, %c0_3] : memref<288x64xbf16, #tpu.memory_space<vmem>>, vector<288x64xbf16>
    %cst = arith.constant dense<0.000000e+00> : vector<24x64xf32>
    %13 = tpu.matmul %11, %12, %cst {dimension_numbers = #tpu.dot_dimension_numbers<[1], [0], [0], [1], [0, 0, 1, 1], [], []>} : vector<24x288xbf16>, vector<288x64xbf16>, vector<24x64xf32> -> vector<24x64xf32>
    %c0_4 = arith.constant 0 : index
    %c0_5 = arith.constant 0 : index
    %14 = vector.load %arg3[%c0_4, %c0_5] : memref<1x64xf32, #tpu.memory_space<vmem>>, vector<1x64xf32>
    %15 = vector.broadcast %14 : vector<1x64xf32> to vector<24x64xf32>
    %16 = arith.addf %13, %15 : vector<24x64xf32>
    %c0_6 = arith.constant 0 : index
    %c0_7 = arith.constant 0 : index
    %c0_8 = arith.constant 0 : index
    %17 = vector.load %arg4[%c0_6, %c0_7, %c0_8] : memref<1x24x64xf32, #tpu.memory_space<vmem>>, vector<1x24x64xf32>
    %18 = vector.shape_cast %17 : vector<1x24x64xf32> to vector<24x64xf32>
    %19 = vector.shape_cast %16 : vector<24x64xf32> to vector<1x24x64xf32>
    tpu.vector_store %arg4[%c0_6, %c0_7, %c0_8], %19 {strides = array<i32>} : memref<1x24x64xf32, #tpu.memory_space<vmem>>, vector<1x24x64xf32>,
    return
  }
  func.func @transform_0(%arg0: i32) -> (i32, i32, i32) {
    %c0_i32 = arith.constant 0 : i32
    %c0_i32_0 = arith.constant 0 : i32
    %c0_i32_1 = arith.constant 0 : i32
    return %arg0, %c0_i32, %c0_i32_0 : i32, i32, i32
  }
  func.func @transform_1(%arg0: i32) -> (i32, i32) {
    %c0_i32 = arith.constant 0 : i32
    %c0_i32_0 = arith.constant 0 : i32
    %c0_i32_1 = arith.constant 0 : i32
    return %c0_i32, %c0_i32_0 : i32, i32
  }
  func.func @transform_2(%arg0: i32) -> (i32, i32) {
    %c0_i32 = arith.constant 0 : i32
    %c0_i32_0 = arith.constant 0 : i32
    %c0_i32_1 = arith.constant 0 : i32
    return %c0_i32, %c0_i32_0 : i32, i32
  }
  func.func @transform_3(%arg0: i32) -> (i32, i32, i32) {
    %c0_i32 = arith.constant 0 : i32
    %c0_i32_0 = arith.constant 0 : i32
    %c0_i32_1 = arith.constant 0 : i32
    return %arg0, %c0_i32, %c0_i32_0 : i32, i32, i32
  }
}

module attributes {stable_mosaic.version = 11 : i64} {
  func.func @_ff_residual_kernel(%arg0: i32, %arg1: memref<32x64xf32, #tpu.memory_space<vmem>>, %arg2: memref<32x64xf32, #tpu.memory_space<vmem>>, %arg3: memref<64x256xbf16, #tpu.memory_space<vmem>>, %arg4: memref<1x256xf32, #tpu.memory_space<vmem>>, %arg5: memref<256x64xbf16, #tpu.memory_space<vmem>>, %arg6: memref<1x64xf32, #tpu.memory_space<vmem>>, %arg7: memref<32x64xf32, #tpu.memory_space<vmem>>) attributes {dimension_semantics = [#tpu.dimension_semantics<parallel>], iteration_bounds = array<i64: 1>, scalar_prefetch = 0 : i64, scratch_operands = 0 : i64, tpu.core_type = #tpu.core_type<tc>, window_params = [{transform_indices = @transform_0, window_bounds = array<i64: 32, 64>}, {transform_indices = @transform_1, window_bounds = array<i64: 32, 64>}, {pipeline_mode = #tpu.pipeline_mode<synchronous>, transform_indices = @transform_2, window_bounds = array<i64: 64, 256>}, {pipeline_mode = #tpu.pipeline_mode<synchronous>, transform_indices = @transform_3, window_bounds = array<i64: 1, 256>}, {pipeline_mode = #tpu.pipeline_mode<synchronous>, transform_indices = @transform_4, window_bounds = array<i64: 256, 64>}, {pipeline_mode = #tpu.pipeline_mode<synchronous>, transform_indices = @transform_5, window_bounds = array<i64: 1, 64>}, {transform_indices = @transform_6, window_bounds = array<i64: 32, 64>}]} {
    %c0 = arith.constant 0 : index
    %c0_0 = arith.constant 0 : index
    %0 = vector.load %arg1[%c0, %c0_0] : memref<32x64xf32, #tpu.memory_space<vmem>>, vector<32x64xf32>
    %c0_1 = arith.constant 0 : index
    %c0_2 = arith.constant 0 : index
    %1 = vector.load %arg2[%c0_1, %c0_2] : memref<32x64xf32, #tpu.memory_space<vmem>>, vector<32x64xf32>
    %2 = arith.addf %0, %1 : vector<32x64xf32>
    %3 = arith.truncf %2 : vector<32x64xf32> to vector<32x64xbf16>
    %c0_3 = arith.constant 0 : index
    %c0_4 = arith.constant 0 : index
    %4 = vector.load %arg3[%c0_3, %c0_4] : memref<64x256xbf16, #tpu.memory_space<vmem>>, vector<64x256xbf16>
    %cst = arith.constant dense<0.000000e+00> : vector<32x256xf32>
    %5 = tpu.matmul %3, %4, %cst {dimension_numbers = #tpu.dot_dimension_numbers<[1], [0], [0], [1], [0, 0, 1, 1], [], []>} : vector<32x64xbf16>, vector<64x256xbf16>, vector<32x256xf32> -> vector<32x256xf32>
    %c0_5 = arith.constant 0 : index
    %c0_6 = arith.constant 0 : index
    %6 = vector.load %arg4[%c0_5, %c0_6] : memref<1x256xf32, #tpu.memory_space<vmem>>, vector<1x256xf32>
    %7 = vector.broadcast %6 : vector<1x256xf32> to vector<32x256xf32>
    %8 = arith.addf %5, %7 : vector<32x256xf32>
    %cst_7 = arith.constant 5.000000e-01 : f32
    %9 = vector.broadcast %cst_7 : f32 to vector<32x256xf32>
    %10 = arith.mulf %9, %8 : vector<32x256xf32>
    %cst_8 = arith.constant 0.707106769 : f32
    %11 = vector.broadcast %cst_8 : f32 to vector<32x256xf32>
    %12 = arith.mulf %8, %11 : vector<32x256xf32>
    %13 = math.absf %12 : vector<32x256xf32>
    %cst_9 = arith.constant 0.327591091 : f32
    %14 = vector.broadcast %cst_9 : f32 to vector<32x256xf32>
    %15 = arith.mulf %14, %13 : vector<32x256xf32>
    %cst_10 = arith.constant 1.000000e+00 : f32
    %16 = vector.broadcast %cst_10 : f32 to vector<32x256xf32>
    %17 = arith.addf %16, %15 : vector<32x256xf32>
    %18 = tpu.reciprocal %17 {approx = true} : vector<32x256xf32> -> vector<32x256xf32>
    %cst_11 = arith.constant 1.06140542 : f32
    %19 = vector.broadcast %cst_11 : f32 to vector<32x256xf32>
    %20 = arith.mulf %19, %18 : vector<32x256xf32>
    %cst_12 = arith.constant -1.45315206 : f32
    %21 = vector.broadcast %cst_12 : f32 to vector<32x256xf32>
    %22 = arith.addf %20, %21 : vector<32x256xf32>
    %23 = arith.mulf %22, %18 : vector<32x256xf32>
    %cst_13 = arith.constant 1.42141378 : f32
    %24 = vector.broadcast %cst_13 : f32 to vector<32x256xf32>
    %25 = arith.addf %23, %24 : vector<32x256xf32>
    %26 = arith.mulf %25, %18 : vector<32x256xf32>
    %cst_14 = arith.constant -0.284496725 : f32
    %27 = vector.broadcast %cst_14 : f32 to vector<32x256xf32>
    %28 = arith.addf %26, %27 : vector<32x256xf32>
    %29 = arith.mulf %28, %18 : vector<32x256xf32>
    %cst_15 = arith.constant 0.254829586 : f32
    %30 = vector.broadcast %cst_15 : f32 to vector<32x256xf32>
    %31 = arith.addf %29, %30 : vector<32x256xf32>
    %32 = arith.mulf %31, %18 : vector<32x256xf32>
    %cst_16 = arith.constant 0.000000e+00 : f32
    %33 = vector.broadcast %cst_16 : f32 to vector<32x256xf32>
    %34 = arith.subf %33, %13 : vector<32x256xf32>
    %35 = arith.mulf %34, %13 : vector<32x256xf32>
    %36 = math.exp %35 : vector<32x256xf32>
    %37 = arith.mulf %32, %36 : vector<32x256xf32>
    %cst_17 = arith.constant 1.000000e+00 : f32
    %38 = vector.broadcast %cst_17 : f32 to vector<32x256xf32>
    %39 = arith.subf %38, %37 : vector<32x256xf32>
    %cst_18 = arith.constant 0.000000e+00 : f32
    %40 = vector.broadcast %cst_18 : f32 to vector<32x256xf32>
    %41 = arith.cmpf oge, %12, %40 : vector<32x256xf32>
    %cst_19 = arith.constant 0.000000e+00 : f32
    %42 = vector.broadcast %cst_19 : f32 to vector<32x256xf32>
    %43 = arith.subf %42, %39 : vector<32x256xf32>
    %44 = arith.select %41, %39, %43 : vector<32x256xi1>, vector<32x256xf32>
    %cst_20 = arith.constant 1.000000e+00 : f32
    %45 = vector.broadcast %cst_20 : f32 to vector<32x256xf32>
    %46 = arith.addf %45, %44 : vector<32x256xf32>
    %47 = arith.mulf %10, %46 : vector<32x256xf32>
    %48 = arith.truncf %47 : vector<32x256xf32> to vector<32x256xbf16>
    %c0_21 = arith.constant 0 : index
    %c0_22 = arith.constant 0 : index
    %49 = vector.load %arg5[%c0_21, %c0_22] : memref<256x64xbf16, #tpu.memory_space<vmem>>, vector<256x64xbf16>
    %cst_23 = arith.constant dense<0.000000e+00> : vector<32x64xf32>
    %50 = tpu.matmul %48, %49, %cst_23 {dimension_numbers = #tpu.dot_dimension_numbers<[1], [0], [0], [1], [0, 0, 1, 1], [], []>} : vector<32x256xbf16>, vector<256x64xbf16>, vector<32x64xf32> -> vector<32x64xf32>
    %c0_24 = arith.constant 0 : index
    %c0_25 = arith.constant 0 : index
    %51 = vector.load %arg6[%c0_24, %c0_25] : memref<1x64xf32, #tpu.memory_space<vmem>>, vector<1x64xf32>
    %52 = vector.broadcast %51 : vector<1x64xf32> to vector<32x64xf32>
    %53 = arith.addf %50, %52 : vector<32x64xf32>
    %54 = arith.addf %53, %2 : vector<32x64xf32>
    %c0_26 = arith.constant 0 : index
    %c0_27 = arith.constant 0 : index
    %55 = vector.load %arg7[%c0_26, %c0_27] : memref<32x64xf32, #tpu.memory_space<vmem>>, vector<32x64xf32>
    tpu.vector_store %arg7[%c0_26, %c0_27], %54 {strides = array<i32>} : memref<32x64xf32, #tpu.memory_space<vmem>>, vector<32x64xf32>,
    return
  }
  func.func @transform_0(%arg0: i32) -> (i32, i32) {
    %c0_i32 = arith.constant 0 : i32
    %c0_i32_0 = arith.constant 0 : i32
    return %arg0, %c0_i32 : i32, i32
  }
  func.func @transform_1(%arg0: i32) -> (i32, i32) {
    %c0_i32 = arith.constant 0 : i32
    %c0_i32_0 = arith.constant 0 : i32
    return %arg0, %c0_i32 : i32, i32
  }
  func.func @transform_2(%arg0: i32) -> (i32, i32) {
    %c0_i32 = arith.constant 0 : i32
    %c0_i32_0 = arith.constant 0 : i32
    %c0_i32_1 = arith.constant 0 : i32
    return %c0_i32, %c0_i32_0 : i32, i32
  }
  func.func @transform_3(%arg0: i32) -> (i32, i32) {
    %c0_i32 = arith.constant 0 : i32
    %c0_i32_0 = arith.constant 0 : i32
    %c0_i32_1 = arith.constant 0 : i32
    return %c0_i32, %c0_i32_0 : i32, i32
  }
  func.func @transform_4(%arg0: i32) -> (i32, i32) {
    %c0_i32 = arith.constant 0 : i32
    %c0_i32_0 = arith.constant 0 : i32
    %c0_i32_1 = arith.constant 0 : i32
    return %c0_i32, %c0_i32_0 : i32, i32
  }
  func.func @transform_5(%arg0: i32) -> (i32, i32) {
    %c0_i32 = arith.constant 0 : i32
    %c0_i32_0 = arith.constant 0 : i32
    %c0_i32_1 = arith.constant 0 : i32
    return %c0_i32, %c0_i32_0 : i32, i32
  }
  func.func @transform_6(%arg0: i32) -> (i32, i32) {
    %c0_i32 = arith.constant 0 : i32
    %c0_i32_0 = arith.constant 0 : i32
    return %arg0, %c0_i32 : i32, i32
  }
}

module attributes {stable_mosaic.version = 11 : i64} {
  func.func @_head_kernel(%arg0: i32, %arg1: memref<2x16x64xf32, #tpu.memory_space<vmem>>, %arg2: memref<64x10xf32, #tpu.memory_space<vmem>>, %arg3: memref<1x10xf32, #tpu.memory_space<vmem>>, %arg4: memref<2x10xf32, #tpu.memory_space<vmem>>) attributes {dimension_semantics = [#tpu.dimension_semantics<arbitrary>], iteration_bounds = array<i64: 1>, scalar_prefetch = 0 : i64, scratch_operands = 0 : i64, tpu.core_type = #tpu.core_type<tc>, window_params = [{pipeline_mode = #tpu.pipeline_mode<synchronous>, transform_indices = @transform_0, window_bounds = array<i64: 2, 16, 64>}, {pipeline_mode = #tpu.pipeline_mode<synchronous>, transform_indices = @transform_1, window_bounds = array<i64: 64, 10>}, {pipeline_mode = #tpu.pipeline_mode<synchronous>, transform_indices = @transform_2, window_bounds = array<i64: 1, 10>}, {pipeline_mode = #tpu.pipeline_mode<synchronous>, transform_indices = @transform_3, window_bounds = array<i64: 2, 10>}]} {
    %c0 = arith.constant 0 : index
    %c0_0 = arith.constant 0 : index
    %c0_1 = arith.constant 0 : index
    %0 = vector.load %arg1[%c0, %c0_0, %c0_1] : memref<2x16x64xf32, #tpu.memory_space<vmem>>, vector<2x16x64xf32>
    %cst = arith.constant dense<0.000000e+00> : vector<2x64xf32>
    %1 = vector.multi_reduction <add>, %0, %cst [1] : vector<2x16x64xf32> to vector<2x64xf32>
    %cst_2 = arith.constant 1.600000e+01 : f32
    %2 = vector.broadcast %cst_2 : f32 to vector<2x64xf32>
    %3 = arith.divf %1, %2 : vector<2x64xf32>
    %c0_3 = arith.constant 0 : index
    %c0_4 = arith.constant 0 : index
    %4 = vector.load %arg2[%c0_3, %c0_4] : memref<64x10xf32, #tpu.memory_space<vmem>>, vector<64x10xf32>
    %cst_5 = arith.constant dense<0.000000e+00> : vector<2x10xf32>
    %5 = tpu.matmul %3, %4, %cst_5 {dimension_numbers = #tpu.dot_dimension_numbers<[1], [0], [0], [1], [0, 0, 1, 1], [], []>} : vector<2x64xf32>, vector<64x10xf32>, vector<2x10xf32> -> vector<2x10xf32>
    %c0_6 = arith.constant 0 : index
    %c0_7 = arith.constant 0 : index
    %6 = vector.load %arg3[%c0_6, %c0_7] : memref<1x10xf32, #tpu.memory_space<vmem>>, vector<1x10xf32>
    %7 = vector.broadcast %6 : vector<1x10xf32> to vector<2x10xf32>
    %8 = arith.addf %5, %7 : vector<2x10xf32>
    %c0_8 = arith.constant 0 : index
    %c0_9 = arith.constant 0 : index
    %9 = vector.load %arg4[%c0_8, %c0_9] : memref<2x10xf32, #tpu.memory_space<vmem>>, vector<2x10xf32>
    tpu.vector_store %arg4[%c0_8, %c0_9], %8 {strides = array<i32>} : memref<2x10xf32, #tpu.memory_space<vmem>>, vector<2x10xf32>,
    return
  }
  func.func @transform_0(%arg0: i32) -> (i32, i32, i32) {
    %c0_i32 = arith.constant 0 : i32
    %c0_i32_0 = arith.constant 0 : i32
    %c0_i32_1 = arith.constant 0 : i32
    %c0_i32_2 = arith.constant 0 : i32
    return %c0_i32, %c0_i32_0, %c0_i32_1 : i32, i32, i32
  }
  func.func @transform_1(%arg0: i32) -> (i32, i32) {
    %c0_i32 = arith.constant 0 : i32
    %c0_i32_0 = arith.constant 0 : i32
    %c0_i32_1 = arith.constant 0 : i32
    return %c0_i32, %c0_i32_0 : i32, i32
  }
  func.func @transform_2(%arg0: i32) -> (i32, i32) {
    %c0_i32 = arith.constant 0 : i32
    %c0_i32_0 = arith.constant 0 : i32
    %c0_i32_1 = arith.constant 0 : i32
    return %c0_i32, %c0_i32_0 : i32, i32
  }
  func.func @transform_3(%arg0: i32) -> (i32, i32) {
    %c0_i32 = arith.constant 0 : i32
    %c0_i32_0 = arith.constant 0 : i32
    %c0_i32_1 = arith.constant 0 : i32
    return %c0_i32, %c0_i32_0 : i32, i32
  }
}

</mosaic_0001>

<bundles_post_ra>
// kernel: cltv_forward.8
= control target key start
LH: loop header
LB: loop body
LE: loop exit
PB: predicated region body
PF: predicated region fallthrough
CT: control target
= control target key end

     0   :  { %s775_s12 = smov 0   ;;  %s939_s0 = inlined_call_operand.vmem [shape: bf16[512,27], index: 0, kind: input, shape index: {}]   ;;  %s940_s1 = inlined_call_operand.vmem [shape: bf16[27,16], index: 1, kind: input, shape index: {}]   ;;  %s941_s2 = inlined_call_operand.vmem [shape: f32[1,16], index: 2, kind: input, shape index: {}]   ;;  %s942_s3 = inlined_call_operand.vmem [shape: f32[512,16], index: 3, kind: output, shape index: {}]  }
   0x1 LB: > { %s615_s13 = sadd.s32 4294967295, %s752_s12   ;;  %p619_p0 = scmp.ge.s32.totalorder %s752_s12, 1  ;;  %s752_s12 = sphi %s775_s12, %s13_s12  }
   0x2   : > { %p138_p1 = scmp.lt.s32.totalorder %s752_s12, 3 }
   0x4   : > { %p139_p2 = pnand %p619_p0, %p138_p1 }
   0x5   : > { %s620_s16 = sshll.u32 (!%p139_p2), %s615_s13, 5 }
   0x6   : > { %142 = sbr.rel (%p139_p2) target bundleno = 250 (0xfa), region = 32  ;;  %p163_p3 = scmp.lt.s32.totalorder (!%p139_p2), %s620_s16, 63 }
   0xb   : > { %v728_v0 = vld [vmem:[%s940_s1 + $0x8] sm:$0x3f]   ;;  %vm358_vm0 = vcmask 1044480   ;;  %vm359_vm1 = vcmask 1045504   ;;  %v754_v1 = vmov 65535   ;;  %v729_v5 = vld [vmem:[%s940_s1] sm:$0xff]  }
   0xc   : > { %v360_v2 = vsel %vm358_vm0, 4294967295, %v754_v1  ;;  %s944_s16 = smov (!%p163_p3, %s620_s16), 63  ;;  %vm309_vm2 = vcmask 220160   ;;  %v833_v22 = vld [vmem:[%s941_s2] ss:$0 sm:$0xff]  ;;  %vm526_vm3 = vcmask 130048  }
   0xd   : > { %v361_v3 = vsel %vm359_vm1, %v360_v2, 0  ;;  %s621_s19 = sshll.u32 %s944_s16, 2  ;;  %s623_s23 = sshll.u32 %s944_s16, 3 }
   0xe   : > { %v363_v4 = vand.u32 %v728_v0, %v361_v3  ;;  %s795_s22 = scalar_lea.vmem %s939_s0, %s621_s19  ;;  %s838_s28 = scalar_lea.vmem %s942_s3, %s623_s23 }
   0xf   : > { %v730_v6 = vld [vmem:[%s795_s22] sm:$0xff]   ;;  %v732_v8 = vld [vmem:[%s795_s22 + $0x8] sm:$0xff]   ;;  %v734_v10 = vld [vmem:[%s795_s22 + $0x10] sm:$0xff]  }
  0x10   : > { %679 = vmatprep.subr.bf16.mxu0 %v363_v4  ;;  %715 = vmatprep.subr.bf16.mxu1 %v363_v4  ;;  %v731_v7 = vld [vmem:[%s795_s22 + $0x40] sm:$0xff]   ;;  %v733_v9 = vld [vmem:[%s795_s22 + $0x48] sm:$0xff]   ;;  %v735_v11 = vld [vmem:[%s795_s22 + $0x50] sm:$0xff]  }
  0x11   : > { %680 = vmatpush3.bf16.msra.mxu0 %v363_v4  ;;  %717 = vmatpush3.bf16.msra.mxu1 %v363_v4  ;;  %v736_v12 = vld [vmem:[%s795_s22 + $0x18] sm:$0xff]   ;;  %v738_v14 = vld [vmem:[%s795_s22 + $0x20] sm:$0xff]   ;;  %v740_v16 = vld [vmem:[%s795_s22 + $0x28] sm:$0xff]  }
  0x12   : > { %681 = vmatprep.subr.bf16.mxu0 %v729_v5  ;;  %716 = vmatprep.subr.bf16.mxu1 %v729_v5  ;;  %v737_v13 = vld [vmem:[%s795_s22 + $0x58] sm:$0xff]   ;;  %v739_v15 = vld [vmem:[%s795_s22 + $0x60] sm:$0xff]   ;;  %v741_v17 = vld [vmem:[%s795_s22 + $0x68] sm:$0xff]  }
  0x13   : > { %683 = vmatprep.mubr.msk.bf16.mxu0 %vm309_vm2, %v730_v6  ;;  %699 = vmatprep.mubr.msk.bf16.mxu1 %vm309_vm2, %v731_v7  ;;  %v742_v18 = vld [vmem:[%s795_s22 + $0x30] sm:$0xff]   ;;  %v744_v20 = vld [vmem:[%s795_s22 + $0x38] sm:$0xff]  }
  0x14   : > { %v743_v19 = vld [vmem:[%s795_s22 + $0x70] sm:$0xff]   ;;  %v745_v21 = vld [vmem:[%s795_s22 + $0x78] sm:$0xff]  }
  0x15   : > { %682 = vmatpush3.bf16.msra.mxu0 %v729_v5  ;;  %718 = vmatpush3.bf16.msra.mxu1 %v729_v5 }
  0x18   : > { %684 = vmatmul.mubr.msk.bf16.vlgmr.msra.gmra.mxu0 %vm309_vm2, %v732_v8  ;;  %700 = vmatmul.mubr.msk.bf16.vlgmr.msra.gmra.mxu1 %vm309_vm2, %v733_v9 }
  0x19   : > { %687 = vmatprep.mubr.msk.bf16.mxu0 %vm309_vm2, %v734_v10  ;;  %703 = vmatprep.mubr.msk.bf16.mxu1 %vm309_vm2, %v735_v11 }
  0x20   : > { %688 = vmatmul.mubr.msk.bf16.gmra.mxu0 %vm309_vm2, %v736_v12  ;;  %704 = vmatmul.mubr.msk.bf16.gmra.mxu1 %vm309_vm2, %v737_v13 }
  0x21   : > { %691 = vmatprep.mubr.msk.bf16.mxu0 %vm309_vm2, %v738_v14  ;;  %707 = vmatprep.mubr.msk.bf16.mxu1 %vm309_vm2, %v739_v15 }
  0x28   : > { %692 = vmatmul.mubr.msk.bf16.gmra.mxu0 %vm309_vm2, %v740_v16  ;;  %708 = vmatmul.mubr.msk.bf16.gmra.mxu1 %vm309_vm2, %v741_v17 }
  0x29   : > { %695 = vmatprep.mubr.msk.bf16.mxu0 %vm309_vm2, %v742_v18  ;;  %711 = vmatprep.mubr.msk.bf16.mxu1 %vm309_vm2, %v743_v19 }
  0x30   : > { %696 = vmatmul.mubr.msk.bf16.gmra.mxu0 %vm309_vm2, %v744_v20  ;;  %712 = vmatmul.mubr.msk.bf16.gmra.mxu1 %vm309_vm2, %v745_v21 }
  0xd8   : > { %v685_v23 = vpop.f32.mrf.mxu0  ;;  %v701_v24 = vpop.f32.mrf.mxu1 }
  0xd9   : > { %v408_v25 = vadd.f32 %v685_v23, %v833_v22  ;;  %v472_v26 = vadd.f32 %v701_v24, %v833_v22 }
  0xda   : > { %v399_v27 = vpop.f32.mrf.mxu0  ;;  %v463_v28 = vpop.f32.mrf.mxu1 }
  0xdb   : > { %529 = vst.msk [vmem:[%s838_s28 + $0x10] sm:$0xff] %vm526_vm3, %v408_v25  ;;  %545 = vst.msk [vmem:[%s838_s28 + $0x90] sm:$0xff] %vm526_vm3, %v472_v26  ;;  %v400_v29 = vadd.f32 %v833_v22, %v399_v27  ;;  %v464_v30 = vadd.f32 %v833_v22, %v463_v28 }
  0xdc   : > { %v686_v31 = vpop.f32.mrf.mxu0  ;;  %v702_v32 = vpop.f32.mrf.mxu1 }
  0xdd   : > { %527 = vst.msk [vmem:[%s838_s28] sm:$0xff] %vm526_vm3, %v400_v29  ;;  %543 = vst.msk [vmem:[%s838_s28 + $0x80] sm:$0xff] %vm526_vm3, %v464_v30  ;;  %v411_v33 = vadd.f32 %v686_v31, %v833_v22  ;;  %v475_v34 = vadd.f32 %v702_v32, %v833_v22 }
  0xde   : > { %v402_v35 = vpop.f32.mrf.mxu0  ;;  %v466_v36 = vpop.f32.mrf.mxu1 }
  0xdf   : > { %530 = vst.msk [vmem:[%s838_s28 + $0x18] sm:$0xff] %vm526_vm3, %v411_v33  ;;  %546 = vst.msk [vmem:[%s838_s28 + $0x98] sm:$0xff] %vm526_vm3, %v475_v34  ;;  %v403_v37 = vadd.f32 %v833_v22, %v402_v35  ;;  %v467_v38 = vadd.f32 %v833_v22, %v466_v36 }
  0xe0   : > { %v689_v39 = vpop.f32.mrf.mxu0  ;;  %v705_v40 = vpop.f32.mrf.mxu1 }
  0xe1   : > { %528 = vst.msk [vmem:[%s838_s28 + $0x8] sm:$0xff] %vm526_vm3, %v403_v37  ;;  %544 = vst.msk [vmem:[%s838_s28 + $0x88] sm:$0xff] %vm526_vm3, %v467_v38  ;;  %v424_v41 = vadd.f32 %v689_v39, %v833_v22  ;;  %v488_v42 = vadd.f32 %v705_v40, %v833_v22 }
  0xe2   : > { %v415_v43 = vpop.f32.mrf.mxu0  ;;  %v479_v44 = vpop.f32.mrf.mxu1 }
  0xe3   : > { %533 = vst.msk [vmem:[%s838_s28 + $0x30] sm:$0xff] %vm526_vm3, %v424_v41  ;;  %549 = vst.msk [vmem:[%s838_s28 + $0xb0] sm:$0xff] %vm526_vm3, %v488_v42  ;;  %v416_v45 = vadd.f32 %v833_v22, %v415_v43  ;;  %v480_v46 = vadd.f32 %v833_v22, %v479_v44 }
  0xe4   : > { %v690_v47 = vpop.f32.mrf.mxu0  ;;  %v706_v48 = vpop.f32.mrf.mxu1 }
  0xe5   : > { %531 = vst.msk [vmem:[%s838_s28 + $0x20] sm:$0xff] %vm526_vm3, %v416_v45  ;;  %547 = vst.msk [vmem:[%s838_s28 + $0xa0] sm:$0xff] %vm526_vm3, %v480_v46  ;;  %v427_v49 = vadd.f32 %v690_v47, %v833_v22  ;;  %v491_v50 = vadd.f32 %v706_v48, %v833_v22 }
  0xe6   : > { %v418_v51 = vpop.f32.mrf.mxu0  ;;  %v482_v52 = vpop.f32.mrf.mxu1 }
  0xe7   : > { %534 = vst.msk [vmem:[%s838_s28 + $0x38] sm:$0xff] %vm526_vm3, %v427_v49  ;;  %550 = vst.msk [vmem:[%s838_s28 + $0xb8] sm:$0xff] %vm526_vm3, %v491_v50  ;;  %v419_v53 = vadd.f32 %v833_v22, %v418_v51  ;;  %v483_v54 = vadd.f32 %v833_v22, %v482_v52 }
  0xe8   : > { %v693_v55 = vpop.f32.mrf.mxu0  ;;  %v709_v56 = vpop.f32.mrf.mxu1 }
  0xe9   : > { %532 = vst.msk [vmem:[%s838_s28 + $0x28] sm:$0xff] %vm526_vm3, %v419_v53  ;;  %548 = vst.msk [vmem:[%s838_s28 + $0xa8] sm:$0xff] %vm526_vm3, %v483_v54  ;;  %v440_v57 = vadd.f32 %v693_v55, %v833_v22  ;;  %v504_v58 = vadd.f32 %v709_v56, %v833_v22 }
  0xea   : > { %v431_v59 = vpop.f32.mrf.mxu0  ;;  %v495_v60 = vpop.f32.mrf.mxu1 }
  0xeb   : > { %537 = vst.msk [vmem:[%s838_s28 + $0x50] sm:$0xff] %vm526_vm3, %v440_v57  ;;  %553 = vst.msk [vmem:[%s838_s28 + $0xd0] sm:$0xff] %vm526_vm3, %v504_v58  ;;  %v432_v61 = vadd.f32 %v833_v22, %v431_v59  ;;  %v496_v62 = vadd.f32 %v833_v22, %v495_v60 }
  0xec   : > { %v694_v63 = vpop.f32.mrf.mxu0  ;;  %v710_v0 = vpop.f32.mrf.mxu1 }
  0xed   : > { %535 = vst.msk [vmem:[%s838_s28 + $0x40] sm:$0xff] %vm526_vm3, %v432_v61  ;;  %551 = vst.msk [vmem:[%s838_s28 + $0xc0] sm:$0xff] %vm526_vm3, %v496_v62  ;;  %v443_v1 = vadd.f32 %v694_v63, %v833_v22  ;;  %v507_v2 = vadd.f32 %v710_v0, %v833_v22 }
  0xee   : > { %v434_v3 = vpop.f32.mrf.mxu0  ;;  %v498_v4 = vpop.f32.mrf.mxu1 }
  0xef   : > { %538 = vst.msk [vmem:[%s838_s28 + $0x58] sm:$0xff] %vm526_vm3, %v443_v1  ;;  %554 = vst.msk [vmem:[%s838_s28 + $0xd8] sm:$0xff] %vm526_vm3, %v507_v2  ;;  %v435_v5 = vadd.f32 %v833_v22, %v434_v3  ;;  %v499_v6 = vadd.f32 %v833_v22, %v498_v4 }
  0xf0   : > { %v697_v7 = vpop.f32.mrf.mxu0  ;;  %v713_v8 = vpop.f32.mrf.mxu1 }
  0xf1   : > { %536 = vst.msk [vmem:[%s838_s28 + $0x48] sm:$0xff] %vm526_vm3, %v435_v5  ;;  %552 = vst.msk [vmem:[%s838_s28 + $0xc8] sm:$0xff] %vm526_vm3, %v499_v6  ;;  %v456_v9 = vadd.f32 %v697_v7, %v833_v22  ;;  %v520_v10 = vadd.f32 %v713_v8, %v833_v22 }
  0xf2   : > { %v447_v11 = vpop.f32.mrf.mxu0  ;;  %v511_v12 = vpop.f32.mrf.mxu1 }
  0xf3   : > { %541 = vst.msk [vmem:[%s838_s28 + $0x70] sm:$0xff] %vm526_vm3, %v456_v9  ;;  %557 = vst.msk [vmem:[%s838_s28 + $0xf0] sm:$0xff] %vm526_vm3, %v520_v10  ;;  %v448_v13 = vadd.f32 %v833_v22, %v447_v11  ;;  %v512_v14 = vadd.f32 %v833_v22, %v511_v12 }
  0xf4   : > { %v698_v15 = vpop.f32.mrf.mxu0  ;;  %v714_v16 = vpop.f32.mrf.mxu1 }
  0xf5   : > { %539 = vst.msk [vmem:[%s838_s28 + $0x60] sm:$0xff] %vm526_vm3, %v448_v13  ;;  %555 = vst.msk [vmem:[%s838_s28 + $0xe0] sm:$0xff] %vm526_vm3, %v512_v14  ;;  %v459_v17 = vadd.f32 %v698_v15, %v833_v22  ;;  %v523_v18 = vadd.f32 %v714_v16, %v833_v22 }
  0xf6   : > { %v450_v19 = vpop.f32.mrf.mxu0  ;;  %v514_v20 = vpop.f32.mrf.mxu1 }
  0xf7   : > { %542 = vst.msk [vmem:[%s838_s28 + $0x78] sm:$0xff] %vm526_vm3, %v459_v17  ;;  %558 = vst.msk [vmem:[%s838_s28 + $0xf8] sm:$0xff] %vm526_vm3, %v523_v18  ;;  %v451_v21 = vadd.f32 %v833_v22, %v450_v19  ;;  %v515_v23 = vadd.f32 %v833_v22, %v514_v20 }
  0xf9   : > { %540 = vst.msk [vmem:[%s838_s28 + $0x68] sm:$0xff] %vm526_vm3, %v451_v21  ;;  %556 = vst.msk [vmem:[%s838_s28 + $0xe8] sm:$0xff] %vm526_vm3, %v515_v23 }
  0xfa PF: > { %s13_s12 = sadd.s32 1, %s752_s12  }
  0xfb   : > { %p10_p4 = scmp.ge.s32.totalorder %s13_s12, 4  }
  0xfd   :  { %12 = sbr.rel (!%p10_p4) target bundleno = 1 (0x1), region = 62 }

// kernel: cltv_forward.9
= control target key start
LH: loop header
LB: loop body
LE: loop exit
PB: predicated region body
PF: predicated region fallthrough
CT: control target
= control target key end

     0   :  { %s1865_s12 = smov 0   ;;  %s3195_s0 = inlined_call_operand.vmem [shape: bf16[2,326,16], index: 0, kind: input, shape index: {}]   ;;  %s3196_s1 = inlined_call_operand.vmem [shape: bf16[144,32], index: 1, kind: input, shape index: {}]   ;;  %s3197_s2 = inlined_call_operand.vmem [shape: f32[1,32], index: 2, kind: input, shape index: {}]   ;;  %s3198_s3 = inlined_call_operand.vmem [shape: f32[2,288,32], index: 3, kind: output, shape index: {}]  }
   0x1 LB: > { %s1691_s13 = sadd.s32 4294967295, %s1835_s12   ;;  %p1695_p0 = scmp.ge.s32.totalorder %s1835_s12, 1  ;;  %s1835_s12 = sphi %s1865_s12, %s13_s12  }
   0x2   : > { %p137_p1 = scmp.lt.s32.totalorder %s1835_s12, 3 }
   0x4   : > { %p138_p2 = pnand %p1695_p0, %p137_p1 }
   0x5   : > { %p161_p3 = scmp.lt.s32.totalorder (!%p138_p2), %s1691_s13, 1  ;;  %s1838_s26 = smov (!%p138_p2), 48  }
   0x6   : > { %141 = sbr.rel (%p138_p2) target bundleno = 584 (0x248), region = 32  ;;  %s1839_s27 = smov (!%p138_p2), 32  }
   0x7   : > { %s1840_s28 = smov (!%p138_p2), 80   ;;  %s1841_s29 = smov (!%p138_p2), 16  }
   0x8   : > { %s1842_s7 = smov (!%p138_p2), 64   ;;  %s1843_s10 = smov (!%p138_p2), 96  }
   0x9   : > { %s1844_s15 = smov (!%p138_p2), 112  }
   0xb   : > { %s3236_s13 = smov (!%p161_p3, %s1691_s13), 1  ;;  %v1837_v0 = vmov 0   ;;  %v1801_v1 = vld [vmem:[%s3196_s1 + $0x38] sm:$0xff]   ;;  %vm491_vm0 = vcmask 1046528   ;;  %v1802_v2 = vld [vmem:[%s3196_s1 + $0x30] sm:$0xff]   ;;  %vm733_vm1 = vcmask 1045504  }
   0xc   : > { %1423 = vmatprep.subr.bf16.mxu0 %v1837_v0  ;;  %1751 = vmatprep.subr.bf16.mxu1 %v1837_v0  ;;  %s1769_s16 = smul.u32 164, %s3236_s13  ;;  %v1803_v3 = vld [vmem:[%s3196_s1 + $0x28] sm:$0xff]   ;;  %vm306_vm2 = vsmask.f32 7424  ;;  %v1804_v13 = vld [vmem:[%s3196_s1 + $0x20] sm:$0xff]   ;;  %vm975_vm5 = vcmask 1044480  }
   0xd   : > { %1424 = vmatpush1.bf16.msra.mxu0 %v1801_v1  ;;  %1760 = vmatpush1.bf16.msra.mxu1 %v1801_v1  ;;  %vm611_vm3 = vsmask.f32 6400  ;;  %vm853_vm4 = vsmask.f32 5376  ;;  %vm1013_vm6 = vcmask 130048   ;;  %vm1050_vm7 = vcmask 261120  }
   0xe   : > { %s1887_s21 = scalar_lea.vmem %s3195_s0, %s1769_s16  ;;  %1425 = vmatprep.subr.bf16.mxu0 %v1837_v0  ;;  %1752 = vmatprep.subr.bf16.mxu1 %v1837_v0  ;;  %vm1087_vm8 = vcmask 392192   ;;  %vm1124_vm9 = vcmask 523264   ;;  %vm1161_vm10 = vcmask 654336   ;;  %vm1198_vm11 = vcmask 785408   ;;  %s1770_s18 = smul.u32 288, %s3236_s13 }
   0xf   : > { %v1895_v4 = vld [vmem:[%s1887_s21 + $0x8] sm:$0xff]   ;;  %v1898_v5 = vld [vmem:[%s1887_s21 + $0x10] sm:$0xff]   ;;  %v1901_v6 = vld [vmem:[%s1887_s21] sm:$0xff]   ;;  %vm1235_vm12 = vcmask 916480  }
  0x10   : > { %v493_v7 = vrot.slane %v1895_v4, 1  ;;  %v495_v8 = vrot.slane %v1898_v5, 1  ;;  %v734_v9 = vrot.slane %v1895_v4, 2  ;;  %v735_v10 = vrot.slane %v1898_v5, 2  ;;  %v1911_v12 = vld [vmem:[%s1887_s21 + $0x48] sm:$0xff]   ;;  %v1922_v15 = vld [vmem:[%s1887_s21 + $0x50] sm:$0xff]   ;;  %s3053_s22 = scalar_lea.vmem %s3198_s3, %s1770_s18 }
  0x11   : > { %1426 = vmatpush1.bf16.msra.mxu0 %v1802_v2  ;;  %1761 = vmatpush1.bf16.msra.mxu1 %v1802_v2  ;;  %v492_v11 = vrot.slane %v1901_v6, 1  ;;  %v308_v16 = vshrl.u32 %v1901_v6, 16  ;;  %v3202_v18 = vrot.slane %v1911_v12, 1  ;;  %v1930_v19 = vld [vmem:[%s1887_s21 + $0x58] sm:$0xff]   ;;  %v310_v20 = vshll.u32 %v1901_v6, 16  ;;  %v1989_v46 = vld [vmem:[%s1887_s21 + $0x60] sm:$0xff]  }
  0x12   : > { %1427 = vmatprep.subr.bf16.mxu0 %v1837_v0  ;;  %1753 = vmatprep.subr.bf16.mxu1 %v1837_v0  ;;  %v1919_v14 = vsel %vm491_vm0, %v493_v7, %v495_v8  ;;  %v315_v21 = vshll.u32 %v1895_v4, 16  ;;  %v736_v22 = vsel %vm733_vm1, %v734_v9, %v735_v10  ;;  %v511_v23 = vrot.slane %v1922_v15, 1  ;;  %v2001_v50 = vld [vmem:[%s1887_s21 + $0x18] sm:$0xff]  }
  0x13   : > { %575 = vrot.lane.b32.xlu0 %v1919_v14, %s1838_s26  ;;  %v494_v17 = vsel %vm491_vm0, %v492_v11, %v493_v7  ;;  %v1940_v24 = vshll.u32 %v1911_v12, 16  ;;  %v1943_v25 = vshrl.u32 %v1911_v12, 16  ;;  %v513_v26 = vrot.slane %v1930_v19, 1 }
  0x14   : > { %529 = vrot.lane.b32.xlu1 %v494_v17, %s1839_s27  ;;  %v312_v27 = vrot.slane %v310_v20, 1  ;;  %v1946_v28 = vrot.slane %v315_v21, 1  ;;  %v3201_v29 = vrot.slane %v1922_v15, 2  ;;  %v1954_v30 = vsel %vm491_vm0, %v3202_v18, %v511_v23  ;;  %v1805_v20 = vld [vmem:[%s3196_s1 + $0x18] sm:$0xff]  }
  0x15   : > { %1428 = vmatpush1.bf16.msra.mxu0 %v1803_v3  ;;  %1762 = vmatpush1.bf16.msra.mxu1 %v1803_v3  ;;  %v3200_v31 = vrot.slane %v1940_v24, 1  ;;  %v1958_v32 = vshll.u32 %v1922_v15, 16  ;;  %v1961_v33 = vshrl.u32 %v1922_v15, 16  ;;  %v1967_v34 = vsel %vm491_vm0, %v511_v23, %v513_v26 }
  0x16   : > { %1429 = vmatprep.subr.bf16.mxu0 %v1837_v0  ;;  %1754 = vmatprep.subr.bf16.mxu1 %v1837_v0  ;;  %v313_v35 = vor.u32 %v312_v27, %v308_v16  ;;  %v753_v36 = vrot.slane %v1930_v19, 2  ;;  %v1971_v37 = vshll.u32 %v1930_v19, 16  ;;  %v1980_v40 = vshrl.u32 %v1930_v19, 16 }
  0x17   : > { %771 = vrot.lane.b32.xlu0 %v736_v22, %s1840_s28  ;;  %v385_v38 = vor.u32 %v1943_v25, %v3200_v31  ;;  %v389_v39 = vrot.slane %v1958_v32, 1  ;;  %v647_v41 = vrot.slane %v1961_v33, 1  ;;  %v648_v43 = vrot.slane %v1958_v32, 2 }
  0x18   : > { %547 = vrot.lane.b32.xlu1 %v1954_v30, %s1839_s27  ;;  %v318_v42 = vsel %vm306_vm2, %v313_v35, %v1946_v28  ;;  %v652_v44 = vrot.slane %v1971_v37, 2  ;;  %v319_v45 = vshrl.u32 %v1895_v4, 16  ;;  %v651_v47 = vrot.slane %v1980_v40, 1  ;;  %v1806_v35 = vld [vmem:[%s3196_s1 + $0x10] sm:$0xff]  }
  0x19   : > { %1430 = vmatpush1.bf16.msra.mxu0 %v1804_v13  ;;  %1763 = vmatpush1.bf16.msra.mxu1 %v1804_v13  ;;  %v1995_v48 = vshll.u32 %v1898_v5, 16  ;;  %v1998_v49 = vshrl.u32 %v1898_v5, 16  ;;  %v2009_v51 = vsel %vm733_vm1, %v3201_v29, %v753_v36  ;;  %v613_v53 = vrot.slane %v315_v21, 2 }
  0x1a   : > { %1431 = vmatprep.subr.bf16.mxu0 %v1837_v0  ;;  %1755 = vmatprep.subr.bf16.mxu1 %v1837_v0  ;;  %v612_v52 = vrot.slane %v319_v45, 1  ;;  %v390_v54 = vsel %vm306_vm2, %v385_v38, %v389_v39  ;;  %v2018_v55 = vor.u32 %v648_v43, %v647_v41  ;;  %v2022_v58 = vor.u32 %v652_v44, %v651_v47 }
  0x1b   : > { %455 = vrot.lane.b32.xlu0 %v318_v42, %s1841_s29  ;;  %v615_v56 = vrot.slane %v1998_v49, 1  ;;  %v616_v57 = vrot.slane %v1995_v48, 2  ;;  %v2025_v60 = vshll.u32 %v1989_v46, 16  ;;  %v2028_v61 = vshrl.u32 %v1989_v46, 16 }
  0x1c   : > { %593 = vrot.lane.b32.xlu1 %v1967_v34, %s1838_s26  ;;  %v614_v59 = vor.u32 %v613_v53, %v612_v52  ;;  %v755_v63 = vrot.slane %v1989_v46, 2  ;;  %v737_v1 = vrot.slane %v2001_v50, 2  ;;  %v889_v2 = vrot.slane %v1980_v40, 2 }
  0x1d   : > { %v2030_v62 = vor.u32 %v616_v57, %v615_v56  ;;  %v890_v3 = vrot.slane %v1971_v37, 3  ;;  %v893_v7 = vrot.slane %v2028_v61, 2  ;;  %v2039_v9 = vshll.u32 %v2001_v50, 16  ;;  %1432 = vmatpush1.bf16.msra.mxu0 %v1805_v20  ;;  %1764 = vmatpush1.bf16.msra.mxu1 %v1805_v20 }
  0x1e   : > { %v2046_v13 = vshrl.u32 %v2001_v50, 16  ;;  %v854_v16 = vrot.slane %v1998_v49, 2  ;;  %v855_v17 = vrot.slane %v1995_v48, 3  ;;  %v654_v21 = vsel %vm611_vm3, %v2018_v55, %v2022_v58  ;;  %1433 = vmatprep.subr.bf16.mxu0 %v1837_v0  ;;  %1756 = vmatprep.subr.bf16.mxu1 %v1837_v0 }
  0x1f   : > { %473 = vrot.lane.b32.xlu0 %v390_v54, %s1841_s29  ;;  %v618_v11 = vsel %vm611_vm3, %v614_v59, %v2030_v62  ;;  %v894_v22 = vrot.slane %v2025_v60, 3  ;;  %v858_v23 = vrot.slane %v2039_v9, 3  ;;  %v2070_v38 = vsel %vm733_vm1, %v735_v10, %v737_v1  ;;  %v1807_v10 = vld [vmem:[%s3196_s1 + $0x8] sm:$0xff]  }
  0x20   : > { %789 = vrot.lane.b32.xlu1 %v2009_v51, %s1840_s28  ;;  %v857_v27 = vrot.slane %v2046_v13, 2  ;;  %v856_v41 = vor.u32 %v855_v17, %v854_v16  ;;  %v2080_v43 = vsel %vm733_vm1, %v753_v36, %v755_v63  ;;  %v2082_v44 = vor.u32 %v890_v3, %v889_v2  ;;  %v2142_v17 = vld [vmem:[%s1887_s21 + $0x20] sm:$0xff]  }
  0x21   : > { %v2084_v47 = vor.u32 %v894_v22, %v893_v7  ;;  %1434 = vmatpush1.bf16.msra.mxu0 %v1806_v35  ;;  %1765 = vmatpush1.bf16.msra.mxu1 %v1806_v35  ;;  %v321_v52 = vor.u32 %v319_v45, %v1946_v28  ;;  %v325_v53 = vrot.slane %v1995_v48, 1  ;;  %v393_v56 = vor.u32 %v1961_v33, %v389_v39  ;;  %v1810_v28 = vld [vmem:[%s3196_s1] sm:$0xff]  }
  0x22   : > { %v2072_v42 = vor.u32 %v858_v23, %v857_v27  ;;  %1435 = vmatprep.subr.bf16.mxu0 %v1837_v0  ;;  %1757 = vmatprep.subr.bf16.mxu1 %v1837_v0  ;;  %v397_v57 = vrot.slane %v1971_v37, 1  ;;  %v1811_v37 = vld [vmem:[%s3196_s1 + $0x40] sm:$0xff]   ;;  %v497_v48 = vrot.slane %v2001_v50, 1  ;;  %v619_v59 = vrot.slane %v2046_v13, 1 }
  0x23   : > { %697 = vrot.lane.b32.xlu0 %v618_v11, %s1842_s7  ;;  %v896_v54 = vsel %vm853_vm4, %v2082_v44, %v2084_v47  ;;  %v326_v45 = vsel %vm306_vm2, %v321_v52, %v325_v53  ;;  %v620_v2 = vrot.slane %v2039_v9, 2  ;;  %v515_v3 = vrot.slane %v1989_v46, 1 }
  0x24   : > { %715 = vrot.lane.b32.xlu1 %v654_v21, %s1842_s7  ;;  %v860_v36 = vsel %vm853_vm4, %v856_v41, %v2072_v42  ;;  %v398_v39 = vsel %vm306_vm2, %v393_v56, %v397_v57  ;;  %v655_v7 = vrot.slane %v2028_v61, 1  ;;  %v656_v11 = vrot.slane %v2025_v60, 2  ;;  %v2152_v21 = vld [vmem:[%s1887_s21 + $0x68] sm:$0xff]  }
  0x25   : > { %1436 = vmatpush1.bf16.msra.mxu0 %v1807_v10  ;;  %1766 = vmatpush1.bf16.msra.mxu1 %v1807_v10  ;;  %v2139_v16 = vor.u32 %v620_v2, %v619_v59  ;;  %v516_v20 = vsel %vm491_vm0, %v513_v26, %v515_v3  ;;  %v2163_v22 = vshrl.u32 %v2142_v17, 16  ;;  %v2169_v23 = vshll.u32 %v2152_v21, 16 }
  0x26   : > { %1437 = vmatprep.subr.bf16.mxu0 %v1837_v0  ;;  %1758 = vmatprep.subr.bf16.mxu1 %v1837_v0  ;;  %v2172_v27 = vshrl.u32 %v2152_v21, 16  ;;  %v757_v10 = vrot.slane %v2152_v21, 2  ;;  %v517_v2 = vrot.slane %v2152_v21, 1 }
  0x27   : > { %817 = vrot.lane.b32.xlu0 %v2070_v38, %s1843_s10  ;;  %v861_v35 = vrot.slane %v2163_v22, 2 }
  0x28   : > { %835 = vrot.lane.b32.xlu1 %v2080_v43, %s1843_s10  ;;  %v758_v56 = vsel %vm733_vm1, %v755_v63, %v757_v10 }
  0x29   : > { %1438 = vmatpush1.bf16.msra.mxu0 %v1810_v28  ;;  %1767 = vmatpush1.bf16.msra.mxu1 %v1810_v28 }
  0x2a   : > { %1453 = vmatprep.subr.bf16.mxu0 %v1837_v0  ;;  %1759 = vmatprep.subr.bf16.mxu1 %v1837_v0  ;;  %v498_v0 = vsel %vm491_vm0, %v495_v8, %v497_v48  ;;  %v622_v8 = vsel %vm611_vm3, %v2030_v62, %v2139_v16  ;;  %v739_v62 = vrot.slane %v2142_v17, 2 }
  0x2b   : > { %939 = vrot.lane.b32.xlu0 %v860_v36, %s1844_s15  ;;  %v898_v36 = vrot.slane %v2169_v23, 3 }
  0x2c   : > { %957 = vrot.lane.b32.xlu1 %v896_v54, %s1844_s15  ;;  %v740_v52 = vsel %vm733_vm1, %v737_v1, %v739_v62 }
  0x2d   : > { %1454 = vmatpush2.bf16.msra.mxu0 %v1811_v37  ;;  %1768 = vmatpush2.bf16.msra.mxu1 %v1811_v37  ;;  %v405_v37 = vrot.slane %v2025_v60, 1 }
  0x2f   : > { %457 = vrot.lane.b32.xlu0 %v326_v45, %s1841_s29  ;;  %v333_v45 = vrot.slane %v2039_v9, 1 }
  0x30   : > { %475 = vrot.lane.b32.xlu1 %v398_v39, %s1841_s29  ;;  %v976_v39 = vrot.slane %v1898_v5, 3 }
  0x33   : > { %531 = vrot.lane.b32.xlu0 %v1919_v14, %s1839_s27  ;;  %v2149_v14 = vor.u32 %v656_v11, %v655_v7  ;;  %v659_v7 = vrot.slane %v2172_v27, 1  ;;  %v660_v11 = vrot.slane %v2169_v23, 2 }
  0x34   : > { %549 = vrot.lane.b32.xlu1 %v1967_v34, %s1839_s27  ;;  %v2160_v34 = vshll.u32 %v2142_v17, 16 }
  0x35   : > { %v658_v26 = vsel %vm611_vm3, %v2022_v58, %v2149_v14  ;;  %v897_v58 = vrot.slane %v2172_v27, 2 }
  0x36   : > { %v862_v41 = vrot.slane %v2160_v34, 3  ;;  %v624_v59 = vrot.slane %v2160_v34, 2 }
  0x37   : > { %577 = vrot.lane.b32.xlu0 %v498_v0, %s1838_s26  ;;  %v2198_v28 = vor.u32 %v898_v36, %v897_v58  ;;  %v661_v58 = vor.u32 %v660_v11, %v659_v7  ;;  %v2250_v36 = vld [vmem:[%s1887_s21 + $0x70] sm:$0xff]   ;;  %v409_v7 = vor.u32 %v2028_v61, %v405_v37  ;;  %v413_v11 = vrot.slane %v2169_v23, 1 }
  0x38   : > { %595 = vrot.lane.b32.xlu1 %v516_v20, %s1838_s26  ;;  %v2191_v54 = vor.u32 %v862_v41, %v861_v35  ;;  %v2244_v35 = vld [vmem:[%s1887_s21 + $0x28] sm:$0xff]   ;;  %v518_v41 = vsel %vm491_vm0, %v515_v3, %v517_v2  ;;  %v2265_v3 = vshll.u32 %v2250_v36, 16  ;;  %v519_v23 = vrot.slane %v2250_v36, 1 }
  0x39   : > { %v900_v63 = vsel %vm853_vm4, %v2084_v47, %v2198_v28  ;;  %v499_v47 = vrot.slane %v2142_v17, 1 }
  0x3a   : > { %v864_v1 = vsel %vm853_vm4, %v2072_v42, %v2191_v54 }
  0x3b   : > { %699 = vrot.lane.b32.xlu0 %v622_v8, %s1842_s7  ;;  %v500_v8 = vsel %vm491_vm0, %v497_v48, %v499_v47  ;;  %v2260_v48 = vshrl.u32 %v2244_v35, 16 }
  0x3c   : > { %717 = vrot.lane.b32.xlu1 %v658_v26, %s1842_s7 }
  0x3d   : > { %v627_v61 = vrot.slane %v2260_v48, 1 }
  0x3f   : > { %773 = vrot.lane.b32.xlu0 %v2070_v38, %s1840_s28  ;;  %v401_v38 = vor.u32 %v1980_v40, %v397_v57  ;;  %v3206_v40 = vrot.slane %v2001_v50, 3  ;;  %v623_v57 = vrot.slane %v2163_v22, 1 }
  0x40   : > { %791 = vrot.lane.b32.xlu1 %v2080_v43, %s1840_s28  ;;  %v329_v43 = vor.u32 %v1998_v49, %v325_v53  ;;  %v3199_v49 = vrot.slane %v1930_v19, 3  ;;  %v3205_v53 = vrot.slane %v1989_v46, 3 }
  0x41   : > { %v978_v9 = vsel %vm975_vm5, %v976_v39, %v3206_v40  ;;  %v406_v42 = vsel %vm306_vm2, %v401_v38, %v405_v37  ;;  %v625_v26 = vor.u32 %v624_v59, %v623_v57  ;;  %v662_v38 = vsel %vm611_vm3, %v2149_v14, %v661_v58 }
  0x42   : > { %v334_v5 = vsel %vm306_vm2, %v329_v43, %v333_v45  ;;  %1731 = vmatprep.mubr.msk.bf16.mxu0 %vm1013_vm6, %v978_v9  ;;  %v996_v60 = vsel %vm975_vm5, %v3199_v49, %v3205_v53  ;;  %v2268_v43 = vshrl.u32 %v2250_v36, 16  ;;  %v902_v9 = vrot.slane %v2265_v3, 3 }
  0x43   : > { %819 = vrot.lane.b32.xlu0 %v740_v52, %s1843_s10  ;;  %1740 = vmatprep.mubr.msk.bf16.mxu1 %vm1013_vm6, %v996_v60 }
  0x44   : > { %837 = vrot.lane.b32.xlu1 %v758_v56, %s1843_s10  ;;  %v901_v14 = vrot.slane %v2268_v43, 2 }
  0x46   : > { %v903_v57 = vor.u32 %v902_v9, %v901_v14  ;;  %v2318_v14 = vld [vmem:[%s1887_s21 + $0x78] sm:$0xff]  }
  0x47   : > { %941 = vrot.lane.b32.xlu0 %v864_v1, %s1844_s15  ;;  %v865_v1 = vrot.slane %v2260_v48, 2 }
  0x48   : > { %959 = vrot.lane.b32.xlu1 %v900_v63, %s1844_s15  ;;  %v759_v63 = vrot.slane %v2250_v36, 2 }
  0x4b   : > { %459 = vrot.lane.b32.xlu0 %v334_v5, %s1841_s29 }
  0x4c   : > { %477 = vrot.lane.b32.xlu1 %v406_v42, %s1841_s29  ;;  %v760_v42 = vsel %vm733_vm1, %v757_v10, %v759_v63 }
  0x4f   : > { %533 = vrot.lane.b32.xlu0 %v498_v0, %s1839_s27  ;;  %v626_v0 = vsel %vm611_vm3, %v2139_v16, %v625_v26  ;;  %v741_v16 = vrot.slane %v2244_v35, 2 }
  0x50   : > { %551 = vrot.lane.b32.xlu1 %v516_v20, %s1839_s27  ;;  %v2257_v20 = vshll.u32 %v2244_v35, 16 }
  0x51   : > { %v742_v5 = vsel %vm733_vm1, %v739_v62, %v741_v16  ;;  %v904_v62 = vsel %vm853_vm4, %v2198_v28, %v903_v57  ;;  %v663_v28 = vrot.slane %v2268_v43, 1 }
  0x52   : > { %v866_v39 = vrot.slane %v2257_v20, 3 }
  0x53   : > { %579 = vrot.lane.b32.xlu0 %v500_v8, %s1838_s26 }
  0x54   : > { %597 = vrot.lane.b32.xlu1 %v518_v41, %s1838_s26  ;;  %v867_v60 = vor.u32 %v866_v39, %v865_v1  ;;  %v520_v1 = vsel %vm491_vm0, %v517_v2, %v519_v23  ;;  %v2332_v2 = vshll.u32 %v2318_v14, 16 }
  0x56   : > { %v868_v59 = vsel %vm853_vm4, %v2191_v54, %v867_v60  ;;  %v414_v54 = vsel %vm306_vm2, %v409_v7, %v413_v11  ;;  %v761_v7 = vrot.slane %v2318_v14, 2 }
  0x57   : > { %701 = vrot.lane.b32.xlu0 %v626_v0, %s1842_s7 }
  0x58   : > { %719 = vrot.lane.b32.xlu1 %v662_v38, %s1842_s7  ;;  %v2312_v38 = vld [vmem:[%s1887_s21 + $0x30] sm:$0xff]  }
  0x5b   : > { %775 = vrot.lane.b32.xlu0 %v740_v52, %s1840_s28  ;;  %v337_v52 = vor.u32 %v2046_v13, %v333_v45  ;;  %v501_v13 = vrot.slane %v2244_v35, 1  ;;  %v664_v45 = vrot.slane %v2265_v3, 2 }
  0x5c   : > { %793 = vrot.lane.b32.xlu1 %v758_v56, %s1840_s28  ;;  %v341_v56 = vrot.slane %v2160_v34, 1  ;;  %v628_v34 = vrot.slane %v2257_v20, 2 }
  0x5d   : > { %v502_v37 = vsel %vm491_vm0, %v499_v47, %v501_v13  ;;  %v2315_v39 = vor.u32 %v664_v45, %v663_v28  ;;  %v2327_v47 = vshrl.u32 %v2312_v38, 16  ;;  %v3208_v45 = vrot.slane %v2257_v20, 1 }
  0x5e   : > { %v342_v10 = vsel %vm306_vm2, %v337_v52, %v341_v56  ;;  %v629_v0 = vor.u32 %v628_v34, %v627_v61  ;;  %v762_v34 = vsel %vm733_vm1, %v759_v63, %v761_v7  ;;  %v3207_v63 = vrot.slane %v2265_v3, 1 }
  0x5f   : > { %821 = vrot.lane.b32.xlu0 %v742_v5, %s1843_s10  ;;  %v869_v52 = vrot.slane %v2327_v47, 2 }
  0x60   : > { %839 = vrot.lane.b32.xlu1 %v760_v42, %s1843_s10  ;;  %v630_v9 = vsel %vm611_vm3, %v625_v26, %v629_v0  ;;  %v743_v26 = vrot.slane %v2312_v38, 2 }
  0x63   : > { %943 = vrot.lane.b32.xlu0 %v868_v59, %s1844_s15  ;;  %v2335_v59 = vshrl.u32 %v2318_v14, 16 }
  0x64   : > { %961 = vrot.lane.b32.xlu1 %v904_v62, %s1844_s15 }
  0x67   : > { %461 = vrot.lane.b32.xlu0 %v342_v10, %s1841_s29  ;;  %v906_v10 = vrot.slane %v2332_v2, 3 }
  0x68   : > { %479 = vrot.lane.b32.xlu1 %v414_v54, %s1841_s29  ;;  %v744_v54 = vsel %vm733_vm1, %v741_v16, %v743_v26 }
  0x6b   : > { %535 = vrot.lane.b32.xlu0 %v500_v8, %s1839_s27  ;;  %v2324_v8 = vshll.u32 %v2312_v38, 16 }
  0x6c   : > { %553 = vrot.lane.b32.xlu1 %v518_v41, %s1839_s27  ;;  %v666_v41 = vsel %vm611_vm3, %v661_v58, %v2315_v39  ;;  %v905_v58 = vrot.slane %v2335_v59, 2 }
  0x6d   : > { %v870_v62 = vrot.slane %v2324_v8, 3 }
  0x6e   : > { %v2355_v28 = vor.u32 %v906_v10, %v905_v58 }
  0x6f   : > { %581 = vrot.lane.b32.xlu0 %v502_v37, %s1838_s26  ;;  %v2350_v61 = vor.u32 %v870_v62, %v869_v52  ;;  %v667_v52 = vrot.slane %v2335_v59, 1  ;;  %v668_v62 = vrot.slane %v2332_v2, 2 }
  0x70   : > { %599 = vrot.lane.b32.xlu1 %v520_v1, %s1838_s26  ;;  %v908_v16 = vsel %vm853_vm4, %v903_v57, %v2355_v28  ;;  %v632_v57 = vrot.slane %v2324_v8, 2 }
  0x73   : > { %703 = vrot.lane.b32.xlu0 %v630_v9, %s1842_s7  ;;  %v417_v9 = vor.u32 %v2172_v27, %v413_v11  ;;  %v3204_v27 = vrot.slane %v2312_v38, 1  ;;  %v3203_v11 = vrot.slane %v2318_v14, 1 }
  0x74   : > { %721 = vrot.lane.b32.xlu1 %v666_v41, %s1842_s7 }
  0x75   : > { %v2388_v10 = vsel %vm491_vm0, %v501_v13, %v3204_v27 }
  0x77   : > { %777 = vrot.lane.b32.xlu0 %v742_v5, %s1840_s28  ;;  %v872_v5 = vsel %vm853_vm4, %v867_v60, %v2350_v61  ;;  %v631_v60 = vrot.slane %v2327_v47, 1 }
  0x78   : > { %795 = vrot.lane.b32.xlu1 %v760_v42, %s1840_s28  ;;  %v345_v42 = vor.u32 %v2163_v22, %v341_v56  ;;  %v422_v22 = vsel %vm306_vm2, %v417_v9, %v3207_v63  ;;  %v2398_v9 = vsel %vm491_vm0, %v519_v23, %v3203_v11 }
  0x7a   : > { %v350_v41 = vsel %vm306_vm2, %v345_v42, %v3208_v45  ;;  %v2393_v42 = vld [vmem:[%s1887_s21 + $0x38] sm:$0xff]  }
  0x7b   : > { %823 = vrot.lane.b32.xlu0 %v744_v54, %s1843_s10  ;;  %v2415_v23 = vshrl.u32 %v2393_v42, 16 }
  0x7c   : > { %841 = vrot.lane.b32.xlu1 %v762_v34, %s1843_s10 }
  0x7d   : > { %v873_v31 = vrot.slane %v2415_v23, 2 }
  0x7f   : > { %945 = vrot.lane.b32.xlu0 %v872_v5, %s1844_s15  ;;  %v2390_v5 = vor.u32 %v632_v57, %v631_v60 }
  0x80   : > { %963 = vrot.lane.b32.xlu1 %v908_v16, %s1844_s15 }
  0x81   : > { %v634_v13 = vsel %vm611_vm3, %v629_v0, %v2390_v5  ;;  %v745_v0 = vrot.slane %v2393_v42, 2 }
  0x83   : > { %463 = vrot.lane.b32.xlu0 %v350_v41, %s1841_s29  ;;  %v2400_v41 = vor.u32 %v668_v62, %v667_v52  ;;  %v2446_v63 = vsel %vm733_vm1, %v743_v26, %v745_v0 }
  0x84   : > { %481 = vrot.lane.b32.xlu1 %v422_v22, %s1841_s29  ;;  %v2412_v22 = vshll.u32 %v2393_v42, 16 }
  0x85   : > { %v576_v56 = vpop.permute.xlu0 %575  ;;  %v670_v57 = vsel %vm611_vm3, %v2315_v39, %v2400_v41 }
  0x86   : > { %v530_v58 = vpop.permute.xlu1 %529  ;;  %v874_v29 = vrot.slane %v2412_v22, 3 }
  0x87   : > { %537 = vrot.lane.b32.xlu0 %v502_v37, %s1839_s27  ;;  %v2403_v37 = vld [vmem:[%s1887_s21 + $0x80] sm:$0xff]  }
  0x88   : > { %555 = vrot.lane.b32.xlu1 %v520_v1, %s1839_s27  ;;  %v2421_v52 = vshll.u32 %v2403_v37, 16  ;;  %v2424_v62 = vshrl.u32 %v2403_v37, 16  ;;  %v763_v39 = vrot.slane %v2403_v37, 2  ;;  %v2448_v45 = vor.u32 %v874_v29, %v873_v31 }
  0x89   : > { %v772_v16 = vpop.permute.xlu0 %771 }
  0x8a   : > { %v548_v1 = vpop.permute.xlu1 %547  ;;  %v909_v11 = vrot.slane %v2424_v62, 2  ;;  %v910_v27 = vrot.slane %v2421_v52, 3  ;;  %v876_v31 = vsel %vm853_vm4, %v2350_v61, %v2448_v45 }
  0x8b   : > { %583 = vrot.lane.b32.xlu0 %v2388_v10, %s1838_s26 }
  0x8c   : > { %601 = vrot.lane.b32.xlu1 %v2398_v9, %s1838_s26 }
  0x8d   : > { %v456_v60 = vpop.permute.xlu0 %455 }
  0x8e   : > { %v594_v49 = vpop.permute.xlu1 %593  ;;  %v1015_v53 = vsel %vm1013_vm6, %v1901_v6, %v456_v60 }
  0x8f   : > { %705 = vrot.lane.b32.xlu0 %v634_v13, %s1842_s7  ;;  %v1052_v6 = vsel %vm1050_vm7, %v1015_v53, %v530_v58  ;;  %v3217_v53 = vrot.slane %v2257_v20, 1 }
  0x90   : > { %723 = vrot.lane.b32.xlu1 %v670_v57, %s1842_s7  ;;  %v1089_v29 = vsel %vm1087_vm8, %v1052_v6, %v576_v56 }
  0x91   : > { %v474_v18 = vpop.permute.xlu0 %473 }
  0x92   : > { %v790_v13 = vpop.permute.xlu1 %789  ;;  %v1033_v57 = vsel %vm1013_vm6, %v1911_v12, %v474_v18  ;;  %v2456_v18 = vsel %vm733_vm1, %v761_v7, %v763_v39  ;;  %v353_v7 = vor.u32 %v2260_v48, %v3217_v53  ;;  %v3212_v48 = vrot.slane %v2142_v17, 3 }
  0x93   : > { %779 = vrot.lane.b32.xlu0 %v744_v54, %s1840_s28  ;;  %v1070_v40 = vsel %vm1050_vm7, %v1033_v57, %v548_v1  ;;  %v2458_v54 = vor.u32 %v910_v27, %v909_v11  ;;  %v357_v27 = vrot.slane %v2324_v8, 1  ;;  %v3218_v11 = vrot.slane %v2265_v3, 1 }
  0x94   : > { %797 = vrot.lane.b32.xlu1 %v762_v34, %s1840_s28  ;;  %v1107_v26 = vsel %vm1087_vm8, %v1070_v40, %v594_v49  ;;  %v429_v1 = vrot.slane %v2332_v2, 1  ;;  %v3211_v57 = vrot.slane %v2152_v21, 3 }
  0x95   : > { %v698_v60 = vpop.permute.xlu0 %697  ;;  %v912_v56 = vsel %vm853_vm4, %v2355_v28, %v2458_v54  ;;  %v425_v58 = vor.u32 %v2268_v43, %v3218_v11  ;;  %v358_v3 = vsel %vm306_vm2, %v353_v7, %v357_v27 }
  0x96   : > { %v716_v34 = vpop.permute.xlu1 %715  ;;  %v1126_v40 = vsel %vm1124_vm9, %v1089_v29, %v698_v60 }
  0x97   : > { %825 = vrot.lane.b32.xlu0 %v2446_v63, %s1843_s10  ;;  %v1144_v61 = vsel %vm1124_vm9, %v1107_v26, %v716_v34  ;;  %v1163_v6 = vsel %vm1161_vm10, %v1126_v40, %v772_v16  ;;  %v430_v34 = vsel %vm306_vm2, %v425_v58, %v429_v1  ;;  %v671_v58 = vrot.slane %v2424_v62, 1 }
  0x98   : > { %843 = vrot.lane.b32.xlu1 %v2456_v18, %s1843_s10  ;;  %v1181_v43 = vsel %vm1161_vm10, %v1144_v61, %v790_v13  ;;  %v3220_v13 = vrot.slane %v1989_v46, 3  ;;  %v3209_v46 = vrot.slane %v2403_v37, 1  ;;  %v672_v61 = vrot.slane %v2421_v52, 2 }
  0x99   : > { %v818_v49 = vpop.permute.xlu0 %817 }
  0x9a   : > { %v836_v20 = vpop.permute.xlu1 %835  ;;  %v1200_v28 = vsel %vm1198_vm11, %v1163_v6, %v818_v49  ;;  %v998_v7 = vsel %vm975_vm5, %v3220_v13, %v3211_v57  ;;  %v3210_v49 = vrot.slane %v2393_v42, 1  ;;  %v3221_v6 = vrot.slane %v2312_v38, 1 }
  0x9b   : > { %947 = vrot.lane.b32.xlu0 %v876_v31, %s1844_s15  ;;  %v1218_v26 = vsel %vm1198_vm11, %v1181_v43, %v836_v20  ;;  %v3219_v31 = vrot.slane %v2001_v50, 3  ;;  %v635_v50 = vrot.slane %v2415_v23, 1 }
  0x9c   : > { %965 = vrot.lane.b32.xlu1 %v912_v56, %s1844_s15  ;;  %v636_v56 = vrot.slane %v2412_v22, 2 }
  0x9d   : > { %v940_v60 = vpop.permute.xlu0 %939  ;;  %v980_v53 = vsel %vm975_vm5, %v3219_v31, %v3212_v48 }
  0x9e   : > { %v958_v29 = vpop.permute.xlu1 %957  ;;  %v1237_v16 = vsel %vm1235_vm12, %v1200_v28, %v940_v60  ;;  %v2529_v43 = vor.u32 %v636_v56, %v635_v50  ;;  %v2532_v28 = vld [vmem:[%s1887_s21 + $0x40] sm:$0xff]  }
  0x9f   : > { %465 = vrot.lane.b32.xlu0 %v358_v3, %s1841_s29  ;;  %1456 = vmatmul.mubr.bf16.vlgmr.msra.gmra.mxu0 %v1237_v16  ;;  %v1264_v40 = vsel %vm1235_vm12, %v1218_v26, %v958_v29  ;;  %v2527_v3 = vsel %vm491_vm0, %v3221_v6, %v3210_v49  ;;  %v2544_v26 = vld [vmem:[%s1887_s21 + $0x88] sm:$0xff]   ;;  %v2554_v31 = vshll.u32 %v2532_v28, 16 }
  0xa0   : > { %483 = vrot.lane.b32.xlu1 %v430_v34, %s1841_s29  ;;  %1528 = vmatmul.mubr.bf16.vlgmr.msra.gmra.mxu1 %v1264_v40  ;;  %v3222_v34 = vrot.slane %v2318_v14, 1  ;;  %v638_v16 = vsel %vm611_vm3, %v2390_v5, %v2529_v43  ;;  %v2563_v40 = vshll.u32 %v2544_v26, 16  ;;  %v2566_v50 = vshrl.u32 %v2544_v26, 16 }
  0xa1   : > { %v458_v11 = vpop.permute.xlu0 %457  ;;  %1732 = vmatprep.mubr.msk.bf16.mxu0 %vm1013_vm6, %v980_v53  ;;  %1741 = vmatprep.mubr.msk.bf16.mxu1 %vm1013_vm6, %v998_v7  ;;  %v2557_v53 = vshrl.u32 %v2532_v28, 16  ;;  %v747_v5 = vrot.slane %v2532_v28, 2 }
  0xa2   : > { %v476_v20 = vpop.permute.xlu1 %475 }
  0xa3   : > { %539 = vrot.lane.b32.xlu0 %v2388_v10, %s1839_s27  ;;  %v2539_v10 = vsel %vm491_vm0, %v3222_v34, %v3209_v46  ;;  %v913_v34 = vrot.slane %v2566_v50, 2  ;;  %v914_v46 = vrot.slane %v2563_v40, 3  ;;  %v1035_v2 = vsel %vm1013_vm6, %v1922_v15, %v476_v20 }
  0xa4   : > { %557 = vrot.lane.b32.xlu1 %v2398_v9, %s1839_s27  ;;  %v2541_v9 = vor.u32 %v672_v61, %v671_v58  ;;  %v877_v58 = vrot.slane %v2557_v53, 2  ;;  %v878_v61 = vrot.slane %v2554_v31, 3 }
  0xa5   : > { %v532_v60 = vpop.permute.xlu0 %531 }
  0xa6   : > { %v550_v29 = vpop.permute.xlu1 %549  ;;  %v674_v7 = vsel %vm611_vm3, %v2400_v41, %v2541_v9  ;;  %v765_v41 = vrot.slane %v2544_v26, 2 }
  0xa7   : > { %585 = vrot.lane.b32.xlu0 %v2527_v3, %s1838_s26 }
  0xa8   : > { %603 = vrot.lane.b32.xlu1 %v2539_v10, %s1838_s26  ;;  %v2594_v48 = vsel %vm733_vm1, %v763_v39, %v765_v41 }
  0xa9   : > { %v578_v13 = vpop.permute.xlu0 %577 }
  0xaa   : > { %v596_v56 = vpop.permute.xlu1 %595 }
  0xab   : > { %707 = vrot.lane.b32.xlu0 %v638_v16, %s1842_s7  ;;  %v2585_v16 = vsel %vm733_vm1, %v745_v0, %v747_v5  ;;  %v433_v0 = vor.u32 %v2335_v59, %v429_v1 }
  0xac   : > { %725 = vrot.lane.b32.xlu1 %v674_v7, %s1842_s7  ;;  %v2587_v7 = vor.u32 %v878_v61, %v877_v58  ;;  %v1017_v58 = vsel %vm1013_vm6, %v1895_v4, %v458_v11  ;;  %v365_v61 = vrot.slane %v2412_v22, 1  ;;  %v437_v11 = vrot.slane %v2421_v52, 1 }
  0xad   : > { %v700_v6 = vpop.permute.xlu0 %699  ;;  %v1054_v59 = vsel %vm1050_vm7, %v1017_v58, %v532_v60 }
  0xae   : > { %v718_v49 = vpop.permute.xlu1 %717  ;;  %v880_v39 = vsel %vm853_vm4, %v2448_v45, %v2587_v7  ;;  %v1072_v45 = vsel %vm1050_vm7, %v1035_v2, %v550_v29  ;;  %v1091_v8 = vsel %vm1087_vm8, %v1054_v59, %v578_v13 }
  0xaf   : > { %781 = vrot.lane.b32.xlu0 %v2446_v63, %s1840_s28  ;;  %v2596_v63 = vor.u32 %v914_v46, %v913_v34  ;;  %v361_v46 = vor.u32 %v2327_v47, %v357_v27  ;;  %v981_v47 = vrot.slane %v2244_v35, 3  ;;  %v999_v27 = vrot.slane %v2250_v36, 3 }
  0xb0   : > { %799 = vrot.lane.b32.xlu1 %v2456_v18, %s1840_s28  ;;  %v1109_v20 = vsel %vm1087_vm8, %v1072_v45, %v596_v56  ;;  %v1128_v60 = vsel %vm1124_vm9, %v1091_v8, %v700_v6  ;;  %v438_v56 = vsel %vm306_vm2, %v433_v0, %v437_v11  ;;  %v640_v45 = vrot.slane %v2554_v31, 2 }
  0xb1   : > { %v774_v57 = vpop.permute.xlu0 %773  ;;  %v916_v4 = vsel %vm853_vm4, %v2458_v54, %v2596_v63  ;;  %v1146_v58 = vsel %vm1124_vm9, %v1109_v20, %v718_v49  ;;  %v366_v29 = vsel %vm306_vm2, %v361_v46, %v365_v61  ;;  %v676_v20 = vrot.slane %v2563_v40, 2 }
  0xb2   : > { %v792_v18 = vpop.permute.xlu1 %791  ;;  %v1165_v54 = vsel %vm1161_vm10, %v1128_v60, %v774_v57  ;;  %v643_v35 = vrot.slane %v1943_v25, 1 }
  0xb3   : > { %827 = vrot.lane.b32.xlu0 %v2585_v16, %s1843_s10  ;;  %v1183_v13 = vsel %vm1161_vm10, %v1146_v58, %v792_v18  ;;  %v3224_v18 = vrot.slane %v2152_v21, 3  ;;  %v2658_v21 = vrot.slane %v2544_v26, 1  ;;  %v2665_v58 = vld [vmem:[%s1887_s21 + $0x90] sm:$0xf] }
  0xb4   : > { %845 = vrot.lane.b32.xlu1 %v2594_v48, %s1843_s10 }
  0xb5   : > { %v820_v1 = vpop.permute.xlu0 %819 }
  0xb6   : > { %v838_v34 = vpop.permute.xlu1 %837  ;;  %v1202_v2 = vsel %vm1198_vm11, %v1165_v54, %v820_v1  ;;  %v1000_v1 = vsel %vm975_vm5, %v3224_v18, %v999_v27  ;;  %v209_v54 = vld [vmem:[%s1887_s21 + $0x94] sm:$0xf] }
  0xb7   : > { %949 = vrot.lane.b32.xlu0 %v880_v39, %s1844_s15  ;;  %v1220_v6 = vsel %vm1198_vm11, %v1183_v13, %v838_v34  ;;  %v3223_v39 = vrot.slane %v2142_v17, 3  ;;  %v3213_v17 = vrot.slane %v2532_v28, 1  ;;  %v675_v34 = vrot.slane %v2566_v50, 1 }
  0xb8   : > { %967 = vrot.lane.b32.xlu1 %v916_v4, %s1844_s15  ;;  %v639_v4 = vrot.slane %v2557_v53, 1 }
  0xb9   : > { %v942_v59 = vpop.permute.xlu0 %941  ;;  %v982_v46 = vsel %vm975_vm5, %v3223_v39, %v981_v47 }
  0xba   : > { %v960_v49 = vpop.permute.xlu1 %959  ;;  %v1240_v57 = vsel %vm1235_vm12, %v1202_v2, %v942_v59  ;;  %v2679_v2 = vor.u32 %v640_v45, %v639_v4  ;;  %v2707_v4 = vld [vmem:[%s1887_s21 + $0x48] sm:$0xff]  }
  0xbb   : > { %467 = vrot.lane.b32.xlu0 %v366_v29, %s1841_s29  ;;  %1464 = vmatmul.mubr.bf16.gmra.mxu0 %v1240_v57  ;;  %v1267_v0 = vsel %vm1235_vm12, %v1220_v6, %v960_v49  ;;  %v3225_v29 = vrot.slane %v2393_v42, 1  ;;  %v3216_v45 = vrot.slane %v2707_v4, 2 }
  0xbc   : > { %485 = vrot.lane.b32.xlu1 %v438_v56, %s1841_s29  ;;  %1536 = vmatmul.mubr.bf16.gmra.mxu1 %v1267_v0  ;;  %v3226_v56 = vrot.slane %v2403_v37, 1  ;;  %v642_v57 = vsel %vm611_vm3, %v2529_v43, %v2679_v2  ;;  %v881_v43 = vrot.slane %v1943_v25, 2  ;;  %v3229_v25 = vrot.slane %v1911_v12, 1 }
  0xbd   : > { %v460_v8 = vpop.permute.xlu0 %459  ;;  %1733 = vmatprep.mubr.msk.bf16.mxu0 %vm1013_vm6, %v982_v46  ;;  %1742 = vmatprep.mubr.msk.bf16.mxu1 %vm1013_vm6, %v1000_v1  ;;  %v2677_v13 = vsel %vm491_vm0, %v3225_v29, %v3213_v17 }
  0xbe   : > { %v478_v60 = vpop.permute.xlu1 %477  ;;  %v2685_v6 = vsel %vm491_vm0, %v3226_v56, %v2658_v21 }
  0xbf   : > { %541 = vrot.lane.b32.xlu0 %v2527_v3, %s1839_s27  ;;  %v2687_v3 = vor.u32 %v676_v20, %v675_v34  ;;  %v882_v34 = vrot.slane %v1940_v24, 3 }
  0xc0   : > { %559 = vrot.lane.b32.xlu1 %v2539_v10, %s1839_s27  ;;  %v2690_v10 = vcombine.low %v2665_v58, %v209_v54 }
  0xc1   : > { %v534_v59 = vpop.permute.xlu0 %533  ;;  %v678_v46 = vsel %vm611_vm3, %v2541_v9, %v2687_v3 }
  0xc2   : > { %v552_v49 = vpop.permute.xlu1 %551  ;;  %v3215_v18 = vshrl.u32 %v2690_v10, 16  ;;  %v3214_v1 = vshll.u32 %v2690_v10, 16  ;;  %v2713_v9 = vrot.slane %v2690_v10, 2  ;;  %v3227_v36 = vshrl.u32 %v2690_v10, 16 }
  0xc3   : > { %587 = vrot.lane.b32.xlu0 %v2677_v13, %s1838_s26 }
  0xc4   : > { %605 = vrot.lane.b32.xlu1 %v2685_v6, %s1838_s26  ;;  %v917_v54 = vrot.slane %v3215_v18, 2  ;;  %v918_v29 = vrot.slane %v3214_v1, 3  ;;  %v2736_v1 = vsel %vm733_vm1, %v765_v41, %v2713_v9 }
  0xc5   : > { %v580_v39 = vpop.permute.xlu0 %579 }
  0xc6   : > { %v598_v0 = vpop.permute.xlu1 %597 }
  0xc7   : > { %709 = vrot.lane.b32.xlu0 %v642_v57, %s1842_s7  ;;  %v2728_v57 = vsel %vm733_vm1, %v747_v5, %v3216_v45  ;;  %v1820_v5 = vld [vmem:[%s1887_s21 + $0x10] sm:$0xff]  }
  0xc8   : > { %727 = vrot.lane.b32.xlu1 %v678_v46, %s1842_s7  ;;  %v2730_v46 = vor.u32 %v882_v34, %v881_v43  ;;  %v1019_v43 = vsel %vm1013_vm6, %v1820_v5, %v460_v8  ;;  %v369_v34 = vor.u32 %v2415_v23, %v365_v61  ;;  %v445_v5 = vrot.slane %v2563_v40, 1 }
  0xc9   : > { %v702_v20 = vpop.permute.xlu0 %701  ;;  %v983_v23 = vrot.slane %v2312_v38, 3  ;;  %v1001_v61 = vrot.slane %v2318_v14, 3 }
  0xca   : > { %v720_v56 = vpop.permute.xlu1 %719  ;;  %v884_v41 = vsel %vm853_vm4, %v2587_v7, %v2730_v46 }
  0xcb   : > { %783 = vrot.lane.b32.xlu0 %v2585_v16, %s1840_s28  ;;  %v2738_v16 = vor.u32 %v918_v29, %v917_v54  ;;  %v373_v54 = vrot.slane %v2554_v31, 1  ;;  %v1821_v29 = vld [vmem:[%s1887_s21 + $0x58] sm:$0xff]   ;;  %v985_v31 = vrot.slane %v2393_v42, 3 }
  0xcc   : > { %801 = vrot.lane.b32.xlu1 %v2594_v48, %s1840_s28  ;;  %v441_v48 = vor.u32 %v2424_v62, %v437_v11  ;;  %v1037_v52 = vsel %vm1013_vm6, %v1821_v29, %v478_v60  ;;  %v1056_v62 = vsel %vm1050_vm7, %v1019_v43, %v534_v59 }
  0xcd   : > { %v776_v17 = vpop.permute.xlu0 %775  ;;  %v920_v8 = vsel %vm853_vm4, %v2596_v63, %v2738_v16  ;;  %v1074_v7 = vsel %vm1050_vm7, %v1037_v52, %v552_v49  ;;  %v1093_v22 = vsel %vm1087_vm8, %v1056_v62, %v580_v39  ;;  %v374_v49 = vsel %vm306_vm2, %v369_v34, %v373_v54 }
  0xce   : > { %v794_v18 = vpop.permute.xlu1 %793  ;;  %v1111_v60 = vsel %vm1087_vm8, %v1074_v7, %v598_v0  ;;  %v1130_v59 = vsel %vm1124_vm9, %v1093_v22, %v702_v20  ;;  %v446_v0 = vsel %vm306_vm2, %v441_v48, %v445_v5  ;;  %v571_v34 = vrot.slane %v2690_v10, 1  ;;  %v210_v7 = vld [vmem:[%s1887_s21 + $0x98] sm:$0xf]  ;;  %v211_v22 = vld [vmem:[%s1887_s21 + $0x9c] sm:$0xf] }
  0xcf   : > { %829 = vrot.lane.b32.xlu0 %v2728_v57, %s1843_s10  ;;  %v1148_v43 = vsel %vm1124_vm9, %v1111_v60, %v720_v56  ;;  %v1167_v63 = vsel %vm1161_vm10, %v1130_v59, %v776_v17  ;;  %v682_v62 = vrot.slane %v3227_v36, 1  ;;  %v3230_v60 = vrot.slane %v2532_v28, 1 }
  0xd0   : > { %847 = vrot.lane.b32.xlu1 %v2736_v1, %s1843_s10  ;;  %v1185_v39 = vsel %vm1161_vm10, %v1148_v43, %v794_v18  ;;  %v1002_v18 = vsel %vm975_vm5, %v999_v27, %v1001_v61  ;;  %v3228_v27 = vshll.u32 %v2690_v10, 16 }
  0xd1   : > { %v822_v11 = vpop.permute.xlu0 %821  ;;  %v2816_v59 = vsel %vm491_vm0, %v3230_v60, %v3229_v25  ;;  %v1822_v25 = vld [vmem:[%s1887_s21 + $0x18] sm:$0xff]  }
  0xd2   : > { %v840_v45 = vpop.permute.xlu1 %839  ;;  %v1204_v29 = vsel %vm1198_vm11, %v1167_v63, %v822_v11  ;;  %v685_v11 = vrot.slane %v3228_v27, 2 }
  0xd3   : > { %951 = vrot.lane.b32.xlu0 %v884_v41, %s1844_s15  ;;  %v1222_v20 = vsel %vm1198_vm11, %v1185_v39, %v840_v45  ;;  %v984_v41 = vsel %vm975_vm5, %v981_v47, %v983_v23  ;;  %v644_v47 = vrot.slane %v1940_v24, 2 }
  0xd4   : > { %969 = vrot.lane.b32.xlu1 %v920_v8, %s1844_s15  ;;  %v2824_v39 = vor.u32 %v685_v11, %v682_v62 }
  0xd5   : > { %v944_v52 = vpop.permute.xlu0 %943  ;;  %v2818_v43 = vor.u32 %v644_v47, %v643_v35 }
  0xd6   : > { %v962_v56 = vpop.permute.xlu1 %961  ;;  %v1243_v17 = vsel %vm1235_vm12, %v1204_v29, %v944_v52  ;;  %v687_v52 = vsel %vm611_vm3, %v2687_v3, %v2824_v39 }
  0xd7   : > { %469 = vrot.lane.b32.xlu0 %v374_v49, %s1841_s29  ;;  %1472 = vmatmul.mubr.bf16.gmra.mxu0 %v1243_v17  ;;  %v1270_v45 = vsel %vm1235_vm12, %v1222_v20, %v962_v56  ;;  %v572_v49 = vsel %vm491_vm0, %v2658_v21, %v571_v34  ;;  %v646_v12 = vsel %vm611_vm3, %v2679_v2, %v2818_v43  ;;  %v885_v2 = vrot.slane %v1961_v33, 2 }
  0xd8   : > { %487 = vrot.lane.b32.xlu1 %v446_v0, %s1841_s29  ;;  %1544 = vmatmul.mubr.bf16.gmra.mxu1 %v1270_v45  ;;  %v2842_v17 = vcombine.low %v2665_v58, %v2665_v58  ;;  %v3231_v33 = vrot.slane %v1922_v15, 2  ;;  %v449_v15 = vor.u32 %v2566_v50, %v445_v5 }
  0xd9   : > { %v462_v48 = vpop.permute.xlu0 %461  ;;  %1734 = vmatprep.mubr.msk.bf16.mxu0 %vm1013_vm6, %v984_v41  ;;  %1743 = vmatprep.mubr.msk.bf16.mxu1 %vm1013_vm6, %v1002_v18  ;;  %v886_v41 = vrot.slane %v1958_v32, 3  ;;  %v3232_v32 = vrot.slane %v2707_v4, 2 }
  0xda   : > { %v480_v8 = vpop.permute.xlu1 %479  ;;  %v451_v36 = vshll.u32 %v2842_v17, 16  ;;  %v1021_v60 = vsel %vm1013_vm6, %v1822_v25, %v462_v48  ;;  %v1718_v48 = vcombine.low %v210_v7, %v210_v7 }
  0xdb   : > { %543 = vrot.lane.b32.xlu0 %v2677_v13, %s1839_s27  ;;  %v2826_v13 = vcombine.low %v210_v7, %v211_v22  ;;  %v2858_v58 = vsel %vm733_vm1, %v3232_v32, %v3231_v33  ;;  %v2860_v62 = vor.u32 %v886_v41, %v885_v2  ;;  %v527_v41 = vrot.slane %v2842_v17, 1 }
  0xdc   : > { %561 = vrot.lane.b32.xlu1 %v2685_v6, %s1839_s27 }
  0xdd   : > { %v536_v63 = vpop.permute.xlu0 %535  ;;  %v922_v0 = vshrl.u32 %v2826_v13, 16  ;;  %v925_v20 = vshll.u32 %v2826_v13, 16  ;;  %v813_v3 = vrot.slane %v2826_v13, 2 }
  0xde   : > { %v554_v6 = vpop.permute.xlu1 %553  ;;  %v1058_v40 = vsel %vm1050_vm7, %v1021_v60, %v536_v63 }
  0xdf   : > { %589 = vrot.lane.b32.xlu0 %v2816_v59, %s1838_s26  ;;  %v924_v45 = vrot.slane %v922_v0, 2  ;;  %v927_v35 = vrot.slane %v925_v20, 3 }
  0xe0   : > { %607 = vrot.lane.b32.xlu1 %v572_v49, %s1838_s26  ;;  %v888_v49 = vsel %vm853_vm4, %v2730_v46, %v2860_v62 }
  0xe1   : > { %v582_v29 = vpop.permute.xlu0 %581  ;;  %v2866_v11 = vor.u32 %v927_v35, %v924_v45  ;;  %v689_v35 = vshrl.u32 %v1718_v48, 16 }
  0xe2   : > { %v600_v56 = vpop.permute.xlu1 %599  ;;  %v1095_v2 = vsel %vm1087_vm8, %v1058_v40, %v582_v29  ;;  %v769_v40 = vrot.slane %v1718_v48, 2 }
  0xe3   : > { %711 = vrot.lane.b32.xlu0 %v646_v12, %s1842_s7  ;;  %v377_v12 = vor.u32 %v2557_v53, %v373_v54  ;;  %v929_v5 = vsel %vm853_vm4, %v2738_v16, %v2866_v11  ;;  %v1003_v53 = vrot.slane %v2403_v37, 3 }
  0xe4   : > { %729 = vrot.lane.b32.xlu1 %v687_v52, %s1842_s7  ;;  %v1823_v52 = vld [vmem:[%s1887_s21 + $0x60] sm:$0xff]  }
  0xe5   : > { %v704_v18 = vpop.permute.xlu0 %703  ;;  %v1039_v0 = vsel %vm1013_vm6, %v1823_v52, %v480_v8  ;;  %v1004_v17 = vsel %vm975_vm5, %v1001_v61, %v1003_v53 }
  0xe6   : > { %v722_v47 = vpop.permute.xlu1 %721  ;;  %v1076_v20 = vsel %vm1050_vm7, %v1039_v0, %v554_v6  ;;  %v1132_v8 = vsel %vm1124_vm9, %v1095_v2, %v704_v18  ;;  %v3233_v6 = vrot.slane %v1940_v24, 1  ;;  %v986_v24 = vsel %vm975_vm5, %v983_v23, %v985_v31 }
  0xe7   : > { %785 = vrot.lane.b32.xlu0 %v2728_v57, %s1840_s28  ;;  %v814_v57 = vsel %vm733_vm1, %v2713_v9, %v813_v3  ;;  %v1113_v54 = vsel %vm1087_vm8, %v1076_v20, %v600_v56  ;;  %v573_v23 = vrot.slane %v1718_v48, 1  ;;  %v770_v20 = vsel %vm733_vm1, %v2713_v9, %v769_v40  ;;  %v1824_v9 = vld [vmem:[%s1887_s21 + $0x20] sm:$0xff]  }
  0xe8   : > { %803 = vrot.lane.b32.xlu1 %v2736_v1, %s1840_s28  ;;  %v453_v1 = vrot.slane %v451_v36, 1  ;;  %v1150_v16 = vsel %vm1124_vm9, %v1113_v54, %v722_v47  ;;  %v382_v29 = vsel %vm306_vm2, %v377_v12, %v3233_v6  ;;  %v692_v36 = vshll.u32 %v1718_v48, 16 }
  0xe9   : > { %v778_v27 = vpop.permute.xlu0 %777  ;;  %v574_v60 = vsel %vm491_vm0, %v571_v34, %v573_v23 }
  0xea   : > { %v796_v22 = vpop.permute.xlu1 %795  ;;  %v454_v63 = vsel %vm306_vm2, %v449_v15, %v453_v1  ;;  %v1169_v7 = vsel %vm1161_vm10, %v1132_v8, %v778_v27  ;;  %v691_v15 = vrot.slane %v689_v35, 1  ;;  %v694_v1 = vrot.slane %v692_v36, 2 }
  0xeb   : > { %831 = vrot.lane.b32.xlu0 %v2858_v58, %s1843_s10  ;;  %v1187_v56 = vsel %vm1161_vm10, %v1150_v16, %v796_v22  ;;  %v528_v22 = vsel %vm491_vm0, %v2658_v21, %v527_v41  ;;  %v2931_v21 = vld [vmem:[%s1887_s21 + $0xa0] ss:$0 sps:$4 sm:$0x77]   ;;  %v1825_v16 = vld [vmem:[%s1887_s21 + $0x68] sm:$0xff]  }
  0xec   : > { %849 = vrot.lane.b32.xlu1 %v814_v57, %s1843_s10  ;;  %v931_v34 = vshrl.u32 %v2931_v21, 16 }
  0xed   : > { %v824_v50 = vpop.permute.xlu0 %823 }
  0xee   : > { %v842_v46 = vpop.permute.xlu1 %841  ;;  %v1206_v18 = vsel %vm1198_vm11, %v1169_v7, %v824_v50  ;;  %v934_v50 = vshll.u32 %v2931_v21, 16 }
  0xef   : > { %953 = vrot.lane.b32.xlu0 %v888_v49, %s1844_s15  ;;  %v1224_v33 = vsel %vm1198_vm11, %v1187_v56, %v842_v46  ;;  %v695_v49 = vor.u32 %v694_v1, %v691_v15 }
  0xf0   : > { %971 = vrot.lane.b32.xlu1 %v929_v5, %s1844_s15 }
  0xf1   : > { %v946_v45 = vpop.permute.xlu0 %945  ;;  %v696_v0 = vsel %vm611_vm3, %v2824_v39, %v695_v49  ;;  %v936_v39 = vrot.slane %v934_v50, 3 }
  0xf2   : > { %v964_v47 = vpop.permute.xlu1 %963  ;;  %v1246_v32 = vsel %vm1235_vm12, %v1206_v18, %v946_v45  ;;  %v1005_v45 = vrot.slane %v2544_v26, 3 }
  0xf3   : > { %v1273_v27 = vsel %vm1235_vm12, %v1224_v33, %v964_v47  ;;  %471 = vrot.lane.b32.xlu0 %v382_v29, %s1841_s29  ;;  %1480 = vmatmul.mubr.bf16.gmra.mxu0 %v1246_v32 }
  0xf4   : > { %489 = vrot.lane.b32.xlu1 %v454_v63, %s1841_s29  ;;  %1552 = vmatmul.mubr.bf16.gmra.mxu1 %v1273_v27 }
  0xf5   : > { %v464_v57 = vpop.permute.xlu0 %463  ;;  %1735 = vmatprep.mubr.msk.bf16.mxu0 %vm1013_vm6, %v986_v24  ;;  %1744 = vmatprep.mubr.msk.bf16.mxu1 %vm1013_vm6, %v1004_v17 }
  0xf6   : > { %v482_v61 = vpop.permute.xlu1 %481  ;;  %v1023_v63 = vsel %vm1013_vm6, %v1824_v9, %v464_v57  ;;  %v1006_v57 = vsel %vm975_vm5, %v1003_v53, %v1005_v45 }
  0xf7   : > { %545 = vrot.lane.b32.xlu0 %v2816_v59, %s1839_s27  ;;  %v650_v59 = vsel %vm611_vm3, %v2818_v43, %v2018_v55  ;;  %v815_v55 = vrot.slane %v2931_v21, 2  ;;  %v933_v43 = vrot.slane %v931_v34, 2  ;;  %v1041_v7 = vsel %vm1013_vm6, %v1825_v16, %v482_v61 }
  0xf8   : > { %563 = vrot.lane.b32.xlu1 %v528_v22, %s1839_s27 }
  0xf9   : > { %v538_v25 = vpop.permute.xlu0 %537  ;;  %v816_v46 = vsel %vm733_vm1, %v813_v3, %v815_v55  ;;  %v937_v54 = vor.u32 %v936_v39, %v933_v43  ;;  %v1007_v43 = vrot.slane %v2690_v10, 3 }
  0xfa   : > { %v556_v12 = vpop.permute.xlu1 %555  ;;  %v1060_v6 = vsel %vm1050_vm7, %v1023_v63, %v538_v25 }
  0xfb   : > { %591 = vrot.lane.b32.xlu0 %v1954_v30, %s1838_s26  ;;  %v938_v29 = vsel %vm853_vm4, %v2866_v11, %v937_v54  ;;  %v1078_v41 = vsel %vm1050_vm7, %v1041_v7, %v556_v12  ;;  %v1008_v16 = vsel %vm975_vm5, %v1005_v45, %v1007_v43 }
  0xfc   : > { %609 = vrot.lane.b32.xlu1 %v574_v60, %s1838_s26 }
  0xfd   : > { %v584_v52 = vpop.permute.xlu0 %583 }
  0xfe   : > { %v602_v5 = vpop.permute.xlu1 %601  ;;  %v1097_v56 = vsel %vm1087_vm8, %v1060_v6, %v584_v52 }
  0xff   : > { %713 = vrot.lane.b32.xlu0 %v650_v59, %s1842_s7  ;;  %v1826_v59 = vld [vmem:[%s1887_s21 + $0x28] sm:$0xff]  }
 0x100   : > { %731 = vrot.lane.b32.xlu1 %v696_v0, %s1842_s7  ;;  %v1827_v0 = vld [vmem:[%s1887_s21 + $0x70] sm:$0xff]  }
 0x101   : > { %v706_v30 = vpop.permute.xlu0 %705 }
 0x102   : > { %v724_v48 = vpop.permute.xlu1 %723 }
 0x103   : > { %787 = vrot.lane.b32.xlu0 %v2858_v58, %s1840_s28  ;;  %v892_v58 = vsel %vm853_vm4, %v2860_v62, %v2082_v44  ;;  %v1115_v44 = vsel %vm1087_vm8, %v1078_v41, %v602_v5  ;;  %v1134_v62 = vsel %vm1124_vm9, %v1097_v56, %v706_v30  ;;  %v989_v5 = vrot.slane %v2707_v4, 3 }
 0x104   : > { %805 = vrot.lane.b32.xlu1 %v770_v20, %s1840_s28  ;;  %v1152_v35 = vsel %vm1124_vm9, %v1115_v44, %v724_v48 }
 0x105   : > { %v780_v2 = vpop.permute.xlu0 %779 }
 0x106   : > { %v798_v8 = vpop.permute.xlu1 %797  ;;  %v1171_v36 = vsel %vm1161_vm10, %v1134_v62, %v780_v2 }
 0x107   : > { %833 = vrot.lane.b32.xlu0 %v2009_v51, %s1843_s10  ;;  %v987_v51 = vrot.slane %v2532_v28, 3  ;;  %v1189_v11 = vsel %vm1161_vm10, %v1152_v35, %v798_v8 }
 0x108   : > { %851 = vrot.lane.b32.xlu1 %v816_v46, %s1843_s10 }
 0x109   : > { %v826_v3 = vpop.permute.xlu0 %825  ;;  %v988_v32 = vsel %vm975_vm5, %v985_v31, %v987_v51  ;;  %v990_v9 = vsel %vm975_vm5, %v987_v51, %v989_v5 }
 0x10a   : > { %v844_v18 = vpop.permute.xlu1 %843  ;;  %v1208_v33 = vsel %vm1198_vm11, %v1171_v36, %v826_v3 }
 0x10b   : > { %955 = vrot.lane.b32.xlu0 %v892_v58, %s1844_s15  ;;  %v1226_v24 = vsel %vm1198_vm11, %v1189_v11, %v844_v18 }
 0x10c   : > { %973 = vrot.lane.b32.xlu1 %v938_v29, %s1844_s15 }
 0x10d   : > { %v948_v47 = vpop.permute.xlu0 %947 }
 0x10e   : > { %v966_v17 = vpop.permute.xlu1 %965  ;;  %v1249_v27 = vsel %vm1235_vm12, %v1208_v33, %v948_v47  ;;  %v1828_v47 = vld [vmem:[%s1887_s21 + $0x50] sm:$0xff]  }
 0x10f   : > { %1488 = vmatmul.mubr.bf16.gmra.mxu0 %v1249_v27  ;;  %v1276_v22 = vsel %vm1235_vm12, %v1226_v24, %v966_v17 }
 0x110   : > { %1560 = vmatmul.mubr.bf16.gmra.mxu1 %v1276_v22  ;;  %1736 = vmatprep.mubr.msk.bf16.mxu0 %vm1013_vm6, %v988_v32  ;;  %v991_v32 = vrot.slane %v1828_v47, 3 }
 0x111   : > { %v466_v23 = vpop.permute.xlu0 %465  ;;  %1745 = vmatprep.mubr.msk.bf16.mxu1 %vm1013_vm6, %v1006_v57  ;;  %v1009_v57 = vrot.slane %v2826_v13, 3 }
 0x112   : > { %v484_v31 = vpop.permute.xlu1 %483  ;;  %v1025_v52 = vsel %vm1013_vm6, %v1826_v59, %v466_v23 }
 0x113   : > { %v1043_v40 = vsel %vm1013_vm6, %v1827_v0, %v484_v31 }
 0x115   : > { %v540_v15 = vpop.permute.xlu0 %539 }
 0x116   : > { %v558_v1 = vpop.permute.xlu1 %557  ;;  %v1062_v34 = vsel %vm1050_vm7, %v1025_v52, %v540_v15 }
 0x117   : > { %v1080_v30 = vsel %vm1050_vm7, %v1043_v40, %v558_v1 }
 0x119   : > { %v586_v61 = vpop.permute.xlu0 %585 }
 0x11a   : > { %v604_v25 = vpop.permute.xlu1 %603  ;;  %v1099_v20 = vsel %vm1087_vm8, %v1062_v34, %v586_v61  ;;  %v992_v61 = vsel %vm975_vm5, %v989_v5, %v991_v32 }
 0x11b   : > { %v1117_v39 = vsel %vm1087_vm8, %v1080_v30, %v604_v25 }
 0x11d   : > { %v708_v60 = vpop.permute.xlu0 %707 }
 0x11e   : > { %v726_v49 = vpop.permute.xlu1 %725  ;;  %v1136_v48 = vsel %vm1124_vm9, %v1099_v20, %v708_v60 }
 0x11f   : > { %v1154_v2 = vsel %vm1124_vm9, %v1117_v39, %v726_v49  ;;  %v1010_v49 = vsel %vm975_vm5, %v1007_v43, %v1009_v57 }
 0x121   : > { %v782_v12 = vpop.permute.xlu0 %781 }
 0x122   : > { %v800_v53 = vpop.permute.xlu1 %799  ;;  %v1173_v46 = vsel %vm1161_vm10, %v1136_v48, %v782_v12 }
 0x123   : > { %v1191_v54 = vsel %vm1161_vm10, %v1154_v2, %v800_v53  ;;  %v3043_v2 = vld [vmem:[%s3197_s2] ss:$0 sm:$0xff] }
 0x125   : > { %v828_v50 = vpop.permute.xlu0 %827 }
 0x126   : > { %v846_v55 = vpop.permute.xlu1 %845  ;;  %v1210_v8 = vsel %vm1198_vm11, %v1173_v46, %v828_v50 }
 0x127   : > { %v1228_v63 = vsel %vm1198_vm11, %v1191_v54, %v846_v55 }
 0x129   : > { %v950_v4 = vpop.permute.xlu0 %949 }
 0x12a   : > { %v968_v58 = vpop.permute.xlu1 %967  ;;  %v1252_v10 = vsel %vm1235_vm12, %v1210_v8, %v950_v4  ;;  %v1011_v4 = vrot.slane %v2931_v21, 3 }
 0x12b   : > { %1496 = vmatmul.mubr.bf16.gmra.mxu0 %v1252_v10  ;;  %v1279_v7 = vsel %vm1235_vm12, %v1228_v63, %v968_v58 }
 0x12c   : > { %1568 = vmatmul.mubr.bf16.gmra.mxu1 %v1279_v7  ;;  %1737 = vmatprep.mubr.msk.bf16.mxu0 %vm1013_vm6, %v990_v9 }
 0x12d   : > { %v468_v6 = vpop.permute.xlu0 %467  ;;  %1746 = vmatprep.mubr.msk.bf16.mxu1 %vm1013_vm6, %v1008_v16 }
 0x12e   : > { %v486_v3 = vpop.permute.xlu1 %485  ;;  %v1027_v45 = vsel %vm1013_vm6, %v2312_v38, %v468_v6 }
 0x12f   : > { %v1045_v36 = vsel %vm1013_vm6, %v2318_v14, %v486_v3 }
 0x131   : > { %v542_v29 = vpop.permute.xlu0 %541 }
 0x132   : > { %v560_v51 = vpop.permute.xlu1 %559  ;;  %v1064_v11 = vsel %vm1050_vm7, %v1027_v45, %v542_v29 }
 0x133   : > { %v1082_v24 = vsel %vm1050_vm7, %v1045_v36, %v560_v51  ;;  %v3234_v51 = vrot.slane %v1930_v19, 3 }
 0x135   : > { %v588_v41 = vpop.permute.xlu0 %587 }
 0x136   : > { %v606_v56 = vpop.permute.xlu1 %605  ;;  %v1101_v17 = vsel %vm1087_vm8, %v1064_v11, %v588_v41  ;;  %v994_v41 = vsel %vm975_vm5, %v991_v32, %v3234_v51 }
 0x137   : > { %v1119_v22 = vsel %vm1087_vm8, %v1082_v24, %v606_v56 }
 0x139   : > { %v710_v18 = vpop.permute.xlu0 %709 }
 0x13a   : > { %v728_v44 = vpop.permute.xlu1 %727  ;;  %v1138_v23 = vsel %vm1124_vm9, %v1101_v17, %v710_v18 }
 0x13b   : > { %v1156_v38 = vsel %vm1124_vm9, %v1119_v22, %v728_v44 }
 0x13d   : > { %v784_v62 = vpop.permute.xlu0 %783 }
 0x13e   : > { %v802_v35 = vpop.permute.xlu1 %801  ;;  %v1175_v14 = vsel %vm1161_vm10, %v1138_v23, %v784_v62 }
 0x13f   : > { %v1193_v31 = vsel %vm1161_vm10, %v1156_v38, %v802_v35  ;;  %v1012_v35 = vsel %vm975_vm5, %v1009_v57, %v1011_v4 }
 0x141   : > { %v830_v33 = vpop.permute.xlu0 %829 }
 0x142   : > { %v848_v27 = vpop.permute.xlu1 %847  ;;  %v1212_v15 = vsel %vm1198_vm11, %v1175_v14, %v830_v33 }
 0x143   : > { %v1230_v25 = vsel %vm1198_vm11, %v1193_v31, %v848_v27 }
 0x145   : > { %v952_v1 = vpop.permute.xlu0 %951 }
 0x146   : > { %v970_v60 = vpop.permute.xlu1 %969  ;;  %v1255_v13 = vsel %vm1235_vm12, %v1212_v15, %v952_v1 }
 0x147   : > { %1504 = vmatmul.mubr.bf16.gmra.mxu0 %v1255_v13  ;;  %v1282_v12 = vsel %vm1235_vm12, %v1230_v25, %v970_v60 }
 0x148   : > { %1576 = vmatmul.mubr.bf16.gmra.mxu1 %v1282_v12  ;;  %1738 = vmatprep.mubr.msk.bf16.mxu0 %vm1013_vm6, %v992_v61 }
 0x149   : > { %v470_v53 = vpop.permute.xlu0 %469  ;;  %1747 = vmatprep.mubr.msk.bf16.mxu1 %vm1013_vm6, %v1010_v49 }
 0x14a   : > { %v488_v59 = vpop.permute.xlu1 %487  ;;  %v1029_v55 = vsel %vm1013_vm6, %v2393_v42, %v470_v53 }
 0x14b   : > { %v1047_v43 = vsel %vm1013_vm6, %v2403_v37, %v488_v59 }
 0x14d   : > { %v544_v52 = vpop.permute.xlu0 %543 }
 0x14e   : > { %v562_v0 = vpop.permute.xlu1 %561  ;;  %v1066_v39 = vsel %vm1050_vm7, %v1029_v55, %v544_v52 }
 0x14f   : > { %v1084_v46 = vsel %vm1050_vm7, %v1047_v43, %v562_v0 }
 0x151   : > { %v590_v40 = vpop.permute.xlu0 %589 }
 0x152   : > { %v608_v34 = vpop.permute.xlu1 %607  ;;  %v1103_v54 = vsel %vm1087_vm8, %v1066_v39, %v590_v40 }
 0x153   : > { %v1121_v42 = vsel %vm1087_vm8, %v1084_v46, %v608_v34 }
 0x155   : > { %v712_v50 = vpop.permute.xlu0 %711 }
 0x156   : > { %v730_v5 = vpop.permute.xlu1 %729  ;;  %v1140_v9 = vsel %vm1124_vm9, %v1103_v54, %v712_v50 }
 0x157   : > { %v1158_v63 = vsel %vm1124_vm9, %v1121_v42, %v730_v5 }
 0x159   : > { %v786_v30 = vpop.permute.xlu0 %785 }
 0x15a   : > { %v804_v20 = vpop.permute.xlu1 %803  ;;  %v1177_v58 = vsel %vm1161_vm10, %v1140_v9, %v786_v30 }
 0x15b   : > { %v1195_v21 = vsel %vm1161_vm10, %v1158_v63, %v804_v20 }
 0x15d   : > { %v832_v48 = vpop.permute.xlu0 %831 }
 0x15e   : > { %v850_v8 = vpop.permute.xlu1 %849  ;;  %v1214_v7 = vsel %vm1198_vm11, %v1177_v58, %v832_v48 }
 0x15f   : > { %v1457_v37 = vpop.f32.mrf.mxu0  ;;  %v1232_v56 = vsel %vm1198_vm11, %v1195_v21, %v850_v8 }
 0x160   : > { %v1458_v10 = vadd.f32 %v3043_v2, %v1457_v37  ;;  %v1529_v16 = vpop.f32.mrf.mxu1 }
 0x161   : > { %v1530_v6 = vadd.f32 %v3043_v2, %v1529_v16  ;;  %v1459_v3 = vpop.f32.mrf.mxu0  ;;  %v954_v29 = vpop.permute.xlu0 %953 }
 0x162   : > { %1600 = vst.msk [vmem:[%s3053_s22] sm:$0xff] %vm1050_vm7, %v1458_v10  ;;  %v972_v18 = vpop.permute.xlu1 %971  ;;  %v1531_v44 = vpop.f32.mrf.mxu1  ;;  %v1258_v62 = vsel %vm1235_vm12, %v1214_v7, %v954_v29 }
 0x163   : > { %1618 = vst.msk [vmem:[%s3053_s22 + $0x90] sm:$0xff] %vm1050_vm7, %v1530_v6  ;;  %v1460_v45 = vpop.f32.mrf.mxu0  ;;  %1512 = vmatmul.mubr.bf16.gmra.mxu0 %v1258_v62  ;;  %v1285_v19 = vsel %vm1235_vm12, %v1232_v56, %v972_v18 }
 0x164   : > { %v1461_v36 = vadd.f32 %v3043_v2, %v1460_v45  ;;  %v1532_v11 = vpop.f32.mrf.mxu1  ;;  %1584 = vmatmul.mubr.bf16.gmra.mxu1 %v1285_v19  ;;  %1739 = vmatprep.mubr.msk.bf16.mxu0 %vm1013_vm6, %v994_v41 }
 0x165   : > { %v1533_v33 = vadd.f32 %v3043_v2, %v1532_v11  ;;  %v1462_v47 = vpop.f32.mrf.mxu0  ;;  %v472_v32 = vpop.permute.xlu0 %471  ;;  %1748 = vmatprep.mubr.msk.bf16.mxu1 %vm1013_vm6, %v1012_v35 }
 0x166   : > { %1601 = vst.msk [vmem:[%s3053_s22 + $0x8] sm:$0xff] %vm1050_vm7, %v1461_v36  ;;  %v490_v24 = vpop.permute.xlu1 %489  ;;  %v1534_v17 = vpop.f32.mrf.mxu1  ;;  %v1031_v1 = vsel %vm1013_vm6, %v2532_v28, %v472_v32 }
 0x167   : > { %1619 = vst.msk [vmem:[%s3053_s22 + $0x98] sm:$0xff] %vm1050_vm7, %v1533_v33  ;;  %v1049_v61 = vsel %vm1013_vm6, %v2544_v26, %v490_v24 }
 0x169   : > { %v546_v27 = vpop.permute.xlu0 %545 }
 0x16a   : > { %v564_v57 = vpop.permute.xlu1 %563  ;;  %v1068_v25 = vsel %vm1050_vm7, %v1031_v1, %v546_v27 }
 0x16b   : > { %v1086_v13 = vsel %vm1050_vm7, %v1049_v61, %v564_v57 }
 0x16d   : > { %v592_v22 = vpop.permute.xlu0 %591 }
 0x16e   : > { %v610_v23 = vpop.permute.xlu1 %609  ;;  %v1105_v49 = vsel %vm1087_vm8, %v1068_v25, %v592_v22 }
 0x16f   : > { %v1123_v53 = vsel %vm1087_vm8, %v1086_v13, %v610_v23 }
 0x171   : > { %v714_v38 = vpop.permute.xlu0 %713 }
 0x172   : > { %v732_v14 = vpop.permute.xlu1 %731  ;;  %v1142_v59 = vsel %vm1124_vm9, %v1105_v49, %v714_v38 }
 0x173   : > { %v1160_v28 = vsel %vm1124_vm9, %v1123_v53, %v732_v14 }
 0x175   : > { %v788_v31 = vpop.permute.xlu0 %787 }
 0x176   : > { %v806_v15 = vpop.permute.xlu1 %805  ;;  %v1179_v0 = vsel %vm1161_vm10, %v1142_v59, %v788_v31 }
 0x177   : > { %v1197_v34 = vsel %vm1161_vm10, %v1160_v28, %v806_v15 }
 0x179   : > { %v834_v60 = vpop.permute.xlu0 %833 }
 0x17a   : > { %v852_v12 = vpop.permute.xlu1 %851  ;;  %v1216_v50 = vsel %vm1198_vm11, %v1179_v0, %v834_v60 }
 0x17b   : > { %v1465_v52 = vpop.f32.mrf.mxu0  ;;  %v1234_v55 = vsel %vm1198_vm11, %v1197_v34, %v852_v12 }
 0x17c   : > { %v1466_v26 = vadd.f32 %v3043_v2, %v1465_v52  ;;  %v1537_v40 = vpop.f32.mrf.mxu1 }
 0x17d   : > { %v1538_v5 = vadd.f32 %v3043_v2, %v1537_v40  ;;  %v1467_v30 = vpop.f32.mrf.mxu0  ;;  %v956_v20 = vpop.permute.xlu0 %955 }
 0x17e   : > { %1602 = vst.msk [vmem:[%s3053_s22 + $0x10] sm:$0xff] %vm1050_vm7, %v1466_v26  ;;  %v974_v43 = vpop.permute.xlu1 %973  ;;  %v1539_v39 = vpop.f32.mrf.mxu1  ;;  %v1261_v48 = vsel %vm1235_vm12, %v1216_v50, %v956_v20 }
 0x17f   : > { %1620 = vst.msk [vmem:[%s3053_s22 + $0xa0] sm:$0xff] %vm1050_vm7, %v1538_v5  ;;  %v1468_v46 = vpop.f32.mrf.mxu0  ;;  %1520 = vmatmul.mubr.bf16.gmra.mxu0 %v1261_v48  ;;  %v1288_v54 = vsel %vm1235_vm12, %v1234_v55, %v974_v43 }
 0x180   : > { %v1469_v8 = vadd.f32 %v3043_v2, %v1468_v46  ;;  %v1540_v4 = vpop.f32.mrf.mxu1  ;;  %1592 = vmatmul.mubr.bf16.gmra.mxu1 %v1288_v54 }
 0x181   : > { %v1541_v42 = vadd.f32 %v3043_v2, %v1540_v4  ;;  %v1470_v9 = vpop.f32.mrf.mxu0 }
 0x182   : > { %1603 = vst.msk [vmem:[%s3053_s22 + $0x18] sm:$0xff] %vm1050_vm7, %v1469_v8  ;;  %v1542_v37 = vpop.f32.mrf.mxu1 }
 0x183   : > { %1621 = vst.msk [vmem:[%s3053_s22 + $0xa8] sm:$0xff] %vm1050_vm7, %v1541_v42 }
 0x197   : > { %v1473_v63 = vpop.f32.mrf.mxu0 }
 0x198   : > { %v1474_v58 = vadd.f32 %v3043_v2, %v1473_v63  ;;  %v1545_v10 = vpop.f32.mrf.mxu1 }
 0x199   : > { %v1546_v16 = vadd.f32 %v3043_v2, %v1545_v10  ;;  %v1475_v21 = vpop.f32.mrf.mxu0 }
 0x19a   : > { %1604 = vst.msk [vmem:[%s3053_s22 + $0x20] sm:$0xff] %vm1050_vm7, %v1474_v58  ;;  %v1547_v7 = vpop.f32.mrf.mxu1 }
 0x19b   : > { %1622 = vst.msk [vmem:[%s3053_s22 + $0xb0] sm:$0xff] %vm1050_vm7, %v1546_v16  ;;  %v1476_v6 = vpop.f32.mrf.mxu0 }
 0x19c   : > { %v1477_v3 = vadd.f32 %v3043_v2, %v1476_v6  ;;  %v1548_v29 = vpop.f32.mrf.mxu1 }
 0x19d   : > { %v1549_v51 = vadd.f32 %v3043_v2, %v1548_v29  ;;  %v1478_v41 = vpop.f32.mrf.mxu0 }
 0x19e   : > { %1605 = vst.msk [vmem:[%s3053_s22 + $0x28] sm:$0xff] %vm1050_vm7, %v1477_v3  ;;  %v1550_v56 = vpop.f32.mrf.mxu1 }
 0x19f   : > { %1623 = vst.msk [vmem:[%s3053_s22 + $0xb8] sm:$0xff] %vm1050_vm7, %v1549_v51 }
 0x1b3   : > { %v1481_v18 = vpop.f32.mrf.mxu0 }
 0x1b4   : > { %v1482_v44 = vadd.f32 %v3043_v2, %v1481_v18  ;;  %v1553_v62 = vpop.f32.mrf.mxu1 }
 0x1b5   : > { %v1554_v35 = vadd.f32 %v3043_v2, %v1553_v62  ;;  %v1483_v45 = vpop.f32.mrf.mxu0 }
 0x1b6   : > { %1606 = vst.msk [vmem:[%s3053_s22 + $0x30] sm:$0xff] %vm1050_vm7, %v1482_v44  ;;  %v1555_v19 = vpop.f32.mrf.mxu1 }
 0x1b7   : > { %1624 = vst.msk [vmem:[%s3053_s22 + $0xc0] sm:$0xff] %vm1050_vm7, %v1554_v35  ;;  %v1484_v36 = vpop.f32.mrf.mxu0 }
 0x1b8   : > { %v1485_v11 = vadd.f32 %v3043_v2, %v1484_v36  ;;  %v1556_v33 = vpop.f32.mrf.mxu1 }
 0x1b9   : > { %v1557_v47 = vadd.f32 %v3043_v2, %v1556_v33  ;;  %v1486_v32 = vpop.f32.mrf.mxu0 }
 0x1ba   : > { %1607 = vst.msk [vmem:[%s3053_s22 + $0x38] sm:$0xff] %vm1050_vm7, %v1485_v11  ;;  %v1558_v24 = vpop.f32.mrf.mxu1 }
 0x1bb   : > { %1625 = vst.msk [vmem:[%s3053_s22 + $0xc8] sm:$0xff] %vm1050_vm7, %v1557_v47 }
 0x1cf   : > { %v1489_v17 = vpop.f32.mrf.mxu0 }
 0x1d0   : > { %v1490_v27 = vadd.f32 %v3043_v2, %v1489_v17  ;;  %v1561_v57 = vpop.f32.mrf.mxu1 }
 0x1d1   : > { %v1562_v22 = vadd.f32 %v3043_v2, %v1561_v57  ;;  %v1491_v23 = vpop.f32.mrf.mxu0 }
 0x1d2   : > { %1608 = vst.msk [vmem:[%s3053_s22 + $0x40] sm:$0xff] %vm1050_vm7, %v1490_v27  ;;  %v1563_v38 = vpop.f32.mrf.mxu1 }
 0x1d3   : > { %1626 = vst.msk [vmem:[%s3053_s22 + $0xd0] sm:$0xff] %vm1050_vm7, %v1562_v22  ;;  %v1492_v14 = vpop.f32.mrf.mxu0 }
 0x1d4   : > { %v1493_v31 = vadd.f32 %v3043_v2, %v1492_v14  ;;  %v1564_v15 = vpop.f32.mrf.mxu1 }
 0x1d5   : > { %v1565_v1 = vadd.f32 %v3043_v2, %v1564_v15  ;;  %v1494_v61 = vpop.f32.mrf.mxu0 }
 0x1d6   : > { %1609 = vst.msk [vmem:[%s3053_s22 + $0x48] sm:$0xff] %vm1050_vm7, %v1493_v31  ;;  %v1566_v25 = vpop.f32.mrf.mxu1 }
 0x1d7   : > { %1627 = vst.msk [vmem:[%s3053_s22 + $0xd8] sm:$0xff] %vm1050_vm7, %v1565_v1 }
 0x1eb   : > { %v1497_v60 = vpop.f32.mrf.mxu0 }
 0x1ec   : > { %v1498_v13 = vadd.f32 %v3043_v2, %v1497_v60  ;;  %v1569_v49 = vpop.f32.mrf.mxu1 }
 0x1ed   : > { %v1570_v12 = vadd.f32 %v3043_v2, %v1569_v49  ;;  %v1499_v53 = vpop.f32.mrf.mxu0 }
 0x1ee   : > { %1610 = vst.msk [vmem:[%s3053_s22 + $0x50] sm:$0xff] %vm1050_vm7, %v1498_v13  ;;  %v1571_v59 = vpop.f32.mrf.mxu1 }
 0x1ef   : > { %1628 = vst.msk [vmem:[%s3053_s22 + $0xe0] sm:$0xff] %vm1050_vm7, %v1570_v12  ;;  %v1500_v52 = vpop.f32.mrf.mxu0 }
 0x1f0   : > { %v1501_v28 = vadd.f32 %v3043_v2, %v1500_v52  ;;  %v1572_v0 = vpop.f32.mrf.mxu1 }
 0x1f1   : > { %v1573_v26 = vadd.f32 %v3043_v2, %v1572_v0  ;;  %v1502_v40 = vpop.f32.mrf.mxu0 }
 0x1f2   : > { %1611 = vst.msk [vmem:[%s3053_s22 + $0x58] sm:$0xff] %vm1050_vm7, %v1501_v28  ;;  %v1574_v34 = vpop.f32.mrf.mxu1 }
 0x1f3   : > { %1629 = vst.msk [vmem:[%s3053_s22 + $0xe8] sm:$0xff] %vm1050_vm7, %v1573_v26 }
 0x207   : > { %v1505_v50 = vpop.f32.mrf.mxu0 }
 0x208   : > { %v1506_v5 = vadd.f32 %v3043_v2, %v1505_v50  ;;  %v1577_v30 = vpop.f32.mrf.mxu1 }
 0x209   : > { %v1578_v20 = vadd.f32 %v3043_v2, %v1577_v30  ;;  %v1507_v55 = vpop.f32.mrf.mxu0 }
 0x20a   : > { %1612 = vst.msk [vmem:[%s3053_s22 + $0x60] sm:$0xff] %vm1050_vm7, %v1506_v5  ;;  %v1579_v43 = vpop.f32.mrf.mxu1 }
 0x20b   : > { %1630 = vst.msk [vmem:[%s3053_s22 + $0xf0] sm:$0xff] %vm1050_vm7, %v1578_v20  ;;  %v1508_v39 = vpop.f32.mrf.mxu0 }
 0x20c   : > { %v1509_v48 = vadd.f32 %v3043_v2, %v1508_v39  ;;  %v1580_v46 = vpop.f32.mrf.mxu1 }
 0x20d   : > { %v1581_v54 = vadd.f32 %v3043_v2, %v1580_v46  ;;  %v1510_v8 = vpop.f32.mrf.mxu0 }
 0x20e   : > { %1613 = vst.msk [vmem:[%s3053_s22 + $0x68] sm:$0xff] %vm1050_vm7, %v1509_v48  ;;  %v1582_v4 = vpop.f32.mrf.mxu1 }
 0x20f   : > { %1631 = vst.msk [vmem:[%s3053_s22 + $0xf8] sm:$0xff] %vm1050_vm7, %v1581_v54 }
 0x223   : > { %v1513_v42 = vpop.f32.mrf.mxu0 }
 0x224   : > { %v1514_v9 = vadd.f32 %v3043_v2, %v1513_v42  ;;  %v1585_v37 = vpop.f32.mrf.mxu1 }
 0x225   : > { %v1586_v63 = vadd.f32 %v3043_v2, %v1585_v37  ;;  %v1515_v58 = vpop.f32.mrf.mxu0 }
 0x226   : > { %1614 = vst.msk [vmem:[%s3053_s22 + $0x70] sm:$0xff] %vm1050_vm7, %v1514_v9  ;;  %v1587_v10 = vpop.f32.mrf.mxu1 }
 0x227   : > { %1632 = vst.msk [vmem:[%s3053_s22 + $0x100] sm:$0xff] %vm1050_vm7, %v1586_v63  ;;  %v1516_v16 = vpop.f32.mrf.mxu0 }
 0x228   : > { %v1517_v21 = vadd.f32 %v3043_v2, %v1516_v16  ;;  %v1588_v7 = vpop.f32.mrf.mxu1 }
 0x229   : > { %v1589_v6 = vadd.f32 %v3043_v2, %v1588_v7  ;;  %v1518_v3 = vpop.f32.mrf.mxu0 }
 0x22a   : > { %1615 = vst.msk [vmem:[%s3053_s22 + $0x78] sm:$0xff] %vm1050_vm7, %v1517_v21  ;;  %v1590_v29 = vpop.f32.mrf.mxu1 }
 0x22b   : > { %1633 = vst.msk [vmem:[%s3053_s22 + $0x108] sm:$0xff] %vm1050_vm7, %v1589_v6 }
 0x23f   : > { %v1521_v51 = vpop.f32.mrf.mxu0 }
 0x240   : > { %v1522_v41 = vadd.f32 %v3043_v2, %v1521_v51  ;;  %v1593_v56 = vpop.f32.mrf.mxu1 }
 0x241   : > { %v1594_v18 = vadd.f32 %v3043_v2, %v1593_v56  ;;  %v1523_v44 = vpop.f32.mrf.mxu0 }
 0x242   : > { %1616 = vst.msk [vmem:[%s3053_s22 + $0x80] sm:$0xff] %vm1050_vm7, %v1522_v41  ;;  %v1595_v62 = vpop.f32.mrf.mxu1 }
 0x243   : > { %1634 = vst.msk [vmem:[%s3053_s22 + $0x110] sm:$0xff] %vm1050_vm7, %v1594_v18  ;;  %v1524_v35 = vpop.f32.mrf.mxu0 }
 0x244   : > { %v1525_v45 = vadd.f32 %v3043_v2, %v1524_v35  ;;  %v1596_v19 = vpop.f32.mrf.mxu1 }
 0x245   : > { %v1597_v36 = vadd.f32 %v3043_v2, %v1596_v19  ;;  %v1526_v11 = vpop.f32.mrf.mxu0 }
 0x246   : > { %1617 = vst.msk [vmem:[%s3053_s22 + $0x88] sm:$0xff] %vm1050_vm7, %v1525_v45  ;;  %v1598_v33 = vpop.f32.mrf.mxu1 }
 0x247   : > { %1635 = vst.msk [vmem:[%s3053_s22 + $0x118] sm:$0xff] %vm1050_vm7, %v1597_v36 }
 0x248 PF: > { %s13_s12 = sadd.s32 1, %s1835_s12  }
 0x249   : > { %p10_p4 = scmp.ge.s32.totalorder %s13_s12, 4  }
 0x24b   :  { %12 = sbr.rel (!%p10_p4) target bundleno = 1 (0x1), region = 62 }

// kernel: cltv_forward.10
= control target key start
LH: loop header
LB: loop body
LE: loop exit
PB: predicated region body
PF: predicated region fallthrough
CT: control target
= control target key end

     0   :  { %vm970_vm0 = vcmask 261120   ;;  %vm1320_vm1 = vcmask 523264   ;;  %s2348_s1 = inlined_call_operand.vmem [shape: bf16[1568,64], index: 1, kind: input, shape index: {}]   ;;  %s2349_s0 = inlined_call_operand.vmem [shape: bf16[32,1568], index: 0, kind: input, shape index: {}]   ;;  %s2350_s2 = inlined_call_operand.vmem [shape: f32[1,64], index: 2, kind: input, shape index: {}]   ;;  %s2351_s3 = inlined_call_operand.vmem [shape: f32[1,64], index: 3, kind: input, shape index: {}]   ;;  %s2352_s4 = inlined_call_operand.vmem [shape: f32[1,64], index: 4, kind: input, shape index: {}]   ;;  %s2353_s5 = inlined_call_operand.vmem [shape: f32[32,64], index: 5, kind: output, shape index: {}]  }
   0x1   :  { %v1741_v0 = vld [vmem:[%s2348_s1 + $0x78] sm:$0xff]   ;;  %v1745_v4 = vld [vmem:[%s2348_s1 + $0x70] sm:$0xff]   ;;  %v1749_v8 = vld [vmem:[%s2348_s1 + $0x68] sm:$0xff]  }
   0x2   :  { %v1742_v1 = vld [vmem:[%s2348_s1 + $0x38] sm:$0xff]   ;;  %1561 = vmatprep.subr.bf16.mxu0 %v1741_v0  ;;  %v1746_v5 = vld [vmem:[%s2348_s1 + $0x30] sm:$0xff]   ;;  %v1750_v9 = vld [vmem:[%s2348_s1 + $0x28] sm:$0xff]  }
   0x3   :  { %v1743_v2 = vld [vmem:[%s2348_s1 + $0xf8] sm:$0xff]   ;;  %1562 = vmatpush3.bf16.msra.mxu0 %v1742_v1  ;;  %v1747_v6 = vld [vmem:[%s2348_s1 + $0xf0] sm:$0xff]   ;;  %v1751_v10 = vld [vmem:[%s2348_s1 + $0xe8] sm:$0xff]  }
   0x4   :  { %v1744_v3 = vld [vmem:[%s2348_s1 + $0xb8] sm:$0xff]   ;;  %1589 = vmatprep.subr.bf16.mxu1 %v1743_v2  ;;  %1563 = vmatprep.subr.bf16.mxu0 %v1745_v4  ;;  %v1748_v7 = vld [vmem:[%s2348_s1 + $0xb0] sm:$0xff]   ;;  %v1752_v11 = vld [vmem:[%s2348_s1 + $0xa8] sm:$0xff]  }
   0x5   :  { %1590 = vmatpush3.bf16.msra.mxu1 %v1744_v3  ;;  %v1753_v12 = vld [vmem:[%s2348_s1 + $0x60] sm:$0xff]   ;;  %v1757_v16 = vld [vmem:[%s2348_s1 + $0x58] sm:$0xff]   ;;  %v1761_v20 = vld [vmem:[%s2348_s1 + $0x50] sm:$0xff]  }
   0x6   :  { %1591 = vmatprep.subr.bf16.mxu1 %v1747_v6  ;;  %v1754_v13 = vld [vmem:[%s2348_s1 + $0x20] sm:$0xff]   ;;  %v1758_v17 = vld [vmem:[%s2348_s1 + $0x18] sm:$0xff]   ;;  %v1762_v21 = vld [vmem:[%s2348_s1 + $0x10] sm:$0xff]  }
   0x7   :  { %1564 = vmatpush3.bf16.msra.mxu0 %v1746_v5  ;;  %v1755_v14 = vld [vmem:[%s2348_s1 + $0xe0] sm:$0xff]   ;;  %v1759_v18 = vld [vmem:[%s2348_s1 + $0xd8] sm:$0xff]   ;;  %v1763_v22 = vld [vmem:[%s2348_s1 + $0xd0] sm:$0xff]  }
   0x8   :  { %1565 = vmatprep.subr.bf16.mxu0 %v1749_v8  ;;  %v1756_v15 = vld [vmem:[%s2348_s1 + $0xa0] sm:$0xff]   ;;  %v1760_v19 = vld [vmem:[%s2348_s1 + $0x98] sm:$0xff]   ;;  %v1764_v23 = vld [vmem:[%s2348_s1 + $0x90] sm:$0xff]  }
   0x9   :  { %1592 = vmatpush3.bf16.msra.mxu1 %v1748_v7  ;;  %v1765_v24 = vld [vmem:[%s2348_s1 + $0x48] sm:$0xff]   ;;  %v1769_v28 = vld [vmem:[%s2348_s1 + $0x40] sm:$0xff]   ;;  %v1776_v34 = vld [vmem:[%s2348_s1 + $0x178] sm:$0xff]  }
   0xa   :  { %1593 = vmatprep.subr.bf16.mxu1 %v1751_v10  ;;  %v1766_v25 = vld [vmem:[%s2348_s1 + $0x8] sm:$0xff]   ;;  %v1770_v29 = vld [vmem:[%s2348_s1] sm:$0xff]   ;;  %v1780_v37 = vld [vmem:[%s2348_s1 + $0x138] sm:$0xff]  }
   0xb   :  { %1566 = vmatpush3.bf16.msra.mxu0 %v1750_v9  ;;  %v1767_v26 = vld [vmem:[%s2348_s1 + $0xc8] sm:$0xff]   ;;  %v1771_v30 = vld [vmem:[%s2348_s1 + $0xc0] sm:$0xff]   ;;  %v1781_v38 = vld [vmem:[%s2348_s1 + $0x1f8] sm:$0xff]  }
   0xc   :  { %1567 = vmatprep.subr.bf16.mxu0 %v1753_v12  ;;  %v1768_v27 = vld [vmem:[%s2348_s1 + $0x88] sm:$0xff]   ;;  %v1772_v31 = vld [vmem:[%s2349_s0] ss:$52 sps:$4 sm:$0xff]   ;;  %v1774_v32 = vld [vmem:[%s2349_s0 + $0x4] ss:$52 sps:$4 sm:$0xff]  }
   0xd   :  { %1594 = vmatpush3.bf16.msra.mxu1 %v1752_v11  ;;  %v1775_v33 = vld [vmem:[%s2348_s1 + $0x80] sm:$0xff]   ;;  %1009 = vmatprep.mubr.bf16.mxu0 %v1774_v32  ;;  %v1777_v35 = vld [vmem:[%s2349_s0 + $0x8] ss:$52 sps:$4 sm:$0xff]   ;;  %v1783_v40 = vld [vmem:[%s2348_s1 + $0x170] sm:$0xff]  }
   0xe   :  { %1595 = vmatprep.subr.bf16.mxu1 %v1755_v14  ;;  %v1779_v36 = vld [vmem:[%s2349_s0 + $0xc] ss:$52 sps:$4 sm:$0xff]   ;;  %v1782_v39 = vld [vmem:[%s2348_s1 + $0x1b8] sm:$0xff]   ;;  %v1784_v41 = vld [vmem:[%s2348_s1 + $0x130] sm:$0xff]  }
   0xf   :  { %1568 = vmatpush3.bf16.msra.mxu0 %v1754_v13  ;;  %1058 = vmatprep.mubr.bf16.mxu1 %v1779_v36  ;;  %v1785_v42 = vld [vmem:[%s2348_s1 + $0x1f0] sm:$0xff]   ;;  %v1787_v44 = vld [vmem:[%s2348_s1 + $0x168] sm:$0xff]   ;;  %v1791_v48 = vld [vmem:[%s2348_s1 + $0x160] sm:$0xff]  }
  0x10   :  { %1569 = vmatprep.subr.bf16.mxu0 %v1757_v16  ;;  %v1786_v43 = vld [vmem:[%s2348_s1 + $0x1b0] sm:$0xff]   ;;  %v1788_v45 = vld [vmem:[%s2348_s1 + $0x128] sm:$0xff]   ;;  %v1792_v49 = vld [vmem:[%s2348_s1 + $0x120] sm:$0xff]  }
  0x11   :  { %1596 = vmatpush3.bf16.msra.mxu1 %v1756_v15  ;;  %v1789_v46 = vld [vmem:[%s2348_s1 + $0x1e8] sm:$0xff]   ;;  %v1793_v50 = vld [vmem:[%s2348_s1 + $0x1e0] sm:$0xff]   ;;  %v1795_v52 = vld [vmem:[%s2348_s1 + $0x158] sm:$0xff]  }
  0x12   :  { %1597 = vmatprep.subr.bf16.mxu1 %v1759_v18  ;;  %v1790_v47 = vld [vmem:[%s2348_s1 + $0x1a8] sm:$0xff]   ;;  %v1794_v51 = vld [vmem:[%s2348_s1 + $0x1a0] sm:$0xff]   ;;  %v1796_v53 = vld [vmem:[%s2348_s1 + $0x118] sm:$0xff]  }
  0x13   :  { %1570 = vmatpush3.bf16.msra.mxu0 %v1758_v17  ;;  %v1797_v54 = vld [vmem:[%s2349_s0 + $0x6c] ss:$52 sps:$4 sm:$0xff]   ;;  %v1799_v55 = vld [vmem:[%s2348_s1 + $0x1d8] sm:$0xff]   ;;  %v1802_v58 = vld [vmem:[%s2349_s0 + $0x74] ss:$52 sps:$4 sm:$0xff]  }
  0x14   :  { %1571 = vmatprep.subr.bf16.mxu0 %v1761_v20  ;;  %v1800_v56 = vld [vmem:[%s2349_s0 + $0x68] ss:$52 sps:$4 sm:$0xff]   ;;  %v1804_v59 = vld [vmem:[%s2348_s1 + $0x150] sm:$0xff]   ;;  %v1813_v4 = vld [vmem:[%s2348_s1 + $0x140] sm:$0xff]  }
  0x15   :  { %1598 = vmatpush3.bf16.msra.mxu1 %v1760_v19  ;;  %v1801_v57 = vld [vmem:[%s2348_s1 + $0x198] sm:$0xff]   ;;  %v1805_v60 = vld [vmem:[%s2349_s0 + $0x70] ss:$52 sps:$4 sm:$0xff]   ;;  %v1809_v0 = vld [vmem:[%s2348_s1 + $0x148] sm:$0xff]  }
  0x16   :  { %1599 = vmatprep.subr.bf16.mxu1 %v1763_v22  ;;  %v1806_v61 = vld [vmem:[%s2348_s1 + $0x110] sm:$0xff]   ;;  %v1810_v1 = vld [vmem:[%s2348_s1 + $0x108] sm:$0xff]   ;;  %v1814_v5 = vld [vmem:[%s2348_s1 + $0x100] sm:$0xff]  }
  0x17   :  { %1572 = vmatpush3.bf16.msra.mxu0 %v1762_v21  ;;  %v1807_v62 = vld [vmem:[%s2348_s1 + $0x1d0] sm:$0xff]   ;;  %v1811_v2 = vld [vmem:[%s2348_s1 + $0x1c8] sm:$0xff]   ;;  %v1815_v6 = vld [vmem:[%s2348_s1 + $0x1c0] sm:$0xff]  }
  0x18   :  { %1573 = vmatprep.subr.bf16.mxu0 %v1765_v24  ;;  %v1808_v63 = vld [vmem:[%s2348_s1 + $0x190] sm:$0xff]   ;;  %v1812_v3 = vld [vmem:[%s2348_s1 + $0x188] sm:$0xff]   ;;  %v1819_v9 = vld [vmem:[%s2348_s1 + $0x180] sm:$0xff]  }
  0x19   :  { %1600 = vmatpush3.bf16.msra.mxu1 %v1764_v23  ;;  %v1816_v7 = vld [vmem:[%s2349_s0 + $0x10] ss:$52 sps:$4 sm:$0xff]   ;;  %v1818_v8 = vld [vmem:[%s2349_s0 + $0x14] ss:$52 sps:$4 sm:$0xff]   ;;  %v1820_v10 = vld [vmem:[%s2348_s1 + $0x278] sm:$0xff]  }
  0x1a   :  { %1601 = vmatprep.subr.bf16.mxu1 %v1767_v26  ;;  %v1821_v11 = vld [vmem:[%s2349_s0 + $0x18] ss:$52 sps:$4 sm:$0xff]   ;;  %v1823_v12 = vld [vmem:[%s2349_s0 + $0x1c] ss:$52 sps:$4 sm:$0xff]  }
  0x1b   :  { %1574 = vmatpush3.bf16.msra.mxu0 %v1766_v25  ;;  %v1824_v13 = vld [vmem:[%s2348_s1 + $0x238] sm:$0xff]   ;;  %v1827_v16 = vld [vmem:[%s2348_s1 + $0x270] sm:$0xff]   ;;  %v1834_v22 = vld [vmem:[%s2348_s1 + $0x268] sm:$0xff]  }
  0x1c   :  { %1575 = vmatprep.subr.bf16.mxu0 %v1769_v28  ;;  %v1825_v14 = vld [vmem:[%s2348_s1 + $0x2f8] sm:$0xff]   ;;  %v1828_v17 = vld [vmem:[%s2348_s1 + $0x230] sm:$0xff]   ;;  %v1837_v24 = vld [vmem:[%s2348_s1 + $0x228] sm:$0xff]  }
  0x1d   :  { %1602 = vmatpush3.bf16.msra.mxu1 %v1768_v27  ;;  %v1826_v15 = vld [vmem:[%s2348_s1 + $0x2b8] sm:$0xff]   ;;  %v1829_v18 = vld [vmem:[%s2348_s1 + $0x2f0] sm:$0xff]   ;;  %v1839_v26 = vld [vmem:[%s2348_s1 + $0x2e8] sm:$0xff]  }
  0x1e   :  { %1603 = vmatprep.subr.bf16.mxu1 %v1771_v30  ;;  %v1830_v19 = vld [vmem:[%s2349_s0 + $0x7c] ss:$52 sps:$4 sm:$0xff]   ;;  %v1833_v21 = vld [vmem:[%s2349_s0 + $0x78] ss:$52 sps:$4 sm:$0xff]   ;;  %v1838_v25 = vld [vmem:[%s2349_s0 + $0x80] ss:$52 sps:$4 sm:$0xff]  }
  0x1f   :  { %1576 = vmatpush3.bf16.msra.mxu0 %v1770_v29  ;;  %v1832_v20 = vld [vmem:[%s2348_s1 + $0x2b0] sm:$0xff]   ;;  %v1835_v23 = vld [vmem:[%s2349_s0 + $0x84] ss:$52 sps:$4 sm:$0xff]   ;;  %v1840_v27 = vld [vmem:[%s2348_s1 + $0x2a8] sm:$0xff]  }
  0x20   :  { %1617 = vmatprep.subr.bf16.mxu0 %v1776_v34  ;;  %v1841_v28 = vld [vmem:[%s2348_s1 + $0x260] sm:$0xff]   ;;  %v1845_v32 = vld [vmem:[%s2348_s1 + $0x258] sm:$0xff]   ;;  %v1849_v36 = vld [vmem:[%s2348_s1 + $0x250] sm:$0xff]  }
  0x21   :  { %1604 = vmatpush3.bf16.msra.mxu1 %v1775_v33  ;;  %v1842_v29 = vld [vmem:[%s2348_s1 + $0x220] sm:$0xff]   ;;  %v1846_v33 = vld [vmem:[%s2348_s1 + $0x218] sm:$0xff]  }
  0x22   :  { %1010 = vmatmul.mubr.bf16.vlgmr.msra.gmra.mxu0 %v1772_v31  ;;  %1645 = vmatprep.subr.bf16.mxu1 %v1781_v38  ;;  %v1843_v30 = vld [vmem:[%s2348_s1 + $0x2e0] sm:$0xff]   ;;  %v1847_v34 = vld [vmem:[%s2348_s1 + $0x2d8] sm:$0xff]   ;;  %v1851_v38 = vld [vmem:[%s2348_s1 + $0x2d0] sm:$0xff]  }
  0x23   :  { %1618 = vmatpush3.bf16.msra.mxu0 %v1780_v37  ;;  %1017 = vmatprep.mubr.bf16.mxu0 %v1797_v54  ;;  %v1844_v31 = vld [vmem:[%s2348_s1 + $0x2a0] sm:$0xff]   ;;  %v1850_v37 = vld [vmem:[%s2348_s1 + $0x210] sm:$0xff]  }
  0x24   :  { %1059 = vmatmul.mubr.bf16.vlgmr.msra.gmra.mxu1 %v1777_v35  ;;  %1619 = vmatprep.subr.bf16.mxu0 %v1783_v40  ;;  %v1848_v35 = vld [vmem:[%s2348_s1 + $0x298] sm:$0xff]   ;;  %v1853_v40 = vld [vmem:[%s2348_s1 + $0x248] sm:$0xff]   ;;  %v1871_v54 = vld [vmem:[%s2348_s1 + $0x300] sm:$0xff]  }
  0x25   :  { %1646 = vmatpush3.bf16.msra.mxu1 %v1782_v39  ;;  %1066 = vmatprep.mubr.bf16.mxu1 %v1802_v58  ;;  %v1852_v39 = vld [vmem:[%s2348_s1 + $0x290] sm:$0xff]  }
  0x26   :  { %1647 = vmatprep.subr.bf16.mxu1 %v1785_v42  ;;  %v1855_v42 = vld [vmem:[%s2348_s1 + $0x2c8] sm:$0xff]   ;;  %v1874_v58 = vld [vmem:[%s2349_s0 + $0x90] ss:$52 sps:$4 sm:$0xff]  }
  0x27   :  { %1620 = vmatpush3.bf16.msra.mxu0 %v1784_v41  ;;  %v1854_v41 = vld [vmem:[%s2348_s1 + $0x208] sm:$0xff]  }
  0x28   :  { %1621 = vmatprep.subr.bf16.mxu0 %v1787_v44  ;;  %v1857_v44 = vld [vmem:[%s2348_s1 + $0x240] sm:$0xff]  }
  0x29   :  { %1648 = vmatpush3.bf16.msra.mxu1 %v1786_v43  ;;  %v1856_v43 = vld [vmem:[%s2348_s1 + $0x288] sm:$0xff]  }
  0x2a   :  { %1649 = vmatprep.subr.bf16.mxu1 %v1789_v46  ;;  %1018 = vmatmul.mubr.bf16.gmra.mxu0 %v1800_v56  ;;  %v1859_v46 = vld [vmem:[%s2348_s1 + $0x2c0] sm:$0xff]   ;;  %v1872_v56 = vld [vmem:[%s2349_s0 + $0x94] ss:$52 sps:$4 sm:$0xff]  }
  0x2b   :  { %1622 = vmatpush3.bf16.msra.mxu0 %v1788_v45  ;;  %1107 = vmatprep.mubr.bf16.mxu0 %v1818_v8  ;;  %v1858_v45 = vld [vmem:[%s2348_s1 + $0x200] sm:$0xff]  }
  0x2c   :  { %1623 = vmatprep.subr.bf16.mxu0 %v1791_v48  ;;  %1067 = vmatmul.mubr.bf16.gmra.mxu1 %v1805_v60  ;;  %v1862_v48 = vld [vmem:[%s2349_s0 + $0x24] ss:$52 sps:$4 sm:$0xff]  }
  0x2d   :  { %1650 = vmatpush3.bf16.msra.mxu1 %v1790_v47  ;;  %1156 = vmatprep.mubr.bf16.mxu1 %v1823_v12  ;;  %v1860_v47 = vld [vmem:[%s2349_s0 + $0x20] ss:$52 sps:$4 sm:$0xff]  }
  0x2e   :  { %1651 = vmatprep.subr.bf16.mxu1 %v1793_v50  ;;  %v1864_v50 = vld [vmem:[%s2348_s1 + $0x308] sm:$0xff]  }
  0x2f   :  { %1624 = vmatpush3.bf16.msra.mxu0 %v1792_v49  ;;  %v1863_v49 = vld [vmem:[%s2348_s1 + $0x280] sm:$0xff]  }
  0x30   :  { %1625 = vmatprep.subr.bf16.mxu0 %v1795_v52  ;;  %v1867_v52 = vld [vmem:[%s2349_s0 + $0x2c] ss:$52 sps:$4 sm:$0xff]  }
  0x31   :  { %1652 = vmatpush3.bf16.msra.mxu1 %v1794_v51  ;;  %v1865_v51 = vld [vmem:[%s2349_s0 + $0x28] ss:$52 sps:$4 sm:$0xff]  }
  0x32   :  { %1653 = vmatprep.subr.bf16.mxu1 %v1799_v55  ;;  %v1870_v55 = vld [vmem:[%s2349_s0 + $0x88] ss:$52 sps:$4 sm:$0xff]  }
  0x33   :  { %1626 = vmatpush3.bf16.msra.mxu0 %v1796_v53  ;;  %v1868_v53 = vld [vmem:[%s2349_s0 + $0x8c] ss:$52 sps:$4 sm:$0xff]  }
  0x34   :  { %1627 = vmatprep.subr.bf16.mxu0 %v1804_v59  ;;  %v1876_v59 = vld [vmem:[%s2349_s0 + $0x98] ss:$52 sps:$4 sm:$0xff]  }
  0x35   :  { %1654 = vmatpush3.bf16.msra.mxu1 %v1801_v57  ;;  %v1875_v57 = vld [vmem:[%s2349_s0 + $0x30] ss:$52 sps:$4 sm:$0xff]  }
  0x36   :  { %1655 = vmatprep.subr.bf16.mxu1 %v1807_v62 }
  0x37   :  { %1628 = vmatpush3.bf16.msra.mxu0 %v1806_v61 }
  0x38   :  { %1629 = vmatprep.subr.bf16.mxu0 %v1809_v0 }
  0x39   :  { %1656 = vmatpush3.bf16.msra.mxu1 %v1808_v63 }
  0x3a   :  { %1657 = vmatprep.subr.bf16.mxu1 %v1811_v2 }
  0x3b   :  { %1630 = vmatpush3.bf16.msra.mxu0 %v1810_v1 }
  0x3c   :  { %1631 = vmatprep.subr.bf16.mxu0 %v1813_v4 }
  0x3d   :  { %1658 = vmatpush3.bf16.msra.mxu1 %v1812_v3 }
  0x3e   :  { %1659 = vmatprep.subr.bf16.mxu1 %v1815_v6 }
  0x3f   :  { %1632 = vmatpush3.bf16.msra.mxu0 %v1814_v5 }
  0x40   :  { %1673 = vmatprep.subr.bf16.mxu0 %v1820_v10 }
  0x41   :  { %1660 = vmatpush3.bf16.msra.mxu1 %v1819_v9 }
  0x42   :  { %1108 = vmatmul.mubr.bf16.vlgmr.msra.gmra.mxu0 %v1816_v7  ;;  %1701 = vmatprep.subr.bf16.mxu1 %v1825_v14 }
  0x43   :  { %1674 = vmatpush3.bf16.msra.mxu0 %v1824_v13  ;;  %1115 = vmatprep.mubr.bf16.mxu0 %v1830_v19 }
  0x44   :  { %1157 = vmatmul.mubr.bf16.vlgmr.msra.gmra.mxu1 %v1821_v11  ;;  %1675 = vmatprep.subr.bf16.mxu0 %v1827_v16 }
  0x45   :  { %1702 = vmatpush3.bf16.msra.mxu1 %v1826_v15  ;;  %1164 = vmatprep.mubr.bf16.mxu1 %v1835_v23 }
  0x46   :  { %1703 = vmatprep.subr.bf16.mxu1 %v1829_v18 }
  0x47   :  { %1676 = vmatpush3.bf16.msra.mxu0 %v1828_v17 }
  0x48   :  { %1677 = vmatprep.subr.bf16.mxu0 %v1834_v22 }
  0x49   :  { %1704 = vmatpush3.bf16.msra.mxu1 %v1832_v20 }
  0x4a   :  { %1116 = vmatmul.mubr.bf16.gmra.mxu0 %v1833_v21  ;;  %1705 = vmatprep.subr.bf16.mxu1 %v1839_v26  ;;  %v1432_v26 = vld [vmem:[%s2350_s2] ss:$0 sm:$0xff] }
  0x4b   :  { %1678 = vmatpush3.bf16.msra.mxu0 %v1837_v24  ;;  %1205 = vmatprep.mubr.bf16.mxu0 %v1862_v48 }
  0x4c   :  { %1165 = vmatmul.mubr.bf16.gmra.mxu1 %v1838_v25  ;;  %1679 = vmatprep.subr.bf16.mxu0 %v1841_v28 }
  0x4d   :  { %1706 = vmatpush3.bf16.msra.mxu1 %v1840_v27  ;;  %1254 = vmatprep.mubr.bf16.mxu1 %v1867_v52 }
  0x4e   :  { %1707 = vmatprep.subr.bf16.mxu1 %v1843_v30 }
  0x4f   :  { %1680 = vmatpush3.bf16.msra.mxu0 %v1842_v29 }
  0x50   :  { %1681 = vmatprep.subr.bf16.mxu0 %v1845_v32 }
  0x51   :  { %1708 = vmatpush3.bf16.msra.mxu1 %v1844_v31 }
  0x52   :  { %1709 = vmatprep.subr.bf16.mxu1 %v1847_v34 }
  0x53   :  { %1682 = vmatpush3.bf16.msra.mxu0 %v1846_v33 }
  0x54   :  { %1683 = vmatprep.subr.bf16.mxu0 %v1849_v36 }
  0x55   :  { %1710 = vmatpush3.bf16.msra.mxu1 %v1848_v35 }
  0x56   :  { %1711 = vmatprep.subr.bf16.mxu1 %v1851_v38 }
  0x57   :  { %1684 = vmatpush3.bf16.msra.mxu0 %v1850_v37 }
  0x58   :  { %1685 = vmatprep.subr.bf16.mxu0 %v1853_v40 }
  0x59   :  { %1712 = vmatpush3.bf16.msra.mxu1 %v1852_v39 }
  0x5a   :  { %1713 = vmatprep.subr.bf16.mxu1 %v1855_v42 }
  0x5b   :  { %1686 = vmatpush3.bf16.msra.mxu0 %v1854_v41 }
  0x5c   :  { %1687 = vmatprep.subr.bf16.mxu0 %v1857_v44 }
  0x5d   :  { %1714 = vmatpush3.bf16.msra.mxu1 %v1856_v43 }
  0x5e   :  { %1715 = vmatprep.subr.bf16.mxu1 %v1859_v46 }
  0x5f   :  { %1688 = vmatpush3.bf16.msra.mxu0 %v1858_v45 }
  0x60   :  { %1733 = vmatprep.subr.bf16.mxu0 %v1864_v50 }
  0x61   :  { %1716 = vmatpush3.bf16.msra.mxu1 %v1863_v49 }
  0x62   :  { %1206 = vmatmul.mubr.bf16.vlgmr.msra.gmra.mxu0 %v1860_v47 }
  0x63   :  { %1734 = vmatpush3.bf16.msra.mxu0 %v1864_v50  ;;  %1213 = vmatprep.mubr.bf16.mxu0 %v1868_v53 }
  0x64   :  { %1255 = vmatmul.mubr.bf16.vlgmr.msra.gmra.mxu1 %v1865_v51  ;;  %1735 = vmatprep.subr.bf16.mxu0 %v1871_v54 }
  0x65   :  { %1262 = vmatprep.mubr.bf16.mxu1 %v1872_v56 }
  0x67   :  { %1736 = vmatpush3.bf16.msra.mxu0 %v1871_v54 }
  0x6a   :  { %1214 = vmatmul.mubr.bf16.gmra.mxu0 %v1870_v55 }
  0x6b   :  { %1737 = vmatprep.mubr.msk.bf16.mxu0 %vm970_vm0, %v1875_v57 }
  0x6c   :  { %1263 = vmatmul.mubr.bf16.gmra.mxu1 %v1874_v58 }
  0x72   :  { %1738 = vmatmul.mubr.msk.bf16.vlgmr.msra.gmra.mxu0 %vm970_vm0, %v1876_v59 }
  0xe2   :  { %v1577_v60 = vpop.f32.mrf.mxu0 }
  0xe4   :  { %v1578_v61 = vpop.f32.mrf.mxu0  ;;  %v1605_v62 = vpop.f32.mrf.mxu1 }
  0xe5   :  { %v1579_v25 = vadd.f32 %v1578_v61, %v1577_v60 }
  0xe6   :  { %v1580_v63 = vpop.f32.mrf.mxu0  ;;  %v1606_v0 = vpop.f32.mrf.mxu1 }
  0xe7   :  { %v1012_v30 = vadd.f32 %v1579_v25, %v1432_v26  ;;  %v1607_v31 = vadd.f32 %v1606_v0, %v1605_v62 }
  0xe8   :  { %v1581_v1 = vpop.f32.mrf.mxu0  ;;  %v1608_v2 = vpop.f32.mrf.mxu1 }
  0xe9   :  { %v1582_v32 = vadd.f32 %v1581_v1, %v1580_v63  ;;  %v1061_v41 = vadd.f32 %v1607_v31, %v1012_v30 }
  0xea   :  { %v1583_v3 = vpop.f32.mrf.mxu0  ;;  %v1609_v4 = vpop.f32.mrf.mxu1 }
  0xeb   :  { %v1015_v42 = vadd.f32 %v1582_v32, %v1432_v26  ;;  %v1610_v43 = vadd.f32 %v1609_v4, %v1608_v2 }
  0xec   :  { %v1584_v5 = vpop.f32.mrf.mxu0  ;;  %v1611_v6 = vpop.f32.mrf.mxu1 }
  0xed   :  { %v1585_v27 = vadd.f32 %v1584_v5, %v1583_v3  ;;  %v1064_v57 = vadd.f32 %v1610_v43, %v1015_v42 }
  0xee   :  { %v1586_v7 = vpop.f32.mrf.mxu0  ;;  %v1612_v8 = vpop.f32.mrf.mxu1 }
  0xef   :  { %v1020_v34 = vadd.f32 %v1585_v27, %v1432_v26  ;;  %v1613_v35 = vadd.f32 %v1612_v8, %v1611_v6 }
  0xf0   :  { %v1587_v9 = vpop.f32.mrf.mxu0  ;;  %v1614_v10 = vpop.f32.mrf.mxu1 }
  0xf1   :  { %v1588_v36 = vadd.f32 %v1587_v9, %v1586_v7  ;;  %v1069_v46 = vadd.f32 %v1613_v35, %v1020_v34 }
  0xf2   :  { %v1615_v12 = vpop.f32.mrf.mxu1 }
  0xf3   :  { %v1023_v47 = vadd.f32 %v1588_v36, %v1432_v26  ;;  %v1616_v48 = vadd.f32 %v1615_v12, %v1614_v10 }
  0xf5   :  { %v1072_v60 = vadd.f32 %v1616_v48, %v1023_v47 }
 0x102   :  { %v1633_v11 = vpop.f32.mrf.mxu0 }
 0x104   :  { %v1634_v13 = vpop.f32.mrf.mxu0  ;;  %v1661_v14 = vpop.f32.mrf.mxu1 }
 0x105   :  { %v1635_v37 = vadd.f32 %v1634_v13, %v1633_v11 }
 0x106   :  { %v1636_v15 = vpop.f32.mrf.mxu0  ;;  %v1662_v16 = vpop.f32.mrf.mxu1 }
 0x107   :  { %v1110_v49 = vadd.f32 %v1635_v37, %v1061_v41  ;;  %v1663_v50 = vadd.f32 %v1662_v16, %v1661_v14 }
 0x108   :  { %v1637_v17 = vpop.f32.mrf.mxu0  ;;  %v1664_v18 = vpop.f32.mrf.mxu1 }
 0x109   :  { %v1638_v51 = vadd.f32 %v1637_v17, %v1636_v15  ;;  %v1159_v62 = vadd.f32 %v1663_v50, %v1110_v49 }
 0x10a   :  { %v1639_v19 = vpop.f32.mrf.mxu0  ;;  %v1665_v20 = vpop.f32.mrf.mxu1 }
 0x10b   :  { %v1113_v63 = vadd.f32 %v1638_v51, %v1064_v57  ;;  %v1666_v0 = vadd.f32 %v1665_v20, %v1664_v18 }
 0x10c   :  { %v1640_v21 = vpop.f32.mrf.mxu0  ;;  %v1667_v22 = vpop.f32.mrf.mxu1 }
 0x10d   :  { %v1641_v40 = vadd.f32 %v1640_v21, %v1639_v19  ;;  %v1162_v13 = vadd.f32 %v1666_v0, %v1113_v63 }
 0x10e   :  { %v1642_v23 = vpop.f32.mrf.mxu0  ;;  %v1668_v24 = vpop.f32.mrf.mxu1 }
 0x10f   :  { %v1118_v54 = vadd.f32 %v1641_v40, %v1069_v46  ;;  %v1669_v55 = vadd.f32 %v1668_v24, %v1667_v22 }
 0x110   :  { %v1643_v28 = vpop.f32.mrf.mxu0  ;;  %v1670_v29 = vpop.f32.mrf.mxu1 }
 0x111   :  { %v1644_v56 = vadd.f32 %v1643_v28, %v1642_v23  ;;  %v1167_v3 = vadd.f32 %v1669_v55, %v1118_v54 }
 0x112   :  { %v1671_v38 = vpop.f32.mrf.mxu1 }
 0x113   :  { %v1121_v4 = vadd.f32 %v1644_v56, %v1072_v60  ;;  %v1672_v5 = vadd.f32 %v1671_v38, %v1670_v29 }
 0x115   :  { %v1170_v16 = vadd.f32 %v1672_v5, %v1121_v4 }
 0x122   :  { %v1689_v33 = vpop.f32.mrf.mxu0 }
 0x124   :  { %v1690_v39 = vpop.f32.mrf.mxu0  ;;  %v1717_v44 = vpop.f32.mrf.mxu1 }
 0x125   :  { %v1691_v61 = vadd.f32 %v1690_v39, %v1689_v33 }
 0x126   :  { %v1692_v45 = vpop.f32.mrf.mxu0  ;;  %v1718_v52 = vpop.f32.mrf.mxu1 }
 0x127   :  { %v1208_v10 = vadd.f32 %v1691_v61, %v1159_v62  ;;  %v1719_v11 = vadd.f32 %v1718_v52, %v1717_v44 }
 0x128   :  { %v1693_v53 = vpop.f32.mrf.mxu0  ;;  %v1720_v58 = vpop.f32.mrf.mxu1 }
 0x129   :  { %v1694_v7 = vadd.f32 %v1693_v53, %v1692_v45  ;;  %v1257_v25 = vadd.f32 %v1719_v11, %v1208_v10 }
 0x12a   :  { %v1695_v59 = vpop.f32.mrf.mxu0  ;;  %v1721_v1 = vpop.f32.mrf.mxu1 }
 0x12b   :  { %v1211_v21 = vadd.f32 %v1694_v7, %v1162_v13  ;;  %v1722_v22 = vadd.f32 %v1721_v1, %v1720_v58 }
 0x12c   :  { %v1696_v2 = vpop.f32.mrf.mxu0  ;;  %v1723_v8 = vpop.f32.mrf.mxu1 }
 0x12d   :  { %v1697_v6 = vadd.f32 %v1696_v2, %v1695_v59  ;;  %v1260_v34 = vadd.f32 %v1722_v22, %v1211_v21 }
 0x12e   :  { %v1698_v9 = vpop.f32.mrf.mxu0  ;;  %v1724_v14 = vpop.f32.mrf.mxu1 }
 0x12f   :  { %v1216_v12 = vadd.f32 %v1697_v6, %v1167_v3  ;;  %v1725_v17 = vadd.f32 %v1724_v14, %v1723_v8 }
 0x130   :  { %v1699_v15 = vpop.f32.mrf.mxu0  ;;  %v1726_v18 = vpop.f32.mrf.mxu1 }
 0x131   :  { %v1700_v19 = vadd.f32 %v1699_v15, %v1698_v9  ;;  %v1265_v24 = vadd.f32 %v1725_v17, %v1216_v12 }
 0x132   :  { %v1739_v20 = vpop.f32.mrf.mxu0  ;;  %v1727_v26 = vpop.f32.mrf.mxu1 }
 0x133   :  { %v1219_v23 = vadd.f32 %v1700_v19, %v1170_v16  ;;  %v1728_v28 = vadd.f32 %v1727_v26, %v1726_v18  ;;  %v1314_v29 = vadd.f32 %v1739_v20, %v1265_v24 }
 0x134   :  { %v1305_v27 = vpop.f32.mrf.mxu0 }
 0x135   :  { %v1306_v30 = vadd.f32 %v1305_v27, %v1257_v25  ;;  %v1268_v32 = vadd.f32 %v1728_v28, %v1219_v23  ;;  %v1327_v33 = vsel %vm1320_vm1, %v1314_v29, 0.0 }
 0x136   :  { %v1740_v31 = vpop.f32.mrf.mxu0  ;;  %1328 = vadd.xlane.f32.xlu1 %v1327_v33 }
 0x137   :  { %v1321_v35 = vsel %vm1320_vm1, %v1306_v30, 0.0  ;;  %v1317_v37 = vadd.f32 %v1740_v31, %v1268_v32  ;;  %v1560_v32 = vld [vmem:[%s2352_s4] ss:$0 sm:$0xff] }
 0x138   :  { %v1308_v36 = vpop.f32.mrf.mxu0  ;;  %1322 = vadd.xlane.f32.xlu0 %v1321_v35 }
 0x139   :  { %v1309_v38 = vadd.f32 %v1308_v36, %v1260_v34  ;;  %v1330_v39 = vsel %vm1320_vm1, %v1317_v37, 0.0 }
 0x13a   :  { %1331 = vadd.xlane.f32.xlu1 %v1330_v39 }
 0x13b   :  { %v1324_v40 = vsel %vm1320_vm1, %v1309_v38, 0.0 }
 0x13c   :  { %1325 = vadd.xlane.f32.xlu0 %v1324_v40 }
 0x1bf   :  { %v1329_v41 = vpop.xlane.xlu1 %1328 }
 0x1c0   :  { %v1336_v43 = vmul.f32 0.015625, %v1329_v41 }
 0x1c1   :  { %v1323_v42 = vpop.xlane.xlu0 %1322 }
 0x1c2   :  { %v1334_v44 = vmul.f32 0.015625, %v1323_v42  ;;  %v2302_v45 = vsub.f32 %v1314_v29, %v1336_v43 }
 0x1c3   :  { %v1332_v47 = vpop.xlane.xlu1 %1331 }
 0x1c4   :  { %v2304_v46 = vsub.f32 %v1306_v30, %v1334_v44  ;;  %v1337_v49 = vmul.f32 0.015625, %v1332_v47  ;;  %v1344_v55 = vmul.f32 %v2302_v45, %v2302_v45  ;;  %v1559_v30 = vld [vmem:[%s2351_s3] ss:$0 sm:$0xff] }
 0x1c5   :  { %v1326_v48 = vpop.xlane.xlu0 %1325 }
 0x1c6   :  { %v1335_v50 = vmul.f32 0.015625, %v1326_v48  ;;  %v1342_v51 = vmul.f32 %v2304_v46, %v2304_v46  ;;  %v2308_v52 = vsub.f32 %v1317_v37, %v1337_v49  ;;  %v1352_v57 = vsel %vm1320_vm1, %v1344_v55, 0.0 }
 0x1c8   :  { %v2310_v53 = vsub.f32 %v1309_v38, %v1335_v50  ;;  %v1346_v54 = vsel %vm1320_vm1, %v1342_v51, 0.0  ;;  %v1345_v59 = vmul.f32 %v2308_v52, %v2308_v52 }
 0x1c9   :  { %1347 = vadd.xlane.f32.xlu0 %v1346_v54 }
 0x1ca   :  { %v1343_v56 = vmul.f32 %v2310_v53, %v2310_v53  ;;  %v1355_v60 = vsel %vm1320_vm1, %v1345_v59, 0.0 }
 0x1cc   :  { %v1349_v58 = vsel %vm1320_vm1, %v1343_v56, 0.0 }
 0x1cd   :  { %1353 = vadd.xlane.f32.xlu0 %v1352_v57  ;;  %1350 = vadd.xlane.f32.xlu1 %v1349_v58 }
 0x1d1   :  { %1356 = vadd.xlane.f32.xlu1 %v1355_v60 }
 0x252   :  { %v1348_v61 = vpop.xlane.xlu0 %1347 }
 0x253   :  { %v1358_v62 = vmul.f32 0.015625, %v1348_v61 }
 0x255   :  { %1877 = vrsqrt.f32 %v1358_v62  ;;  %vm1364_vm2 = vcmp.eq.f32.partialorder %v1358_v62, inf  ;;  %v1367_v7 = vand.u32 2147483648, %v1358_v62  ;;  %vm1366_vm3 = vcmp.eq.f32.partialorder %v1358_v62, 0.0 }
 0x256   :  { %v1351_v63 = vpop.xlane.xlu1 %1350  ;;  %v1354_v0 = vpop.xlane.xlu0 %1353 }
 0x257   :  { %v1359_v1 = vmul.f32 0.015625, %v1351_v63  ;;  %v1360_v2 = vmul.f32 0.015625, %v1354_v0 }
 0x259   :  { %1879 = vrsqrt.f32 %v1359_v1  ;;  %vm1371_vm4 = vcmp.eq.f32.partialorder %v1359_v1, inf  ;;  %vm1373_vm5 = vcmp.eq.f32.partialorder %v1359_v1, 0.0  ;;  %v1374_v14 = vand.u32 2147483648, %v1359_v1 }
 0x25a   :  { %1881 = vrsqrt.f32 %v1360_v2  ;;  %v1357_v3 = vpop.xlane.xlu1 %1356  ;;  %vm1378_vm6 = vcmp.eq.f32.partialorder %v1360_v2, inf  ;;  %v1381_v17 = vand.u32 2147483648, %v1360_v2  ;;  %vm1380_vm7 = vcmp.eq.f32.partialorder %v1360_v2, 0.0 }
 0x25b   :  { %v1361_v4 = vmul.f32 0.015625, %v1357_v3 }
 0x25d   :  { %1883 = vrsqrt.f32 %v1361_v4  ;;  %vm1385_vm8 = vcmp.eq.f32.partialorder %v1361_v4, inf  ;;  %v1388_v25 = vand.u32 2147483648, %v1361_v4  ;;  %vm1387_vm9 = vcmp.eq.f32.partialorder %v1361_v4, 0.0 }
 0x262   :  { %v1878_v5 = vpop.eup %1877 }
 0x263   :  { %v1363_v6 = vmul.f32 %v1878_v5, %v1358_v62 }
 0x265   :  { %v1365_v8 = vsel %vm1364_vm2, %v1358_v62, %v1363_v6 }
 0x266   :  { %v1880_v9 = vpop.eup %1879  ;;  %v1368_v10 = vsel %vm1366_vm3, %v1367_v7, %v1365_v8 }
 0x267   :  { %v1882_v11 = vpop.eup %1881  ;;  %v1390_v12 = vadd.f32 1e-05, %v1368_v10  ;;  %v1370_v13 = vmul.f32 %v1880_v9, %v1359_v1 }
 0x268   :  { %v1377_v15 = vmul.f32 %v1882_v11, %v1360_v2 }
 0x269   :  { %1885 = vrcp.f32 %v1390_v12  ;;  %v1372_v16 = vsel %vm1371_vm4, %v1359_v1, %v1370_v13 }
 0x26a   :  { %v1884_v19 = vpop.eup %1883  ;;  %v1375_v21 = vsel %vm1373_vm5, %v1374_v14, %v1372_v16  ;;  %v1379_v18 = vsel %vm1378_vm6, %v1360_v2, %v1377_v15 }
 0x26b   :  { %v1391_v20 = vadd.f32 1e-05, %v1375_v21  ;;  %v1382_v22 = vsel %vm1380_vm7, %v1381_v17, %v1379_v18  ;;  %v1384_v23 = vmul.f32 %v1884_v19, %v1361_v4 }
 0x26c   :  { %v1392_v24 = vadd.f32 1e-05, %v1382_v22 }
 0x26d   :  { %1887 = vrcp.f32 %v1391_v20  ;;  %v1386_v26 = vsel %vm1385_vm8, %v1361_v4, %v1384_v23 }
 0x26e   :  { %1889 = vrcp.f32 %v1392_v24  ;;  %v1389_v27 = vsel %vm1387_vm9, %v1388_v25, %v1386_v26 }
 0x26f   :  { %v1393_v28 = vadd.f32 1e-05, %v1389_v27 }
 0x271   :  { %1891 = vrcp.f32 %v1393_v28 }
 0x276   :  { %v1886_v29 = vpop.eup %1885 }
 0x277   :  { %v1395_v31 = vmul.f32 %v1886_v29, %v2304_v46 }
 0x279   :  { %v1409_v33 = vmul.f32 %v1559_v30, %v1395_v31 }
 0x27a   :  { %v1888_v34 = vpop.eup %1887 }
 0x27b   :  { %v1890_v35 = vpop.eup %1889  ;;  %v1420_v36 = vadd.f32 %v1560_v32, %v1409_v33  ;;  %v1397_v37 = vmul.f32 %v1888_v34, %v2310_v53 }
 0x27c   :  { %v1399_v38 = vmul.f32 %v1890_v35, %v2302_v45 }
 0x27d   :  { %1424 = vst.msk [vmem:[%s2353_s5] sm:$0xff] %vm1320_vm1, %v1420_v36  ;;  %v1410_v39 = vmul.f32 %v1559_v30, %v1397_v37 }
 0x27e   :  { %v1892_v40 = vpop.eup %1891  ;;  %v1411_v41 = vmul.f32 %v1559_v30, %v1399_v38 }
 0x27f   :  { %v1421_v42 = vadd.f32 %v1560_v32, %v1410_v39  ;;  %v1401_v43 = vmul.f32 %v1892_v40, %v2308_v52 }
 0x280   :  { %v1422_v44 = vadd.f32 %v1560_v32, %v1411_v41 }
 0x281   :  { %1425 = vst.msk [vmem:[%s2353_s5 + $0x8] sm:$0xff] %vm1320_vm1, %v1421_v42  ;;  %v1412_v46 = vmul.f32 %v1559_v30, %v1401_v43 }
 0x282   :  { %1426 = vst.msk [vmem:[%s2353_s5 + $0x10] sm:$0xff] %vm1320_vm1, %v1422_v44 }
 0x283   :  { %v1423_v45 = vadd.f32 %v1560_v32, %v1412_v46 }
 0x285   :  { %1427 = vst.msk [vmem:[%s2353_s5 + $0x18] sm:$0xff] %vm1320_vm1, %v1423_v45 }

// kernel: cltv_forward.12
= control target key start
LH: loop header
LB: loop body
LE: loop exit
PB: predicated region body
PF: predicated region fallthrough
CT: control target
= control target key end

     0   :  { %s444_s6 = smov 0   ;;  %s479_s0 = inlined_call_operand.vmem [shape: f32[2,16,128], index: 0, kind: input, shape index: {}]   ;;  %s480_s1 = inlined_call_operand.vmem [shape: f32[2,16,32], index: 1, kind: output, shape index: {}]  }
   0x1 LB: > { %s359_s7 = sadd.s32 4294967295, %s428_s6   ;;  %p363_p0 = scmp.ge.s32.totalorder %s428_s6, 1  ;;  %s428_s6 = sphi %s444_s6, %s11_s6  }
   0x2   : > { %p87_p1 = scmp.lt.s32.totalorder %s428_s6, 3 }
   0x4   : > { %p88_p2 = pnand %p363_p0, %p87_p1 }
   0x5   : > { %p107_p3 = scmp.lt.s32.totalorder (!%p88_p2), %s359_s7, 1  ;;  %s430_s12 = smov (!%p88_p2), 96  }
   0x6   : > { %91 = sbr.rel (%p88_p2) target bundleno = 732 (0x2dc), region = 24  ;;  %s431_s13 = smov (!%p88_p2), 64  }
   0xb   : > { %s482_s7 = smov (!%p107_p3, %s359_s7), 1  ;;  %vm122_vm0 = vcmask 523520   ;;  %vm150_vm1 = vcmask 261120   ;;  %vm199_vm2 = vcmask 130048   ;;  %v432_v49 = vmov 0.0  }
   0xc   : > { %s373_s8 = sshll.u32 %s482_s7, 4  ;;  %387 = vmatprep.subr.bf16.mxu1 %v432_v49  ;;  %vm433_vm3 = vmmov 0  }
   0xd   : > { %s111_s11 = scalar_lea.vmem %s479_s0, %s373_s8  ;;  %391 = vmatprep.mubr.msk.bf16.mxu1 %vm433_vm3, %v432_v49  ;;  %s116_s16 = scalar_lea.vmem %s480_s1, %s373_s8 }
   0xe   : > { %v118_v0 = vld [vmem:[%s111_s11] sm:$0xff]  ;;  %v119_v1 = vld [vmem:[%s111_s11 + $0x8] sm:$0xff] }
   0xf   : > { %v120_v2 = vmul.f32 0.4204482, %v118_v0  ;;  %v121_v3 = vmul.f32 0.4204482, %v119_v1  ;;  %v174_v4 = vpack.c.bf16 %v119_v1, %v118_v0 }
  0x11   : > { %v123_v5 = vsel %vm122_vm0, %v120_v2, -inf  ;;  %v124_v6 = vsel %vm122_vm0, %v121_v3, -inf  ;;  %v154_v33 = vsel %vm150_vm1, %v121_v3, -inf  ;;  %v151_v36 = vsel %vm150_vm1, %v120_v2, -inf }
  0x12   : > { %v125_v7 = vmax.f32 %v123_v5, %v124_v6 }
  0x14   : > { %v126_v8 = vrot.slane %v125_v7, 4 }
  0x16   : > { %v127_v9 = vmax.f32 %v125_v7, %v126_v8 }
  0x18   : > { %v128_v10 = vrot.slane %v127_v9, 2 }
  0x1a   : > { %v129_v11 = vmax.f32 %v127_v9, %v128_v10 }
  0x1c   : > { %v130_v12 = vrot.slane %v129_v11, 1 }
  0x1e   : > { %v131_v13 = vmax.f32 %v129_v11, %v130_v12 }
  0x20   : > { %v132_v14 = vsub.f32 %v120_v2, %v131_v13  ;;  %v133_v15 = vsub.f32 %v121_v3, %v131_v13 }
  0x22   : > { %v134_v16 = vmul.f32 1.442695, %v132_v14  ;;  %v136_v17 = vmul.f32 1.442695, %v133_v15 }
  0x24   : > { %408 = vpow2.f32 %v134_v16 }
  0x25   : > { %410 = vpow2.f32 %v136_v17 }
  0x31   : > { %v409_v18 = vpop.eup %408 }
  0x32   : > { %v411_v19 = vpop.eup %410  ;;  %v138_v20 = vsel %vm122_vm0, %v409_v18, 0.0 }
  0x33   : > { %v139_v21 = vsel %vm122_vm0, %v411_v19, 0.0 }
  0x34   : > { %v140_v22 = vadd.f32 %v139_v21, %v138_v20 }
  0x36   : > { %v141_v23 = vrot.slane %v140_v22, 4 }
  0x38   : > { %v142_v24 = vadd.f32 %v141_v23, %v140_v22 }
  0x3a   : > { %v143_v25 = vrot.slane %v142_v24, 2 }
  0x3c   : > { %v144_v26 = vadd.f32 %v143_v25, %v142_v24 }
  0x3e   : > { %v145_v27 = vrot.slane %v144_v26, 1 }
  0x40   : > { %v146_v28 = vadd.f32 %v145_v27, %v144_v26 }
  0x42   : > { %412 = vrcp.f32 %v146_v28 }
  0x4f   : > { %v413_v29 = vpop.eup %412 }
  0x50   : > { %v148_v30 = vmul.f32 %v413_v29, %v409_v18  ;;  %v149_v31 = vmul.f32 %v413_v29, %v411_v19 }
  0x52   : > { %v173_v32 = vpack.c.bf16 %v149_v31, %v148_v30 }
  0x54   : > { %176 = vrot.lane.b32.xlu0 %v173_v32, %s430_s12 }
  0x58   : > { %196 = vrot.lane.b32.xlu0 %v174_v4, %s431_s13 }
  0x77   : > { %155 = vmax.xlane.f32.xlu0 %v154_v33 }
  0xc6   : > { %v177_v34 = vpop.permute.xlu0 %176 }
  0xc7   : > { %179 = vxpose.xlu1.c.b16.start.end [1/1] (short) (narrow) %v177_v34, 32 }
  0xca   : > { %v197_v35 = vpop.permute.xlu0 %196 }
  0xcb   : > { %381 = vmatprep.subr.bf16.mxu0 %v197_v35 }
  0xcc   : > { %382 = vmatpush3.bf16.msra.mxu0 %v197_v35 }
  0xd8   : > { %152 = vmax.xlane.f32.xlu1 %v151_v36 }
 0x100   : > { %v156_v39 = vpop.xlane.xlu0 %155 }
 0x101   : > { %v158_v40 = vsub.f32 %v121_v3, %v156_v39 }
 0x103   : > { %v161_v42 = vmul.f32 1.442695, %v158_v40 }
 0x105   : > { %414 = vpow2.f32 %v161_v42 }
 0x112   : > { %v415_v45 = vpop.eup %414 }
 0x113   : > { %v166_v48 = vsel %vm150_vm1, %v415_v45, 0.0 }
 0x129   : > { %v187_v37 = vpop.trf.xlu1 }
 0x12a   : > { %383 = vmatprep.mubr.msk.bf16.mxu0 %vm199_vm2, %v187_v37 }
 0x12d   : > { %v188_v38 = vpop.trf.xlu1 }
 0x12e   : > { %384 = vmatmul.mubr.msk.bf16.vlgmr.msra.gmra.mxu0 %vm199_vm2, %v188_v38 }
 0x161   : > { %v153_v41 = vpop.xlane.xlu1 %152 }
 0x162   : > { %v157_v43 = vsub.f32 %v120_v2, %v153_v41 }
 0x164   : > { %v159_v44 = vmul.f32 1.442695, %v157_v43 }
 0x166   : > { %416 = vpow2.f32 %v159_v44 }
 0x173   : > { %v417_v46 = vpop.eup %416 }
 0x174   : > { %v163_v47 = vsel %vm150_vm1, %v417_v46, 0.0 }
 0x175   : > { %164 = vadd.xlane.f32.xlu1 %v163_v47 }
 0x179   : > { %167 = vadd.xlane.f32.xlu1 %v166_v48 }
 0x1ee   : > { %v385_v50 = vpop.f32.mrf.mxu0 }
 0x1f0   : > { %v240_v51 = vpop.f32.mrf.mxu0 }
 0x1f2   : > { %v386_v52 = vpop.f32.mrf.mxu0 }
 0x1f3   : > { %v257_v53 = vpack.c.bf16 %v386_v52, %v385_v50 }
 0x1f4   : > { %v243_v54 = vpop.f32.mrf.mxu0 }
 0x1f5   : > { %388 = vmatpush3.bf16.msra.mxu1 %v257_v53  ;;  %v256_v55 = vpack.c.bf16 %v243_v54, %v240_v51 }
 0x1f6   : > { %389 = vmatprep.subr.bf16.mxu1 %v432_v49 }
 0x1f9   : > { %390 = vmatpush3.bf16.msra.mxu1 %v256_v55 }
 0x1fe   : > { %v165_v56 = vpop.xlane.xlu1 %164 }
 0x1ff   : > { %418 = vrcp.f32 %v165_v56 }
 0x202   : > { %v168_v57 = vpop.xlane.xlu1 %167 }
 0x203   : > { %420 = vrcp.f32 %v168_v57 }
 0x20c   : > { %v419_v58 = vpop.eup %418 }
 0x20d   : > { %v170_v60 = vmul.f32 %v419_v58, %v417_v46 }
 0x210   : > { %v421_v59 = vpop.eup %420 }
 0x211   : > { %v172_v61 = vmul.f32 %v421_v59, %v415_v45 }
 0x213   : > { %v255_v62 = vpack.c.bf16 %v172_v61, %v170_v60 }
 0x215   : > { %392 = vmatmul.mubr.msk.bf16.vlgmr.msra.gmra.mxu1 %vm150_vm1, %v255_v62 }
 0x2d5   : > { %v295_v63 = vpop.f32.mrf.mxu1 }
 0x2d6   : > { %302 = vst.msk [vmem:[%s116_s16] sm:$0xff] %vm150_vm1, %v295_v63 }
 0x2d7   : > { %v393_v0 = vpop.f32.mrf.mxu1 }
 0x2d9   : > { %v298_v1 = vpop.f32.mrf.mxu1 }
 0x2da   : > { %303 = vst.msk [vmem:[%s116_s16 + $0x8] sm:$0xff] %vm150_vm1, %v298_v1 }
 0x2db   : > { %v394_v2 = vpop.f32.mrf.mxu1 }
 0x2dc PF: > { %s11_s6 = sadd.s32 1, %s428_s6  }
 0x2dd   : > { %p8_p4 = scmp.ge.s32.totalorder %s11_s6, 4  }
 0x2df   :  { %10 = sbr.rel (!%p8_p4) target bundleno = 1 (0x1), region = 54 }

// kernel: cltv_forward.11
= control target key start
LH: loop header
LB: loop body
LE: loop exit
PB: predicated region body
PF: predicated region fallthrough
CT: control target
= control target key end

     0   :  { %s1011_s12 = smov 0   ;;  %s1219_s0 = inlined_call_operand.vmem [shape: bf16[2,38,64], index: 0, kind: input, shape index: {}]   ;;  %s1220_s1 = inlined_call_operand.vmem [shape: bf16[576,128], index: 1, kind: input, shape index: {}]   ;;  %s1221_s2 = inlined_call_operand.vmem [shape: f32[1,128], index: 2, kind: input, shape index: {}]   ;;  %s1222_s3 = inlined_call_operand.vmem [shape: f32[2,24,128], index: 3, kind: output, shape index: {}]  }
   0x1 LB: > { %s801_s13 = sadd.s32 4294967295, %s988_s12   ;;  %p805_p0 = scmp.ge.s32.totalorder %s988_s12, 1  ;;  %s988_s12 = sphi %s1011_s12, %s13_s12  }
   0x2   : > { %p137_p1 = scmp.lt.s32.totalorder %s988_s12, 3 }
   0x4   : > { %p138_p2 = pnand %p805_p0, %p137_p1 }
   0x5   : > { %p161_p3 = scmp.lt.s32.totalorder (!%p138_p2), %s801_s13, 1  ;;  %s990_s9 = smov (!%p138_p2), 64  }
   0x6   : > { %141 = sbr.rel (%p138_p2) target bundleno = 361 (0x169), region = 32 }
   0xb   : > { %v945_v0 = vld [vmem:[%s1220_s1 + $0x78] sm:$0xff]   ;;  %s1224_s13 = smov (!%p161_p3, %s801_s13), 1  ;;  %v947_v2 = vld [vmem:[%s1220_s1 + $0x70] sm:$0xff]   ;;  %vm241_vm0 = vsmask.f32 5376  ;;  %vm212_vm2 = vcmask 1044480  }
   0xc   : > { %855 = vmatprep.subr.bf16.mxu0 %v945_v0  ;;  %v946_v1 = vld [vmem:[%s1220_s1 + $0x38] sm:$0xff]   ;;  %s929_s20 = smul.u32 20, %s1224_s13  ;;  %v948_v3 = vld [vmem:[%s1220_s1 + $0x30] sm:$0xff]   ;;  %vm188_vm1 = vsmask.f32 7424  ;;  %v951_v15 = vld [vmem:[%s1220_s1 + $0x68] sm:$0xff]  }
   0xd   : > { %856 = vmatpush3.bf16.msra.mxu0 %v946_v1  ;;  %v949_v4 = vld [vmem:[%s1220_s1 + $0xf8] sm:$0xff]   ;;  %v952_v23 = vld [vmem:[%s1220_s1 + $0x28] sm:$0xff]   ;;  %v953_v24 = vld [vmem:[%s1220_s1 + $0xf0] sm:$0xff]   ;;  %vm237_vm3 = vcmask 1045504   ;;  %vm220_vm4 = vsmask.f32 4352 }
   0xe   : > { %857 = vmatprep.subr.bf16.mxu0 %v947_v2  ;;  %s165_s27 = scalar_lea.vmem %s1219_s0, %s929_s20  ;;  %v950_v5 = vld [vmem:[%s1220_s1 + $0xb8] sm:$0xff]   ;;  %883 = vmatprep.subr.bf16.mxu1 %v949_v4  ;;  %v954_v33 = vld [vmem:[%s1220_s1 + $0xb0] sm:$0xff]   ;;  %v955_v38 = vld [vmem:[%s1220_s1 + $0x60] sm:$0xff]   ;;  %vm208_vm5 = vcmask 1046528   ;;  %vm266_vm6 = vcmask 523264   ;;  %s930_s19 = smul.u32 24, %s1224_s13 }
   0xf   : > { %v1043_v6 = vld [vmem:[%s165_s27 + $0x8] sm:$0xf]  ;;  %v1045_v7 = vld [vmem:[%s165_s27 + $0xc] sm:$0xf]  ;;  %v176_v8 = vld [vmem:[%s165_s27 + $0x10] sm:$0x7]  ;;  %884 = vmatpush3.bf16.msra.mxu1 %v950_v5 }
  0x10   : > { %v1049_v9 = vcombine.low %v1043_v6, %v1045_v7  ;;  %v1052_v10 = vcombine.low %v1045_v7, %v176_v8  ;;  %v172_v11 = vld [vmem:[%s165_s27] sm:$0xf]  ;;  %v173_v12 = vld [vmem:[%s165_s27 + $0x4] sm:$0xf]  ;;  %885 = vmatprep.subr.bf16.mxu1 %v953_v24  ;;  %v957_v44 = vld [vmem:[%s1220_s1 + $0xe8] sm:$0xff]   ;;  %v812_v56 = vcombine.low %v1045_v7, %v1045_v7 }
  0x11   : > { %858 = vmatpush3.bf16.msra.mxu0 %v948_v3  ;;  %v1054_v13 = vcombine.low %v172_v11, %v173_v12  ;;  %v1057_v14 = vcombine.low %v173_v12, %v1043_v6  ;;  %v956_v42 = vld [vmem:[%s1220_s1 + $0x20] sm:$0xff]   ;;  %v958_v47 = vld [vmem:[%s1220_s1 + $0xa8] sm:$0xff]   ;;  %v959_v50 = vld [vmem:[%s1220_s1 + $0x58] sm:$0xff]  }
  0x12   : > { %v214_v16 = vrot.slane %v1049_v9, 3  ;;  %v251_v17 = vshrl.u32 %v1052_v10, 16  ;;  %v254_v18 = vshll.u32 %v1052_v10, 16  ;;  %v197_v19 = vshll.u32 %v1049_v9, 16  ;;  %859 = vmatprep.subr.bf16.mxu0 %v951_v15  ;;  %v960_v52 = vld [vmem:[%s1220_s1 + $0x18] sm:$0xff]   ;;  %v961_v54 = vld [vmem:[%s1220_s1 + $0xe0] sm:$0xff]  }
  0x13   : > { %v213_v20 = vrot.slane %v1054_v13, 3  ;;  %v243_v21 = vshrl.u32 %v1057_v14, 16  ;;  %v246_v22 = vshll.u32 %v1057_v14, 16  ;;  %v190_v27 = vshrl.u32 %v1054_v13, 16  ;;  %886 = vmatpush3.bf16.msra.mxu1 %v954_v33  ;;  %v962_v57 = vld [vmem:[%s1220_s1 + $0xa0] sm:$0xff]   ;;  %v963_v60 = vld [vmem:[%s1220_s1 + $0x50] sm:$0xff]  }
  0x14   : > { %218 = vrot.lane.b32.xlu1 %v214_v16, %s990_s9  ;;  %v253_v25 = vrot.slane %v251_v17, 2  ;;  %v256_v26 = vrot.slane %v254_v18, 3  ;;  %v192_v28 = vshll.u32 %v1054_v13, 16  ;;  %v199_v32 = vrot.slane %v197_v19, 1  ;;  %887 = vmatprep.subr.bf16.mxu1 %v957_v44  ;;  %v964_v63 = vld [vmem:[%s1220_s1 + $0x10] sm:$0xff]   ;;  %v965_v0 = vld [vmem:[%s1220_s1 + $0xd8] sm:$0xff]  }
  0x15   : > { %v215_v29 = vsel %vm212_vm2, %v213_v20, %v214_v16  ;;  %v245_v30 = vrot.slane %v243_v21, 2  ;;  %v248_v31 = vrot.slane %v246_v22, 3  ;;  %860 = vmatpush3.bf16.msra.mxu0 %v952_v23  ;;  %v225_v36 = vrot.slane %v197_v19, 4  ;;  %v966_v2 = vld [vmem:[%s1220_s1 + $0x98] sm:$0xff]   ;;  %v967_v3 = vld [vmem:[%s1220_s1 + $0x48] sm:$0xff]   ;;  %v969_v5 = vld [vmem:[%s1220_s1 + $0xd0] sm:$0xff]  }
  0x16   : > { %216 = vrot.lane.b32.xlu0 %v215_v29, %s990_s9  ;;  %v257_v34 = vor.u32 %v256_v26, %v253_v25  ;;  %v194_v35 = vrot.slane %v192_v28, 1  ;;  %v201_v37 = vshrl.u32 %v1049_v9, 16  ;;  %861 = vmatprep.subr.bf16.mxu0 %v955_v38  ;;  %v221_v46 = vrot.slane %v190_v27, 3  ;;  %v968_v4 = vld [vmem:[%s1220_s1 + $0x8] sm:$0xff]   ;;  %v970_v7 = vld [vmem:[%s1220_s1 + $0x90] sm:$0xff]   ;;  %v971_v8 = vld [vmem:[%s1220_s1 + $0x40] sm:$0xff]  }
  0x17   : > { %v249_v39 = vor.u32 %v248_v31, %v245_v30  ;;  %v238_v51 = vrot.slane %v1057_v14, 2  ;;  %888 = vmatpush3.bf16.msra.mxu1 %v958_v47  ;;  %v239_v53 = vrot.slane %v1052_v10, 2  ;;  %v222_v55 = vrot.slane %v192_v28, 4  ;;  %v972_v11 = vld [vmem:[%s1220_s1] sm:$0xff]   ;;  %v973_v12 = vld [vmem:[%s1220_s1 + $0xc8] sm:$0xff]   ;;  %v975_v15 = vld [vmem:[%s1220_s1 + $0x118] sm:$0xff]  }
  0x18   : > { %v195_v40 = vor.u32 %v194_v35, %v190_v27  ;;  %v224_v41 = vrot.slane %v201_v37, 3  ;;  %v203_v49 = vor.u32 %v201_v37, %v199_v32  ;;  %v263_v59 = vrot.slane %v1057_v14, 3  ;;  %889 = vmatprep.subr.bf16.mxu1 %v961_v54  ;;  %v976_v16 = vld [vmem:[%s1220_s1 + $0xc0] sm:$0xff]   ;;  %v978_v29 = vld [vmem:[%s1220_s1 + $0x110] sm:$0xff]  }
  0x19   : > { %v258_v43 = vsel %vm241_vm0, %v249_v39, %v257_v34  ;;  %862 = vmatpush3.bf16.msra.mxu0 %v956_v42  ;;  %v240_v58 = vsel %vm237_vm3, %v238_v51, %v239_v53  ;;  %v223_v61 = vor.u32 %v222_v55, %v221_v46  ;;  %v264_v62 = vrot.slane %v1052_v10, 3  ;;  %v977_v17 = vld [vmem:[%s1220_s1 + $0x80] sm:$0xff]  }
  0x1a   : > { %259 = vrot.lane.b32.xlu1 %v258_v43, %s990_s9  ;;  %v200_v45 = vsel %vm188_vm1, %v195_v40, %v199_v32  ;;  %v1099_v48 = vor.u32 %v225_v36, %v224_v41  ;;  %863 = vmatprep.subr.bf16.mxu0 %v959_v50  ;;  %v209_v19 = vrot.slane %v1054_v13, 1  ;;  %v210_v20 = vrot.slane %v1049_v9, 1  ;;  %v981_v37 = vld [vmem:[%s1220_s1 + $0x100] sm:$0xff]  }
  0x1b   : > { %204 = vrot.lane.b32.xlu0 %v200_v45, %s990_s9  ;;  %890 = vmatpush3.bf16.msra.mxu1 %v962_v57  ;;  %v1138_v1 = vsel %vm212_vm2, %v263_v59, %v264_v62  ;;  %v809_v31 = vcombine.low %v1043_v6, %v1043_v6  ;;  %v814_v10 = vld [vmem:[%s1221_s2] ss:$0 sm:$0xff] }
  0x1c   : > { %891 = vmatprep.subr.bf16.mxu1 %v965_v0  ;;  %v227_v18 = vsel %vm220_vm4, %v223_v61, %v1099_v48  ;;  %v211_v22 = vsel %vm208_vm5, %v209_v19, %v210_v20 }
  0x1d   : > { %864 = vmatpush3.bf16.msra.mxu0 %v960_v52 }
  0x1e   : > { %230 = vrot.lane.b32.xlu1 %v1057_v14, %s990_s9  ;;  %865 = vmatprep.subr.bf16.mxu0 %v963_v60  ;;  %v974_v14 = vld [vmem:[%s1220_s1 + $0x88] sm:$0xff]  }
  0x1f   : > { %206 = vrot.lane.b32.xlu0 %v203_v49, %s990_s9  ;;  %892 = vmatpush3.bf16.msra.mxu1 %v966_v2 }
  0x20   : > { %893 = vmatprep.subr.bf16.mxu1 %v969_v5 }
  0x21   : > { %866 = vmatpush3.bf16.msra.mxu0 %v964_v63 }
  0x22   : > { %232 = vrot.lane.b32.xlu1 %v812_v56, %s990_s9  ;;  %867 = vmatprep.subr.bf16.mxu0 %v967_v3 }
  0x23   : > { %261 = vrot.lane.b32.xlu0 %v257_v34, %s990_s9  ;;  %894 = vmatpush3.bf16.msra.mxu1 %v970_v7  ;;  %v979_v34 = vld [vmem:[%s1220_s1 + $0x108] sm:$0xff]   ;;  %s170_s9 = scalar_lea.vmem %s1222_s3, %s930_s19 }
  0x24   : > { %895 = vmatprep.subr.bf16.mxu1 %v973_v12 }
  0x25   : > { %868 = vmatpush3.bf16.msra.mxu0 %v968_v4 }
  0x26   : > { %869 = vmatprep.subr.bf16.mxu0 %v971_v8 }
  0x27   : > { %896 = vmatpush3.bf16.msra.mxu1 %v974_v14 }
  0x28   : > { %897 = vmatprep.subr.bf16.mxu1 %v976_v16 }
  0x29   : > { %870 = vmatpush3.bf16.msra.mxu0 %v972_v11 }
  0x2a   : > { %917 = vmatprep.subr.bf16.mxu0 %v975_v15 }
  0x2b   : > { %898 = vmatpush3.bf16.msra.mxu1 %v977_v17 }
  0x86   : > { %v219_v21 = vpop.permute.xlu1 %218 }
  0x87   : > { %v280_v27 = vsel %vm266_vm6, %v210_v20, %v219_v21 }
  0x88   : > { %v217_v23 = vpop.permute.xlu0 %216 }
  0x89   : > { %v276_v24 = vsel %vm266_vm6, %v211_v22, %v217_v23 }
  0x8a   : > { %631 = vmatprep.mubr.bf16.mxu0 %v276_v24 }
  0x8c   : > { %v260_v25 = vpop.permute.xlu1 %259 }
  0x8d   : > { %v205_v26 = vpop.permute.xlu0 %204  ;;  %v292_v28 = vsel %vm266_vm6, %v240_v58, %v260_v25 }
  0x8e   : > { %v268_v9 = vsel %vm266_vm6, %v1054_v13, %v205_v26  ;;  %679 = vmatprep.mubr.bf16.mxu1 %v292_v28 }
  0x8f   : > { %632 = vmatmul.mubr.bf16.vlgmr.msra.gmra.mxu0 %v268_v9 }
  0x90   : > { %918 = vmatpush3.bf16.msra.mxu0 %v975_v15  ;;  %639 = vmatprep.mubr.bf16.mxu0 %v280_v27  ;;  %v231_v30 = vpop.permute.xlu1 %230 }
  0x91   : > { %919 = vmatprep.subr.bf16.mxu0 %v978_v29  ;;  %v284_v32 = vsel %vm266_vm6, %v227_v18, %v231_v30  ;;  %v207_v33 = vpop.permute.xlu0 %206 }
  0x92   : > { %680 = vmatmul.mubr.bf16.vlgmr.msra.gmra.mxu1 %v284_v32  ;;  %v272_v13 = vsel %vm266_vm6, %v809_v31, %v207_v33 }
  0x94   : > { %920 = vmatpush3.bf16.msra.mxu0 %v978_v29  ;;  %v233_v35 = vpop.permute.xlu1 %232 }
  0x95   : > { %921 = vmatprep.subr.bf16.mxu0 %v979_v34  ;;  %v262_v36 = vpop.permute.xlu0 %261  ;;  %v288_v38 = vsel %vm266_vm6, %v1099_v48, %v233_v35 }
  0x96   : > { %v296_v6 = vsel %vm266_vm6, %v239_v53, %v262_v36 }
  0x97   : > { %640 = vmatmul.mubr.bf16.gmra.mxu0 %v272_v13  ;;  %687 = vmatprep.mubr.bf16.mxu1 %v296_v6 }
  0x98   : > { %922 = vmatpush3.bf16.msra.mxu0 %v979_v34  ;;  %925 = vmatprep.mubr.msk.bf16.mxu0 %vm266_vm6, %v1138_v1 }
  0x99   : > { %923 = vmatprep.subr.bf16.mxu0 %v981_v37 }
  0x9a   : > { %688 = vmatmul.mubr.bf16.gmra.mxu1 %v288_v38 }
  0x9c   : > { %924 = vmatpush3.bf16.msra.mxu0 %v981_v37 }
  0x9f   : > { %926 = vmatmul.mubr.msk.bf16.vlgmr.msra.gmra.mxu0 %vm266_vm6, %v264_v62 }
 0x14f   : > { %v871_v39 = vpop.f32.mrf.mxu0 }
 0x151   : > { %v872_v40 = vpop.f32.mrf.mxu0 }
 0x152   : > { %v899_v41 = vpop.f32.mrf.mxu1  ;;  %v873_v49 = vadd.f32 %v872_v40, %v871_v39 }
 0x153   : > { %v874_v42 = vpop.f32.mrf.mxu0 }
 0x154   : > { %v900_v43 = vpop.f32.mrf.mxu1  ;;  %v634_v58 = vadd.f32 %v873_v49, %v814_v10 }
 0x155   : > { %v875_v44 = vpop.f32.mrf.mxu0  ;;  %v901_v53 = vadd.f32 %v900_v43, %v899_v41 }
 0x156   : > { %v902_v45 = vpop.f32.mrf.mxu1  ;;  %v876_v59 = vadd.f32 %v875_v44, %v874_v42 }
 0x157   : > { %v877_v46 = vpop.f32.mrf.mxu0  ;;  %v682_v1 = vadd.f32 %v901_v53, %v634_v58 }
 0x158   : > { %v903_v47 = vpop.f32.mrf.mxu1  ;;  %v637_v4 = vadd.f32 %v876_v59, %v814_v10 }
 0x159   : > { %v878_v48 = vpop.f32.mrf.mxu0  ;;  %v904_v63 = vadd.f32 %v903_v47, %v902_v45 }
 0x15a   : > { %v879_v50 = vadd.f32 %v878_v48, %v877_v46  ;;  %v905_v51 = vpop.f32.mrf.mxu1 }
 0x15b   : > { %v880_v52 = vpop.f32.mrf.mxu0  ;;  %v685_v8 = vadd.f32 %v904_v63, %v637_v4 }
 0x15c   : > { %v906_v54 = vpop.f32.mrf.mxu1  ;;  %v642_v55 = vadd.f32 %v879_v50, %v814_v10 }
 0x15d   : > { %v881_v56 = vpop.f32.mrf.mxu0  ;;  %v907_v57 = vadd.f32 %v906_v54, %v905_v51 }
 0x15e   : > { %v908_v60 = vpop.f32.mrf.mxu1 }
 0x15f   : > { %v690_v61 = vadd.f32 %v907_v57, %v642_v55  ;;  %v927_v62 = vpop.f32.mrf.mxu0 }
 0x160   : > { %v909_v0 = vpop.f32.mrf.mxu1 }
 0x161   : > { %v738_v2 = vadd.f32 %v927_v62, %v690_v61  ;;  %v729_v3 = vpop.f32.mrf.mxu0 }
 0x162   : > { %v730_v5 = vadd.f32 %v729_v3, %v682_v1 }
 0x163   : > { %745 = vst [vmem:[%s170_s9 + $0x10] sm:$0xff] %v738_v2  ;;  %v928_v7 = vpop.f32.mrf.mxu0 }
 0x164   : > { %743 = vst [vmem:[%s170_s9] sm:$0xff] %v730_v5 }
 0x165   : > { %v732_v11 = vpop.f32.mrf.mxu0 }
 0x166   : > { %v733_v12 = vadd.f32 %v732_v11, %v685_v8 }
 0x168   : > { %744 = vst [vmem:[%s170_s9 + $0x8] sm:$0xff] %v733_v12 }
 0x169 PF: > { %s13_s12 = sadd.s32 1, %s988_s12  }
 0x16a   : > { %p10_p4 = scmp.ge.s32.totalorder %s13_s12, 4  }
 0x16c   :  { %12 = sbr.rel (!%p10_p4) target bundleno = 1 (0x1), region = 62 }

// kernel: cltv_forward.13
= control target key start
LH: loop header
LB: loop body
LE: loop exit
PB: predicated region body
PF: predicated region fallthrough
CT: control target
= control target key end

     0   :  { %s763_s12 = smov 0   ;;  %s917_s0 = inlined_call_operand.vmem [shape: bf16[2,38,32], index: 0, kind: input, shape index: {}]   ;;  %s918_s1 = inlined_call_operand.vmem [shape: bf16[288,64], index: 1, kind: input, shape index: {}]   ;;  %s919_s2 = inlined_call_operand.vmem [shape: f32[1,64], index: 2, kind: input, shape index: {}]   ;;  %s920_s3 = inlined_call_operand.vmem [shape: f32[2,24,64], index: 3, kind: output, shape index: {}]  }
   0x1 LB: > { %s619_s13 = sadd.s32 4294967295, %s738_s12   ;;  %p623_p0 = scmp.ge.s32.totalorder %s738_s12, 1  ;;  %s738_s12 = sphi %s763_s12, %s13_s12  }
   0x2   : > { %p137_p1 = scmp.lt.s32.totalorder %s738_s12, 3 }
   0x4   : > { %p138_p2 = pnand %p623_p0, %p137_p1 }
   0x5   : > { %p161_p3 = scmp.lt.s32.totalorder (!%p138_p2), %s619_s13, 1  ;;  %s740_s30 = smov (!%p138_p2), 32  }
   0x6   : > { %141 = sbr.rel (%p138_p2) target bundleno = 360 (0x168), region = 32  ;;  %s741_s8 = smov (!%p138_p2), 64  }
   0x7   : > { %s742_s21 = smov (!%p138_p2), 96  }
   0xb   : > { %v713_v0 = vld [vmem:[%s918_s1 + $0x78] sm:$0xff]   ;;  %s922_s13 = smov (!%p161_p3, %s619_s13), 1  ;;  %v715_v2 = vld [vmem:[%s918_s1 + $0x70] sm:$0xff]   ;;  %vm241_vm0 = vcmask 1045504   ;;  %vm188_vm1 = vsmask.f32 7424 }
   0xc   : > { %v714_v1 = vld [vmem:[%s918_s1 + $0x38] sm:$0xff]   ;;  %655 = vmatprep.subr.bf16.mxu0 %v713_v0  ;;  %s695_s18 = smul.u32 20, %s922_s13  ;;  %v716_v3 = vld [vmem:[%s918_s1 + $0x30] sm:$0xff]   ;;  %vm208_vm2 = vcmask 1046528   ;;  %v717_v4 = vld [vmem:[%s918_s1 + $0x68] sm:$0xff]   ;;  %vm216_vm3 = vcmask 1044480  }
   0xd   : > { %656 = vmatpush3.bf16.msra.mxu0 %v714_v1  ;;  %v718_v15 = vld [vmem:[%s918_s1 + $0x28] sm:$0xff]   ;;  %vm249_vm4 = vsmask.f32 5376  ;;  %v719_v20 = vld [vmem:[%s918_s1 + $0x60] sm:$0xff]   ;;  %v721_v36 = vld [vmem:[%s918_s1 + $0x58] sm:$0xff]   ;;  %vm274_vm6 = vcmask 261120  }
   0xe   : > { %s165_s25 = scalar_lea.vmem %s917_s0, %s695_s18  ;;  %657 = vmatprep.subr.bf16.mxu0 %v715_v2  ;;  %v720_v24 = vld [vmem:[%s918_s1 + $0x20] sm:$0xff]   ;;  %v722_v41 = vld [vmem:[%s918_s1 + $0x18] sm:$0xff]   ;;  %vm224_vm5 = vsmask.f32 4352  ;;  %v723_v48 = vld [vmem:[%s918_s1 + $0x50] sm:$0xff]   ;;  %vm280_vm7 = vcmask 523264  }
   0xf   : > { %v173_v5 = vld [vmem:[%s165_s25 + $0x4] sm:$0xf]  ;;  %v792_v6 = vld [vmem:[%s165_s25 + $0x8] sm:$0xf]  ;;  %v172_v7 = vld [vmem:[%s165_s25] sm:$0xf] }
  0x10   : > { %v795_v8 = vcombine.low %v173_v5, %v792_v6  ;;  %v797_v9 = vcombine.low %v172_v7, %v173_v5  ;;  %v175_v10 = vld [vmem:[%s165_s25 + $0xc] sm:$0xf]  ;;  %v176_v11 = vld [vmem:[%s165_s25 + $0x10] sm:$0x7]  ;;  %v727_v0 = vld [vmem:[%s918_s1 + $0x40] sm:$0xff]   ;;  %vm285_vm8 = vcmask 785408  }
  0x11   : > { %658 = vmatpush3.bf16.msra.mxu0 %v716_v3  ;;  %v799_v12 = vcombine.low %v175_v10, %v176_v11  ;;  %v630_v13 = vcombine.low %v175_v10, %v175_v10  ;;  %v802_v14 = vcombine.low %v792_v6, %v175_v10  ;;  %v724_v56 = vld [vmem:[%s918_s1 + $0x10] sm:$0xff]   ;;  %v725_v60 = vld [vmem:[%s918_s1 + $0x48] sm:$0xff]   ;;  %v730_v1 = vld [vmem:[%s918_s1 + $0x80] sm:$0xff]  }
  0x12   : > { %659 = vmatprep.subr.bf16.mxu0 %v717_v4  ;;  %234 = vrot.lane.b32.xlu0 %v795_v8, %s740_s30  ;;  %v242_v16 = vrot.slane %v795_v8, 2  ;;  %v209_v17 = vrot.slane %v797_v9, 1  ;;  %v190_v18 = vshrl.u32 %v797_v9, 16  ;;  %v192_v19 = vshll.u32 %v797_v9, 16  ;;  %v728_v62 = vld [vmem:[%s918_s1 + $0x88] sm:$0xff]   ;;  %v729_v2 = vld [vmem:[%s918_s1] sm:$0xff]  }
  0x13   : > { %v243_v21 = vrot.slane %v799_v12, 2  ;;  %v210_v22 = vrot.slane %v802_v14, 1  ;;  %v197_v23 = vshll.u32 %v802_v14, 16  ;;  %v217_v27 = vrot.slane %v797_v9, 3  ;;  %v726_v63 = vld [vmem:[%s918_s1 + $0x8] sm:$0xff]   ;;  %687 = vmatprep.subr.bf16.mxu1 %v728_v62 }
  0x14   : > { %v194_v25 = vrot.slane %v192_v19, 1  ;;  %v225_v26 = vrot.slane %v190_v18, 3  ;;  %v251_v28 = vshrl.u32 %v795_v8, 16  ;;  %v218_v31 = vrot.slane %v802_v14, 3  ;;  %688 = vmatpush3.bf16.msra.mxu1 %v728_v62 }
  0x15   : > { %660 = vmatpush3.bf16.msra.mxu0 %v718_v15  ;;  %v244_v29 = vsel %vm241_vm0, %v242_v16, %v243_v21  ;;  %v199_v30 = vrot.slane %v197_v23, 1  ;;  %v229_v33 = vrot.slane %v197_v23, 4  ;;  %v254_v35 = vshll.u32 %v795_v8, 16  ;;  %689 = vmatprep.subr.bf16.mxu1 %v730_v1 }
  0x16   : > { %661 = vmatprep.subr.bf16.mxu0 %v719_v20  ;;  %245 = vrot.lane.b32.xlu1 %v244_v29, %s741_s8  ;;  %v195_v32 = vor.u32 %v194_v25, %v190_v18  ;;  %v253_v34 = vrot.slane %v251_v28, 2  ;;  %v211_v37 = vsel %vm208_vm2, %v209_v17, %v210_v22  ;;  %v259_v38 = vshrl.u32 %v799_v12, 16 }
  0x17   : > { %236 = vrot.lane.b32.xlu0 %v630_v13, %s740_s30  ;;  %v262_v39 = vshll.u32 %v799_v12, 16  ;;  %v201_v40 = vshrl.u32 %v802_v14, 16  ;;  %v256_v43 = vrot.slane %v254_v35, 3  ;;  %v226_v44 = vrot.slane %v192_v19, 4 }
  0x18   : > { %v200_v42 = vsel %vm188_vm1, %v195_v32, %v199_v30  ;;  %v261_v45 = vrot.slane %v259_v38, 2  ;;  %v271_v51 = vrot.slane %v795_v8, 3  ;;  %v272_v52 = vrot.slane %v799_v12, 3  ;;  %690 = vmatpush3.bf16.msra.mxu1 %v730_v1 }
  0x19   : > { %662 = vmatpush3.bf16.msra.mxu0 %v720_v24  ;;  %v264_v46 = vrot.slane %v262_v39, 3  ;;  %v228_v47 = vrot.slane %v201_v40, 3  ;;  %v257_v49 = vor.u32 %v256_v43, %v253_v34  ;;  %v227_v50 = vor.u32 %v226_v44, %v225_v26 }
  0x1a   : > { %663 = vmatprep.subr.bf16.mxu0 %v721_v36  ;;  %212 = vrot.lane.b32.xlu1 %v211_v37, %s741_s8  ;;  %v219_v53 = vsel %vm216_vm3, %v217_v27, %v218_v31  ;;  %v273_v57 = vsel %vm216_vm3, %v271_v51, %v272_v52  ;;  %v203_v61 = vor.u32 %v201_v40, %v199_v30 }
  0x1b   : > { %204 = vrot.lane.b32.xlu0 %v200_v42, %s740_s30  ;;  %v265_v54 = vor.u32 %v264_v46, %v261_v45  ;;  %v230_v55 = vor.u32 %v229_v33, %v228_v47  ;;  %691 = vmatprep.mubr.msk.bf16.mxu1 %vm274_vm6, %v273_v57  ;;  %v632_v33 = vld [vmem:[%s919_s2] ss:$0 sm:$0xff] }
  0x1c   : > { %692 = vmatmul.mubr.msk.bf16.vlgmr.msra.gmra.mxu1 %vm274_vm6, %v272_v52 }
  0x1d   : > { %664 = vmatpush3.bf16.msra.mxu0 %v722_v41  ;;  %v266_v58 = vsel %vm249_vm4, %v257_v49, %v265_v54  ;;  %v231_v59 = vsel %vm224_vm5, %v227_v50, %v230_v55 }
  0x1e   : > { %665 = vmatprep.subr.bf16.mxu0 %v723_v48  ;;  %220 = vrot.lane.b32.xlu1 %v219_v53, %s742_s21 }
  0x1f   : > { %267 = vrot.lane.b32.xlu0 %v266_v58, %s742_s21 }
  0x21   : > { %666 = vmatpush3.bf16.msra.mxu0 %v724_v56 }
  0x22   : > { %667 = vmatprep.subr.bf16.mxu0 %v725_v60  ;;  %206 = vrot.lane.b32.xlu1 %v203_v61, %s740_s30  ;;  %s696_s30 = smul.u32 24, %s922_s13 }
  0x23   : > { %247 = vrot.lane.b32.xlu0 %v243_v21, %s741_s8 }
  0x24   : > { %s170_s10 = scalar_lea.vmem %s920_s3, %s696_s30 }
  0x25   : > { %668 = vmatpush3.bf16.msra.mxu0 %v726_v63 }
  0x26   : > { %669 = vmatprep.subr.bf16.mxu0 %v727_v0  ;;  %214 = vrot.lane.b32.xlu1 %v210_v22, %s741_s8 }
  0x27   : > { %269 = vrot.lane.b32.xlu0 %v265_v54, %s742_s21 }
  0x29   : > { %670 = vmatpush3.bf16.msra.mxu0 %v729_v2 }
  0x2a   : > { %222 = vrot.lane.b32.xlu1 %v218_v31, %s742_s21 }
  0x84   : > { %v235_v3 = vpop.permute.xlu0 %234 }
  0x85   : > { %v294_v10 = vsel %vm274_vm6, %v231_v59, %v235_v3 }
  0x88   : > { %v246_v4 = vpop.permute.xlu1 %245 }
  0x89   : > { %v237_v5 = vpop.permute.xlu0 %236  ;;  %v299_v13 = vsel %vm280_vm7, %v294_v10, %v246_v4 }
  0x8a   : > { %v297_v20 = vsel %vm274_vm6, %v230_v55, %v237_v5 }
  0x8c   : > { %v213_v7 = vpop.permute.xlu1 %212 }
  0x8d   : > { %v205_v8 = vpop.permute.xlu0 %204 }
  0x8e   : > { %v276_v11 = vsel %vm274_vm6, %v797_v9, %v205_v8  ;;  %v627_v9 = vcombine.low %v792_v6, %v792_v6 }
  0x8f   : > { %v282_v12 = vsel %vm280_vm7, %v276_v11, %v213_v7 }
  0x90   : > { %v221_v14 = vpop.permute.xlu1 %220 }
  0x91   : > { %v268_v15 = vpop.permute.xlu0 %267  ;;  %v287_v17 = vsel %vm285_vm8, %v282_v12, %v221_v14 }
  0x92   : > { %v303_v16 = vsel %vm285_vm8, %v299_v13, %v268_v15 }
  0x93   : > { %497 = vmatprep.mubr.bf16.mxu0 %v303_v16 }
  0x94   : > { %498 = vmatmul.mubr.bf16.vlgmr.msra.gmra.mxu0 %v287_v17  ;;  %v207_v18 = vpop.permute.xlu1 %206 }
  0x95   : > { %v248_v19 = vpop.permute.xlu0 %247  ;;  %v279_v25 = vsel %vm274_vm6, %v627_v9, %v207_v18 }
  0x96   : > { %v301_v21 = vsel %vm280_vm7, %v297_v20, %v248_v19 }
  0x98   : > { %v215_v22 = vpop.permute.xlu1 %214 }
  0x99   : > { %v270_v23 = vpop.permute.xlu0 %269  ;;  %v284_v26 = vsel %vm280_vm7, %v279_v25, %v215_v22 }
  0x9a   : > { %v306_v24 = vsel %vm285_vm8, %v301_v21, %v270_v23 }
  0x9b   : > { %505 = vmatprep.mubr.bf16.mxu0 %v306_v24 }
  0x9c   : > { %v223_v27 = vpop.permute.xlu1 %222 }
  0x9d   : > { %v290_v28 = vsel %vm285_vm8, %v284_v26, %v223_v27 }
  0x9e   : > { %506 = vmatmul.mubr.bf16.gmra.mxu0 %v290_v28 }
  0xdc   : > { %v693_v29 = vpop.f32.mrf.mxu1 }
  0xde   : > { %v547_v30 = vpop.f32.mrf.mxu1 }
  0xe0   : > { %v694_v31 = vpop.f32.mrf.mxu1 }
  0xe2   : > { %v550_v40 = vpop.f32.mrf.mxu1 }
 0x154   : > { %v671_v6 = vpop.f32.mrf.mxu0 }
 0x156   : > { %v672_v32 = vpop.f32.mrf.mxu0 }
 0x157   : > { %v673_v34 = vadd.f32 %v672_v32, %v671_v6 }
 0x158   : > { %v674_v35 = vpop.f32.mrf.mxu0 }
 0x159   : > { %v500_v36 = vadd.f32 %v673_v34, %v632_v33 }
 0x15a   : > { %v675_v37 = vpop.f32.mrf.mxu0 }
 0x15b   : > { %v676_v38 = vadd.f32 %v675_v37, %v674_v35  ;;  %v548_v39 = vadd.f32 %v547_v30, %v500_v36 }
 0x15d   : > { %561 = vst.msk [vmem:[%s170_s10] sm:$0xff] %vm280_vm7, %v548_v39  ;;  %v503_v41 = vadd.f32 %v676_v38, %v632_v33 }
 0x15e   : > { %v677_v42 = vpop.f32.mrf.mxu0 }
 0x15f   : > { %v551_v43 = vadd.f32 %v550_v40, %v503_v41 }
 0x160   : > { %v678_v44 = vpop.f32.mrf.mxu0 }
 0x161   : > { %562 = vst.msk [vmem:[%s170_s10 + $0x8] sm:$0xff] %vm280_vm7, %v551_v43  ;;  %v679_v45 = vadd.f32 %v678_v44, %v677_v42 }
 0x162   : > { %v680_v46 = vpop.f32.mrf.mxu0 }
 0x163   : > { %v508_v47 = vadd.f32 %v679_v45, %v632_v33 }
 0x164   : > { %v681_v48 = vpop.f32.mrf.mxu0 }
 0x165   : > { %v556_v49 = vadd.f32 %v693_v29, %v508_v47 }
 0x167   : > { %563 = vst.msk [vmem:[%s170_s10 + $0x10] sm:$0xff] %vm280_vm7, %v556_v49 }
 0x168 PF: > { %s13_s12 = sadd.s32 1, %s738_s12  }
 0x169   : > { %p10_p4 = scmp.ge.s32.totalorder %s13_s12, 4  }
 0x16b   :  { %12 = sbr.rel (!%p10_p4) target bundleno = 1 (0x1), region = 62 }

// kernel: cltv_forward.15
= control target key start
LH: loop header
LB: loop body
LE: loop exit
PB: predicated region body
PF: predicated region fallthrough
CT: control target
= control target key end

     0   :  { %vm19_vm0 = vcmask 523264   ;;  %v203_v1 = vmov 0.0   ;;  %vm204_vm1 = vmmov 0   ;;  %s273_s0 = inlined_call_operand.vmem [shape: f32[2,16,64], index: 0, kind: input, shape index: {}]   ;;  %s274_s1 = inlined_call_operand.vmem [shape: f32[64,10], index: 1, kind: input, shape index: {}]   ;;  %s275_s2 = inlined_call_operand.vmem [shape: f32[1,10], index: 2, kind: input, shape index: {}]   ;;  %s276_s3 = inlined_call_operand.hbm [shape: f32[2,10], index: 3, kind: output, shape index: {}]  }
   0x1   :  { %v48_v0 = vld [vmem:[%s274_s1 + $0x38] sm:$0xff]  ;;  %159 = vmatprep.subr.mxu0 %v203_v1  ;;  %v47_v2 = vld [vmem:[%s274_s1 + $0x30] sm:$0xff]  ;;  %175 = vmatprep.mubr.msk.f32.mxu0 %vm204_vm1, %v203_v1  ;;  %v46_v3 = vld [vmem:[%s274_s1 + $0x28] sm:$0xff] }
   0x2   :  { %160 = vmatpush3.msra.mxu0 %v48_v0  ;;  %v15_v4 = vld [vmem:[%s273_s0] sm:$0xff]  ;;  %v16_v5 = vld [vmem:[%s273_s0 + $0x8] sm:$0xff]  ;;  %v17_v6 = vld [vmem:[%s273_s0 + $0x10] sm:$0xff] }
   0x3   :  { %161 = vmatprep.subr.mxu0 %v203_v1  ;;  %v18_v7 = vld [vmem:[%s273_s0 + $0x18] sm:$0xff]  ;;  %v20_v8 = vsel %vm19_vm0, %v15_v4, 0.0  ;;  %v21_v9 = vsel %vm19_vm0, %v16_v5, 0.0  ;;  %v29_v10 = vsel %vm19_vm0, %v17_v6, 0.0  ;;  %v45_v12 = vld [vmem:[%s274_s1 + $0x20] sm:$0xff] }
   0x4   :  { %162 = vmatpush3.msra.mxu0 %v47_v2  ;;  %v30_v11 = vsel %vm19_vm0, %v18_v7, 0.0  ;;  %v22_v13 = vadd.f32 %v21_v9, %v20_v8 }
   0x5   :  { %163 = vmatprep.subr.mxu0 %v203_v1  ;;  %v31_v14 = vadd.f32 %v30_v11, %v29_v10 }
   0x6   :  { %8 = vsyncpa [#allocation3], 0  ;;  %164 = vmatpush3.msra.mxu0 %v46_v3  ;;  %v44_v15 = vld [vmem:[%s274_s1 + $0x18] sm:$0xff]  ;;  %v23_v16 = vrot.slane %v22_v13, 4  ;;  %v43_v18 = vld [vmem:[%s274_s1 + $0x10] sm:$0xff]  ;;  %vm58_vm2 = vcmask 1041409  }
   0x7   :  { %165 = vmatprep.subr.mxu0 %v203_v1  ;;  %v32_v17 = vrot.slane %v31_v14, 4  ;;  %v42_v21 = vld [vmem:[%s274_s1 + $0x8] sm:$0xff]  ;;  %v41_v24 = vld [vmem:[%s274_s1] sm:$0xff]  ;;  %s205_s1 = smov [#allocation2]   ;;  %vm132_vm3 = vcmask 74752  }
   0x8   :  { %166 = vmatpush3.msra.mxu0 %v45_v12  ;;  %v24_v19 = vadd.f32 %v23_v16, %v22_v13  ;;  %v148_v34 = vld [vmem:[%s275_s2] ss:$0 sm:$0xff]  ;;  %s140_s10 = sshll.u32 %s205_s1, 4  ;;  %s141_s10 = int_to_ptr.vmem [resolvable:$true] %s140_s10 }
   0x9   :  { %167 = vmatprep.subr.mxu0 %v203_v1  ;;  %v33_v20 = vadd.f32 %v32_v17, %v31_v14  ;;  %s181_s11 = scalar_lea.vmem %s141_s10, 32  ;;  %p186_p1 = scmp.lt.s32.totalorder %s141_s10, %s141_s10 }
   0xa   :  { %168 = vmatpush3.msra.mxu0 %v44_v15  ;;  %v25_v22 = vrot.slane %v24_v19, 2  ;;  %p182_p0 = scmp.ne.s32.totalorder %s141_s10, %s181_s11  ;;  %p187_p2 = scmp.lt.s32.totalorder %s181_s11, %s181_s11 }
   0xb   :  { %169 = vmatprep.subr.mxu0 %v203_v1  ;;  %v34_v23 = vrot.slane %v33_v20, 2 }
   0xc   :  { %170 = vmatpush3.msra.mxu0 %v43_v18  ;;  %v26_v25 = vadd.f32 %v25_v22, %v24_v19  ;;  %p188_p3 = por %p187_p2, %p186_p1 }
   0xd   :  { %171 = vmatprep.subr.mxu0 %v203_v1  ;;  %v35_v26 = vadd.f32 %v34_v23, %v33_v20 }
   0xe   :  { %172 = vmatpush3.msra.mxu0 %v42_v21  ;;  %v27_v27 = vrot.slane %v26_v25, 1  ;;  %p189_p4 = pnand %p188_p3, %p182_p0 }
   0xf   :  { %173 = vmatprep.subr.mxu0 %v203_v1  ;;  %v36_v28 = vrot.slane %v35_v26, 1 }
  0x10   :  { %174 = vmatpush3.msra.mxu0 %v41_v24  ;;  %v28_v29 = vadd.f32 %v27_v27, %v26_v25 }
  0x11   :  { %v37_v30 = vadd.f32 %v36_v28, %v35_v26 }
  0x12   :  { %v39_v31 = vmul.f32 0.0625, %v28_v29 }
  0x13   :  { %v40_v32 = vmul.f32 0.0625, %v37_v30 }
  0x15   :  { %v59_v33 = vsel %vm58_vm2, %v40_v32, %v39_v31 }
  0x16   :  { %176 = vmatmul.mubr.msk.f32.vlgmr.msra.gmra.mxu0 %vm19_vm0, %v59_v33 }
  0xd6   :  { %v128_v35 = vpop.f32.mrf.mxu0 }
  0xd7   :  { %v129_v36 = vadd.f32 %v148_v34, %v128_v35 }
  0xd8   :  { %v177_v37 = vpop.f32.mrf.mxu0 }
  0xd9   :  { %133 = vst.msk [vmem:[#allocation2] sm:$0x3] %vm132_vm3, %v129_v36 }
  0xda   :  { %192 = shalt.err (!%p189_p4)
}
  0xdb   :  { %143 = dma.vmem_to_hbm [thread:$0]  %s141_s10, 32, %s276_s3, [#allocation3]  }
  0xdc   :  { %201 = dma.done.wait [#allocation3], 32  }
  0xdd   :  { %202 = vsyncadd [#allocation3], 4294967264 }
  0xde   :  { %147 = vsyncpa [#allocation3], 1 }

// kernel: cltv_forward.14
= control target key start
LH: loop header
LB: loop body
LE: loop exit
PB: predicated region body
PF: predicated region fallthrough
CT: control target
= control target key end

     0   :  { %v682_v1 = vmov 0   ;;  %vm98_vm0 = vcmask 523264   ;;  %v48_v39 = vlaneseq  ;;  %s979_s2 = inlined_call_operand.vmem [shape: bf16[64,256], index: 2, kind: input, shape index: {}]   ;;  %s980_s0 = inlined_call_operand.vmem [shape: f32[32,64], index: 0, kind: input, shape index: {}]   ;;  %s981_s1 = inlined_call_operand.vmem [shape: f32[32,64], index: 1, kind: input, shape index: {}]   ;;  %s982_s4 = inlined_call_operand.vmem [shape: bf16[256,64], index: 4, kind: input, shape index: {}]   ;;  %s983_s3 = inlined_call_operand.vmem [shape: f32[1,256], index: 3, kind: input, shape index: {}]   ;;  %s984_s5 = inlined_call_operand.vmem [shape: f32[1,64], index: 5, kind: input, shape index: {}]   ;;  %s985_s6 = inlined_call_operand.vmem [shape: f32[32,64], index: 6, kind: output, shape index: {}]  }
   0x1   :  { %v622_v0 = vld [vmem:[%s979_s2 + $0x34] ss:$8 sps:$4 sm:$0xff]   ;;  %137 = vmatprep.mubr.bf16.mxu0 %v682_v1  ;;  %v624_v2 = vld [vmem:[%s979_s2 + $0x30] ss:$8 sps:$4 sm:$0xff]   ;;  %v625_v3 = vld [vmem:[%s979_s2 + $0x24] ss:$8 sps:$4 sm:$0xff]  }
   0x2   :  { %113 = vmatprep.subr.bf16.mxu0 %v622_v0  ;;  %v627_v4 = vld [vmem:[%s979_s2 + $0x20] ss:$8 sps:$4 sm:$0xff]   ;;  %v628_v5 = vld [vmem:[%s979_s2 + $0x14] ss:$8 sps:$4 sm:$0xff]   ;;  %v630_v6 = vld [vmem:[%s979_s2 + $0x10] ss:$8 sps:$4 sm:$0xff]  }
   0x3   :  { %114 = vmatpush1.bf16.msra.mxu0 %v624_v2  ;;  %v24_v7 = vld [vmem:[%s980_s0] sm:$0xff]  ;;  %v25_v8 = vld [vmem:[%s980_s0 + $0x8] sm:$0xff]  ;;  %v26_v16 = vld [vmem:[%s980_s0 + $0x10] sm:$0xff]  ;;  %v49_v40 = vshrl.u32 %v48_v39, 7 }
   0x4   :  { %115 = vmatprep.subr.bf16.mxu0 %v625_v3  ;;  %v28_v9 = vld [vmem:[%s981_s1] sm:$0xff]  ;;  %v29_v10 = vld [vmem:[%s981_s1 + $0x8] sm:$0xff]  ;;  %v27_v17 = vld [vmem:[%s980_s0 + $0x18] sm:$0xff] }
   0x5   :  { %v631_v11 = vld [vmem:[%s979_s2 + $0x4] ss:$8 sps:$4 sm:$0xff]   ;;  %v751_v12 = vadd.f32 %v28_v9, %v24_v7  ;;  %v753_v13 = vadd.f32 %v29_v10, %v25_v8  ;;  %v633_v14 = vld [vmem:[%s979_s2] ss:$8 sps:$4 sm:$0xff]   ;;  %v30_v18 = vld [vmem:[%s981_s1 + $0x10] sm:$0xff]  ;;  %v50_v41 = vsub.s32 0, %v49_v40 }
   0x6   :  { %v31_v19 = vld [vmem:[%s981_s1 + $0x18] sm:$0xff]  ;;  %v773_v20 = vadd.f32 %v30_v18, %v26_v16  ;;  %v636_v25 = vld [vmem:[%s982_s4 + $0x70] sm:$0xff]   ;;  %v638_v27 = vld [vmem:[%s982_s4 + $0x68] sm:$0xff]   ;;  %v54_v43 = vsub.s32 1, %v49_v40 }
   0x7   :  { %116 = vmatpush1.bf16.msra.mxu0 %v627_v4  ;;  %v36_v15 = vpack.c.bf16 %v753_v13, %v751_v12  ;;  %v775_v21 = vadd.f32 %v31_v19, %v27_v17  ;;  %v634_v23 = vld [vmem:[%s982_s4 + $0x78] sm:$0xff]   ;;  %v637_v26 = vld [vmem:[%s982_s4 + $0x30] sm:$0xff]   ;;  %v639_v28 = vld [vmem:[%s982_s4 + $0x28] sm:$0xff]  }
   0x8   :  { %117 = vmatprep.subr.bf16.mxu0 %v628_v5  ;;  %v635_v24 = vld [vmem:[%s982_s4 + $0x38] sm:$0xff]   ;;  %593 = vmatprep.subr.bf16.mxu1 %v634_v23  ;;  %v640_v29 = vld [vmem:[%s982_s4 + $0x60] sm:$0xff]   ;;  %v644_v33 = vld [vmem:[%s982_s4 + $0x50] sm:$0xff]  }
   0x9   :  { %v37_v22 = vpack.c.bf16 %v775_v21, %v773_v20  ;;  %594 = vmatpush3.bf16.msra.mxu1 %v635_v24  ;;  %v641_v30 = vld [vmem:[%s982_s4 + $0x20] sm:$0xff]   ;;  %v642_v31 = vld [vmem:[%s982_s4 + $0x58] sm:$0xff]   ;;  %v645_v34 = vld [vmem:[%s982_s4 + $0x10] sm:$0xff]  }
   0xa   :  { %595 = vmatprep.subr.bf16.mxu1 %v636_v25  ;;  %v643_v32 = vld [vmem:[%s982_s4 + $0x18] sm:$0xff]   ;;  %v646_v35 = vld [vmem:[%s982_s4 + $0x48] sm:$0xff]   ;;  %v648_v37 = vld [vmem:[%s982_s4 + $0x40] sm:$0xff]  }
   0xb   :  { %118 = vmatpush1.bf16.msra.mxu0 %v630_v6  ;;  %v647_v36 = vld [vmem:[%s982_s4 + $0x8] sm:$0xff]   ;;  %v649_v38 = vld [vmem:[%s982_s4] sm:$0xff]  }
   0xc   :  { %119 = vmatprep.subr.bf16.mxu0 %v631_v11  ;;  %v46_v42 = vld [vmem:[%s983_s3] sm:$0x3] }
   0xd   :  { %596 = vmatpush3.bf16.msra.mxu1 %v637_v26  ;;  %v51_v44 = vrot.slane %v46_v42, %v50_v41  ;;  %v55_v45 = vrot.slane %v46_v42, %v54_v43 }
   0xe   :  { %597 = vmatprep.subr.bf16.mxu1 %v638_v27 }
   0xf   :  { %120 = vmatpush1.bf16.msra.mxu0 %v633_v14 }
  0x11   :  { %598 = vmatpush3.bf16.msra.mxu1 %v639_v28 }
  0x12   :  { %574 = vmatmul.mubr.msk.bf16.vlgmr.msra.gmra.mxu0 %vm98_vm0, %v36_v15  ;;  %599 = vmatprep.subr.bf16.mxu1 %v640_v29 }
  0x13   :  { %147 = vmatprep.mubr.bf16.mxu0 %v682_v1 }
  0x15   :  { %600 = vmatpush3.bf16.msra.mxu1 %v641_v30 }
  0x16   :  { %601 = vmatprep.subr.bf16.mxu1 %v642_v31 }
  0x19   :  { %602 = vmatpush3.bf16.msra.mxu1 %v643_v32 }
  0x1a   :  { %575 = vmatmul.mubr.msk.bf16.gmra.mxu0 %vm98_vm0, %v37_v22  ;;  %603 = vmatprep.subr.bf16.mxu1 %v644_v33 }
  0x1d   :  { %604 = vmatpush3.bf16.msra.mxu1 %v645_v34 }
  0x1e   :  { %605 = vmatprep.subr.bf16.mxu1 %v646_v35 }
  0x21   :  { %606 = vmatpush3.bf16.msra.mxu1 %v647_v36 }
  0x22   :  { %607 = vmatprep.subr.bf16.mxu1 %v648_v37 }
  0x25   :  { %608 = vmatpush3.bf16.msra.mxu1 %v649_v38 }
  0xd2   :  { %v139_v46 = vpop.f32.mrf.mxu0 }
  0xd3   :  { %v831_v47 = vadd.f32 %v139_v46, %v51_v44 }
  0xd4   :  { %v141_v48 = vpop.f32.mrf.mxu0 }
  0xd5   :  { %v834_v49 = vmul.f32 0.70710677, %v831_v47  ;;  %v836_v50 = vadd.f32 %v141_v48, %v55_v45 }
  0xd6   :  { %v143_v51 = vpop.f32.mrf.mxu0 }
  0xd7   :  { %v174_v52 = vand.u32 2147483647, %v834_v49  ;;  %v840_v53 = vmul.f32 0.70710677, %v836_v50  ;;  %v842_v54 = vadd.f32 %v143_v51, %v51_v44  ;;  %vm326_vm1 = vcmp.ge.f32.partialorder %v834_v49, 0.0 }
  0xd8   :  { %v145_v55 = vpop.f32.mrf.mxu0 }
  0xd9   :  { %v182_v56 = vmul.f32 0.3275911, %v174_v52  ;;  %v175_v57 = vand.u32 2147483647, %v840_v53  ;;  %v846_v58 = vmul.f32 0.70710677, %v842_v54  ;;  %v848_v59 = vadd.f32 %v145_v55, %v55_v45 }
  0xda   :  { %v149_v60 = vpop.f32.mrf.mxu0  ;;  %v278_v10 = vsub.f32 0.0, %v174_v52  ;;  %vm327_vm2 = vcmp.ge.f32.partialorder %v840_v53, 0.0 }
  0xdb   :  { %v190_v61 = vadd.f32 1.0, %v182_v56  ;;  %v183_v62 = vmul.f32 0.3275911, %v175_v57  ;;  %v176_v63 = vand.u32 2147483647, %v846_v58  ;;  %v855_v6 = vadd.f32 %v149_v60, %v51_v44 }
  0xdc   :  { %v852_v0 = vmul.f32 0.70710677, %v848_v59  ;;  %v151_v1 = vpop.f32.mrf.mxu0  ;;  %v286_v19 = vmul.f32 %v278_v10, %v174_v52  ;;  %v279_v24 = vsub.f32 0.0, %v175_v57  ;;  %vm328_vm3 = vcmp.ge.f32.partialorder %v846_v58, 0.0 }
  0xdd   :  { %650 = vrcp.f32 %v190_v61  ;;  %v191_v2 = vadd.f32 1.0, %v183_v62  ;;  %v184_v3 = vmul.f32 0.3275911, %v176_v63  ;;  %v857_v7 = vadd.f32 %v151_v1, %v55_v45 }
  0xde   :  { %v177_v4 = vand.u32 2147483647, %v852_v0  ;;  %v153_v5 = vpop.f32.mrf.mxu0  ;;  %v860_v11 = vmul.f32 0.70710677, %v855_v6  ;;  %v280_v25 = vsub.f32 0.0, %v176_v63  ;;  %v287_v34 = vmul.f32 %v279_v24, %v175_v57 }
  0xdf   :  { %652 = vrcp.f32 %v191_v2  ;;  %v192_v8 = vadd.f32 1.0, %v184_v3  ;;  %v864_v17 = vmul.f32 0.70710677, %v857_v7  ;;  %v866_v18 = vadd.f32 %v153_v5, %v51_v44 }
  0xe0   :  { %v185_v9 = vmul.f32 0.3275911, %v177_v4  ;;  %v155_v15 = vpop.f32.mrf.mxu0  ;;  %v178_v16 = vand.u32 2147483647, %v860_v11  ;;  %v294_v31 = vmul.f32 1.442695, %v286_v19  ;;  %v288_v35 = vmul.f32 %v280_v25, %v176_v63 }
  0xe1   :  { %654 = vrcp.f32 %v192_v8  ;;  %v868_v23 = vadd.f32 %v155_v15, %v55_v45  ;;  %v179_v26 = vand.u32 2147483647, %v864_v17  ;;  %v872_v27 = vmul.f32 0.70710677, %v866_v18 }
  0xe2   :  { %v193_v14 = vadd.f32 1.0, %v185_v9  ;;  %v186_v22 = vmul.f32 0.3275911, %v178_v16  ;;  %v281_v40 = vsub.f32 0.0, %v177_v4  ;;  %v282_v44 = vsub.f32 0.0, %v178_v16 }
  0xe3   :  { %v187_v29 = vmul.f32 0.3275911, %v179_v26  ;;  %v180_v30 = vand.u32 2147483647, %v872_v27  ;;  %v876_v32 = vmul.f32 0.70710677, %v868_v23 }
  0xe4   :  { %656 = vrcp.f32 %v193_v14  ;;  %v194_v28 = vadd.f32 1.0, %v186_v22  ;;  %v296_v46 = vmul.f32 1.442695, %v287_v34  ;;  %v298_v48 = vmul.f32 1.442695, %v288_v35 }
  0xe5   :  { %v195_v36 = vadd.f32 1.0, %v187_v29  ;;  %v188_v37 = vmul.f32 0.3275911, %v180_v30  ;;  %v181_v39 = vand.u32 2147483647, %v876_v32  ;;  %v283_v56 = vsub.f32 0.0, %v179_v26 }
  0xe6   :  { %658 = vrcp.f32 %v194_v28  ;;  %v289_v61 = vmul.f32 %v281_v40, %v177_v4  ;;  %v290_v1 = vmul.f32 %v282_v44, %v178_v16  ;;  %v284_v4 = vsub.f32 0.0, %v180_v30 }
  0xe7   :  { %660 = vrcp.f32 %v195_v36  ;;  %v196_v41 = vadd.f32 1.0, %v188_v37  ;;  %v189_v45 = vmul.f32 0.3275911, %v181_v39  ;;  %v291_v9 = vmul.f32 %v283_v56, %v179_v26 }
  0xe8   :  { %662 = vpow2.f32 %v294_v31  ;;  %v300_v15 = vmul.f32 1.442695, %v289_v61  ;;  %v302_v16 = vmul.f32 1.442695, %v290_v1  ;;  %v898_v28 = vmul.f32 0.5, %v836_v50 }
  0xe9   :  { %664 = vrcp.f32 %v196_v41  ;;  %v197_v57 = vadd.f32 1.0, %v189_v45  ;;  %v285_v31 = vsub.f32 0.0, %v181_v39  ;;  %v304_v36 = vmul.f32 1.442695, %v291_v9 }
  0xea   :  { %v878_v33 = vpop.eup %650  ;;  %v292_v40 = vmul.f32 %v284_v4, %v180_v30  ;;  %vm329_vm4 = vcmp.ge.f32.partialorder %v852_v0, 0.0  ;;  %vm331_vm5 = vcmp.ge.f32.partialorder %v864_v17, 0.0  ;;  %vm330_vm6 = vcmp.ge.f32.partialorder %v860_v11, 0.0 }
  0xeb   :  { %v206_v38 = vmul.f32 1.0614054, %v878_v33  ;;  %666 = vrcp.f32 %v197_v57  ;;  %vm332_vm7 = vcmp.ge.f32.partialorder %v872_v27, 0.0  ;;  %vm333_vm8 = vcmp.ge.f32.partialorder %v876_v32, 0.0 }
  0xec   :  { %v882_v42 = vpop.eup %652  ;;  %668 = vpow2.f32 %v296_v46  ;;  %v306_v1 = vmul.f32 1.442695, %v292_v40  ;;  %v164_v17 = vmul.f32 0.5, %v866_v18  ;;  %v163_v11 = vmul.f32 0.5, %v857_v7  ;;  %v576_v18 = vld [vmem:[%s984_s5] ss:$0 sm:$0xff] }
  0xed   :  { %v214_v43 = vadd.f32 -1.4531521, %v206_v38  ;;  %v207_v51 = vmul.f32 1.0614054, %v882_v42  ;;  %670 = vpow2.f32 %v298_v48 }
  0xee   :  { %v885_v52 = vpop.eup %654  ;;  %672 = vpow2.f32 %v300_v15 }
  0xef   :  { %v222_v55 = vmul.f32 %v878_v33, %v214_v43  ;;  %v208_v60 = vmul.f32 1.0614054, %v885_v52  ;;  %v215_v62 = vadd.f32 -1.4531521, %v207_v51  ;;  %674 = vpow2.f32 %v302_v16 }
  0xf0   :  { %v293_v51 = vmul.f32 %v285_v31, %v181_v39  ;;  %676 = vpow2.f32 %v304_v36 }
  0xf1   :  { %v230_v63 = vadd.f32 1.4214138, %v222_v55  ;;  %v889_v2 = vpop.eup %656  ;;  %v216_v3 = vadd.f32 -1.4531521, %v208_v60  ;;  %v223_v5 = vmul.f32 %v882_v42, %v215_v62  ;;  %678 = vpow2.f32 %v306_v1 }
  0xf2   :  { %v209_v10 = vmul.f32 1.0614054, %v889_v2  ;;  %v308_v15 = vmul.f32 1.442695, %v293_v51 }
  0xf3   :  { %v238_v8 = vmul.f32 %v878_v33, %v230_v63  ;;  %v224_v14 = vmul.f32 %v885_v52, %v216_v3  ;;  %v231_v19 = vadd.f32 1.4214138, %v223_v5  ;;  %v895_v25 = vpop.eup %658 }
  0xf4   :  { %v217_v24 = vadd.f32 -1.4531521, %v209_v10  ;;  %v210_v35 = vmul.f32 1.0614054, %v895_v25  ;;  %v905_v43 = vpop.eup %660  ;;  %680 = vpow2.f32 %v308_v15 }
  0xf5   :  { %v246_v22 = vadd.f32 -0.28449672, %v238_v8  ;;  %v232_v29 = vadd.f32 1.4214138, %v224_v14  ;;  %v239_v34 = vmul.f32 %v882_v42, %v231_v19  ;;  %v211_v48 = vmul.f32 1.0614054, %v905_v43  ;;  %v663_v56 = vpop.eup %662 }
  0xf6   :  { %v225_v37 = vmul.f32 %v889_v2, %v217_v24  ;;  %v218_v44 = vadd.f32 -1.4531521, %v210_v35  ;;  %v912_v61 = vpop.eup %664 }
  0xf7   :  { %v254_v26 = vmul.f32 %v878_v33, %v246_v22  ;;  %v240_v38 = vmul.f32 %v885_v52, %v232_v29  ;;  %v247_v41 = vadd.f32 -0.28449672, %v239_v34  ;;  %v219_v63 = vadd.f32 -1.4531521, %v211_v48 }
  0xf8   :  { %v233_v45 = vadd.f32 1.4214138, %v225_v37  ;;  %v226_v60 = vmul.f32 %v895_v25, %v218_v44  ;;  %v212_v39 = vmul.f32 1.0614054, %v912_v61  ;;  %v916_v10 = vpop.eup %666 }
  0xf9   :  { %v262_v50 = vadd.f32 0.2548296, %v254_v26  ;;  %v248_v46 = vadd.f32 -0.28449672, %v240_v38  ;;  %v255_v55 = vmul.f32 %v882_v42, %v247_v41  ;;  %v227_v14 = vmul.f32 %v905_v43, %v219_v63  ;;  %v669_v19 = vpop.eup %668 }
  0xfa   :  { %v241_v30 = vmul.f32 %v889_v2, %v233_v45  ;;  %v234_v8 = vadd.f32 1.4214138, %v226_v60  ;;  %v220_v24 = vadd.f32 -1.4531521, %v212_v39  ;;  %v213_v29 = vmul.f32 1.0614054, %v916_v10  ;;  %v671_v31 = vpop.eup %670 }
  0xfb   :  { %v270_v57 = vmul.f32 %v878_v33, %v262_v50  ;;  %v256_v62 = vmul.f32 %v885_v52, %v248_v46  ;;  %v263_v3 = vadd.f32 0.2548296, %v255_v55  ;;  %v235_v26 = vadd.f32 1.4214138, %v227_v14 }
  0xfc   :  { %v249_v9 = vadd.f32 -0.28449672, %v241_v30  ;;  %v242_v16 = vmul.f32 %v895_v25, %v234_v8  ;;  %v228_v38 = vmul.f32 %v912_v61, %v220_v24 }
  0xfd   :  { %v310_v5 = vmul.f32 %v663_v56, %v270_v57  ;;  %v264_v33 = vadd.f32 0.2548296, %v256_v62  ;;  %v271_v4 = vmul.f32 %v882_v42, %v263_v3  ;;  %v221_v42 = vadd.f32 -1.4531521, %v213_v29  ;;  %v673_v57 = vpop.eup %672 }
  0xfe   :  { %v257_v35 = vmul.f32 %v889_v2, %v249_v9  ;;  %v250_v37 = vadd.f32 -0.28449672, %v242_v16  ;;  %v243_v41 = vmul.f32 %v905_v43, %v235_v26  ;;  %v236_v46 = vadd.f32 1.4214138, %v228_v38  ;;  %v675_v1 = vpop.eup %674 }
  0xff   :  { %v318_v22 = vsub.f32 1.0, %v310_v5  ;;  %v272_v34 = vmul.f32 %v885_v52, %v264_v33  ;;  %v311_v36 = vmul.f32 %v669_v19, %v271_v4  ;;  %v229_v48 = vmul.f32 %v916_v10, %v221_v42  ;;  %v677_v33 = vpop.eup %676 }
 0x100   :  { %v265_v50 = vadd.f32 0.2548296, %v257_v35  ;;  %v258_v45 = vmul.f32 %v895_v25, %v250_v37  ;;  %v251_v55 = vadd.f32 -0.28449672, %v243_v41  ;;  %v244_v30 = vmul.f32 %v912_v61, %v236_v46 }
 0x101   :  { %v312_v40 = vmul.f32 %v671_v31, %v272_v34  ;;  %v319_v44 = vsub.f32 1.0, %v311_v36  ;;  %v334_v52 = vsub.f32 0.0, %v318_v22  ;;  %v237_v62 = vadd.f32 1.4214138, %v229_v48 }
 0x102   :  { %v273_v56 = vmul.f32 %v889_v2, %v265_v50  ;;  %v266_v60 = vadd.f32 0.2548296, %v258_v45  ;;  %v259_v5 = vmul.f32 %v905_v43, %v251_v55  ;;  %v252_v9 = vadd.f32 -0.28449672, %v244_v30  ;;  %v679_v50 = vpop.eup %678 }
 0x103   :  { %v320_v51 = vsub.f32 1.0, %v312_v40  ;;  %v335_v63 = vsub.f32 0.0, %v319_v44  ;;  %v245_v2 = vmul.f32 %v916_v10, %v237_v62  ;;  %v342_v16 = vsel %vm326_vm1, %v318_v22, %v334_v52 }
 0x104   :  { %v313_v8 = vmul.f32 %v673_v57, %v273_v56  ;;  %v274_v39 = vmul.f32 %v895_v25, %v266_v60  ;;  %v267_v15 = vadd.f32 0.2548296, %v259_v5  ;;  %v260_v24 = vmul.f32 %v912_v61, %v252_v9 }
 0x105   :  { %v336_v3 = vsub.f32 0.0, %v320_v51  ;;  %v343_v19 = vsel %vm327_vm2, %v319_v44, %v335_v63  ;;  %v253_v29 = vadd.f32 -0.28449672, %v245_v2  ;;  %v160_v31 = vmul.f32 0.5, %v842_v54 }
 0x106   :  { %v321_v4 = vsub.f32 1.0, %v313_v8  ;;  %v314_v53 = vmul.f32 %v675_v1, %v274_v39  ;;  %v275_v25 = vmul.f32 %v905_v43, %v267_v15  ;;  %v268_v26 = vadd.f32 0.2548296, %v260_v24 }
 0x107   :  { %v344_v14 = vsel %vm328_vm3, %v320_v51, %v336_v3  ;;  %v261_v35 = vmul.f32 %v916_v10, %v253_v29  ;;  %v351_v36 = vadd.f32 1.0, %v343_v19  ;;  %v350_v37 = vadd.f32 1.0, %v342_v16  ;;  %v681_v51 = vpop.eup %680 }
 0x108   :  { %v352_v58 = vadd.f32 1.0, %v344_v14  ;;  %v337_v34 = vsub.f32 0.0, %v321_v4  ;;  %v322_v38 = vsub.f32 1.0, %v314_v53  ;;  %v315_v49 = vmul.f32 %v677_v33, %v275_v25 }
 0x109   :  { %v161_v42 = vmul.f32 0.5, %v848_v59  ;;  %v276_v40 = vmul.f32 %v912_v61, %v268_v26  ;;  %v269_v41 = vadd.f32 0.2548296, %v261_v35  ;;  %v158_v43 = vmul.f32 0.5, %v831_v47 }
 0x10a   :  { %v345_v22 = vsel %vm329_vm4, %v321_v4, %v337_v34  ;;  %v360_v44 = vmul.f32 %v352_v58, %v160_v31  ;;  %v323_v45 = vsub.f32 1.0, %v315_v49  ;;  %v359_v48 = vmul.f32 %v351_v36, %v898_v28 }
 0x10b   :  { %v353_v54 = vadd.f32 1.0, %v345_v22  ;;  %v316_v0 = vmul.f32 %v679_v50, %v276_v40  ;;  %v277_v46 = vmul.f32 %v916_v10, %v269_v41  ;;  %v358_v55 = vmul.f32 %v350_v37, %v158_v43 }
 0x10c   :  { %v338_v56 = vsub.f32 0.0, %v322_v38  ;;  %v339_v57 = vsub.f32 0.0, %v323_v45  ;;  %v165_v9 = vmul.f32 0.5, %v868_v23  ;;  %v162_v33 = vmul.f32 0.5, %v855_v6 }
 0x10d   :  { %v361_v52 = vmul.f32 %v353_v54, %v161_v42  ;;  %v324_v59 = vsub.f32 1.0, %v316_v0  ;;  %v317_v60 = vmul.f32 %v681_v51, %v277_v46  ;;  %v366_v30 = vpack.c.bf16 %v360_v44, %v358_v55 }
 0x10e   :  { %v347_v47 = vsel %vm331_vm5, %v323_v45, %v339_v57  ;;  %v346_v10 = vsel %vm330_vm6, %v322_v38, %v338_v56 }
 0x10f   :  { %v367_v61 = vpack.c.bf16 %v361_v52, %v359_v48  ;;  %v340_v62 = vsub.f32 0.0, %v324_v59  ;;  %v325_v63 = vsub.f32 1.0, %v317_v60  ;;  %v355_v3 = vadd.f32 1.0, %v347_v47 }
 0x110   :  { %v354_v8 = vadd.f32 1.0, %v346_v10 }
 0x111   :  { %537 = vmatprep.mubr.bf16.mxu1 %v367_v61  ;;  %v348_v28 = vsel %vm332_vm7, %v324_v59, %v340_v62  ;;  %v341_v1 = vsub.f32 0.0, %v325_v63  ;;  %v363_v27 = vmul.f32 %v355_v3, %v163_v11 }
 0x112   :  { %538 = vmatmul.mubr.bf16.vlgmr.msra.gmra.mxu1 %v366_v30  ;;  %v356_v5 = vadd.f32 1.0, %v348_v28  ;;  %v362_v4 = vmul.f32 %v354_v8, %v162_v33 }
 0x113   :  { %v349_v39 = vsel %vm333_vm8, %v325_v63, %v341_v1 }
 0x114   :  { %v357_v2 = vadd.f32 1.0, %v349_v39  ;;  %v364_v14 = vmul.f32 %v356_v5, %v164_v17 }
 0x116   :  { %v365_v15 = vmul.f32 %v357_v2, %v165_v9  ;;  %v368_v16 = vpack.c.bf16 %v364_v14, %v362_v4 }
 0x118   :  { %v369_v19 = vpack.c.bf16 %v365_v15, %v363_v27 }
 0x11a   :  { %545 = vmatprep.mubr.bf16.mxu1 %v369_v19 }
 0x11b   :  { %546 = vmatmul.mubr.bf16.gmra.mxu1 %v368_v16 }
 0x1d2   :  { %v609_v32 = vpop.f32.mrf.mxu1 }
 0x1d4   :  { %v610_v53 = vpop.f32.mrf.mxu1 }
 0x1d5   :  { %v611_v7 = vadd.f32 %v610_v53, %v609_v32 }
 0x1d6   :  { %v612_v24 = vpop.f32.mrf.mxu1 }
 0x1d7   :  { %v540_v23 = vadd.f32 %v611_v7, %v576_v18 }
 0x1d8   :  { %v613_v29 = vpop.f32.mrf.mxu1 }
 0x1d9   :  { %v554_v6 = vadd.f32 %v540_v23, %v751_v12  ;;  %v614_v31 = vadd.f32 %v613_v29, %v612_v24 }
 0x1db   :  { %558 = vst.msk [vmem:[%s985_s6] sm:$0xff] %vm98_vm0, %v554_v6  ;;  %v543_v58 = vadd.f32 %v614_v31, %v576_v18  ;;  %v615_v34 = vpop.f32.mrf.mxu1 }
 0x1dd   :  { %v555_v25 = vadd.f32 %v543_v58, %v753_v13  ;;  %v616_v26 = vpop.f32.mrf.mxu1 }
 0x1de   :  { %v617_v35 = vadd.f32 %v616_v26, %v615_v34 }
 0x1df   :  { %559 = vst.msk [vmem:[%s985_s6 + $0x8] sm:$0xff] %vm98_vm0, %v555_v25  ;;  %v618_v36 = vpop.f32.mrf.mxu1 }
 0x1e0   :  { %v548_v37 = vadd.f32 %v617_v35, %v576_v18 }
 0x1e1   :  { %v619_v12 = vpop.f32.mrf.mxu1 }
 0x1e2   :  { %v556_v38 = vadd.f32 %v548_v37, %v773_v20  ;;  %v620_v49 = vadd.f32 %v619_v12, %v618_v36 }
 0x1e4   :  { %560 = vst.msk [vmem:[%s985_s6 + $0x10] sm:$0xff] %vm98_vm0, %v556_v38  ;;  %v551_v13 = vadd.f32 %v620_v49, %v576_v18 }
 0x1e6   :  { %v557_v22 = vadd.f32 %v551_v13, %v775_v21 }
 0x1e8   :  { %561 = vst.msk [vmem:[%s985_s6 + $0x18] sm:$0xff] %vm98_vm0, %v557_v22 }

</bundles_post_ra>
